<compile_context>
chip_gen: v7x
topology: tpu7x:2x2x1
jax: 0.10.0
libtpu: 0.0.40
codegen_flags: <defaults>
</compile_context>

<pallas_src>
import jax
import jax.numpy as jnp
from jax.experimental import pallas as pl
from jax.experimental.pallas import tpu as pltpu

# ----------------------------- model configuration -----------------------------
BATCH       = 2
IN_CH       = 3
IMG         = 32
P           = 16                 # patch size
GRID_H      = IMG // P
GRID_W      = IMG // P
N_PATCH     = GRID_H * GRID_W    # 4
N_TOK       = N_PATCH + 1        # +CLS = 5
N_PAD       = 8                  # token axis padded to a full sublane
CPP         = IN_CH * P * P      # 768 flattened patch features
D           = 64                 # embed dim (scaled down from 768)
NUM_HEADS   = 4
HEAD_DIM    = D // NUM_HEADS     # 16
MLP_DIM     = 4 * D              # 256
DEPTH       = 2                  # scaled down from 12
H1          = 1024               # classifier hidden 1 (as in the module)
H2          = 512                # classifier hidden 2 (as in the module)
NUM_CLASSES = 3
OUT_PAD     = 128                # lane-dense logits store, sliced to 3 in the wrapper
SCALE       = 1.0 / (HEAD_DIM ** 0.5)
LN_EPS      = 1e-6               # timm ViT LayerNorm eps
BN_EPS      = 1e-5               # nn.BatchNorm1d default eps


# ----------------------------- in-kernel helpers -----------------------------
def _layer_norm(x, g, b, eps=LN_EPS):
    mu = jnp.mean(x, axis=-1, keepdims=True)
    var = jnp.mean(jnp.square(x - mu), axis=-1, keepdims=True)
    return (x - mu) * jax.lax.rsqrt(var + eps) * g + b


def _gelu(x):
    # TODO(synk): timm ViT uses exact erf-GELU; tanh approximation used here (EUP-friendly).
    return 0.5 * x * (1.0 + jnp.tanh(0.7978845608028654 * (x + 0.044715 * x * x * x)))


def _encoder_block(x2d, kbias,
                   ln1g, ln1b, wqkv, bqkv, wproj, bproj,
                   ln2g, ln2b, w1, b1, w2, b2):
    """Pre-norm transformer block on the flattened (BATCH*N_PAD, D) token matrix."""
    bf16, f32 = jnp.bfloat16, jnp.float32

    # --- multi-head self attention, fused QKV projection (lane-dense (., 3D)) ---
    xn = _layer_norm(x2d, ln1g, ln1b)
    qkv = jnp.dot(xn.astype(bf16), wqkv, preferred_element_type=f32) + bqkv   # (B*N_PAD, 3D)
    qkv3 = qkv.reshape(BATCH, N_PAD, 3 * D)

    # Stack all heads along the leading (batch) axis -> ONE batched contraction pair,
    # ONE masked softmax, ONE p@v for all heads (no per-head MXU push/pop unroll).
    def _heads(off):
        return jnp.concatenate(
            [qkv3[:, :, off + h * HEAD_DIM: off + (h + 1) * HEAD_DIM]
             for h in range(NUM_HEADS)], axis=0)             # (NUM_HEADS*BATCH, N_PAD, HD)

    qh = _heads(0).astype(bf16)
    kh = _heads(D).astype(bf16)
    vh = _heads(2 * D).astype(bf16)

    s = jnp.einsum('bqd,bkd->bqk', qh, kh, preferred_element_type=f32) * SCALE
    s = s + kbias                                            # mask padded key positions
    s = s - jnp.max(s, axis=-1, keepdims=True)               # softmax stabilization
    p = jnp.exp(s)
    p = p * pl.reciprocal(jnp.sum(p, axis=-1, keepdims=True), approx=True)
    ctx_h = jnp.einsum('bqk,bkd->bqd', p.astype(bf16), vh,
                       preferred_element_type=f32)           # (NUM_HEADS*BATCH, N_PAD, HD)

    ctx = jnp.concatenate([ctx_h[h * BATCH:(h + 1) * BATCH] for h in range(NUM_HEADS)],
                          axis=-1).reshape(BATCH * N_PAD, D)
    attn = jnp.dot(ctx.astype(bf16), wproj, preferred_element_type=f32) + bproj
    x2d = x2d + attn

    # --- MLP ---
    xn2 = _layer_norm(x2d, ln2g, ln2b)
    h1 = jnp.dot(xn2.astype(bf16), w1, preferred_element_type=f32) + b1
    h1 = _gelu(h1)
    h2 = jnp.dot(h1.astype(bf16), w2, preferred_element_type=f32) + b2
    return x2d + h2


# ----------------------------- the pipelined Pallas kernel -----------------------------
def vit_fused_kernel(
        # constant-index inputs (needed at step 0)
        patches_ref, patch_w_ref, pos_ref, kmask_ref,
        # per-block weights, stacked along a leading DEPTH axis, streamed per grid step
        ln1g_ref, ln1b_ref, wqkv_ref, bqkv_ref, wproj_ref, bproj_ref,
        ln2g_ref, ln2b_ref, wfc1_ref, bfc1_ref, wfc2_ref, bfc2_ref,
        # classifier-head small vectors (tiny; fetched at prologue)
        lnfg_ref, lnfb_ref, hb1_ref, bnsc_ref, bnsh_ref, hb2_ref, hb3_ref,
        # classifier-head matrices, left in HBM and manually DMA'd (overlaps block compute)
        hw1_hbm, hw2_hbm, hw3_hbm,
        # output
        o_ref,
        # scratch
        x_scr, hw1_buf, hw2_buf, hw3_buf, head_sem):
    step = pl.program_id(0)

    # ---- step 0: kick off head-weight DMAs, then patch embedding + pos ----
    @pl.when(step == 0)
    def _():
        pltpu.make_async_copy(hw1_hbm, hw1_buf, head_sem.at[0]).start()
        pltpu.make_async_copy(hw2_hbm, hw2_buf, head_sem.at[1]).start()
        pltpu.make_async_copy(hw3_hbm, hw3_buf, head_sem.at[2]).start()
        # Conv2d(k=16, s=16) as one matmul over the zero-padded token slab; CLS token,
        # conv bias and positional embedding are pre-folded into pos_ref by the wrapper.
        emb = jnp.dot(patches_ref[...], patch_w_ref[...],
                      preferred_element_type=jnp.float32)     # (BATCH*N_PAD, D)
        x_scr[...] = emb + pos_ref[...]

    # ---- steps 0..DEPTH-1: encoder block `step` on the resident activation slab ----
    @pl.when(step < DEPTH)
    def _():
        kbias = kmask_ref[...].reshape(1, 1, N_PAD)           # 0 real / -1e30 padded keys
        x_scr[...] = _encoder_block(
            x_scr[...], kbias,
            ln1g_ref[0], ln1b_ref[0], wqkv_ref[0], bqkv_ref[0],
            wproj_ref[0], bproj_ref[0], ln2g_ref[0], ln2b_ref[0],
            wfc1_ref[0], bfc1_ref[0], wfc2_ref[0], bfc2_ref[0])

    # ---- final step: final LayerNorm + classifier head ----
    @pl.when(step == DEPTH)
    def _():
        pltpu.make_async_copy(hw1_hbm, hw1_buf, head_sem.at[0]).wait()
        pltpu.make_async_copy(hw2_hbm, hw2_buf, head_sem.at[1]).wait()
        pltpu.make_async_copy(hw3_hbm, hw3_buf, head_sem.at[2]).wait()
        bf16, f32 = jnp.bfloat16, jnp.float32
        # Run the head on the full 16-row token slab (same MXU passes as 2 rows, full-
        # sublane unmasked store); CLS rows are sliced out by the wrapper.
        fn = _layer_norm(x_scr[...], lnfg_ref[...], lnfb_ref[...])
        h = jnp.dot(fn.astype(bf16), hw1_buf[...], preferred_element_type=f32) + hb1_ref[...]
        h = jnp.maximum(h, 0.0)                               # ReLU
        h = h * bnsc_ref[...] + bnsh_ref[...]                 # folded BatchNorm1d (eval)
        # Dropout(p=0.7): identity at inference
        h = jnp.dot(h.astype(bf16), hw2_buf[...], preferred_element_type=f32) + hb2_ref[...]
        h = jnp.maximum(h, 0.0)                               # ReLU
        # Dropout(p=0.5): identity at inference
        out = jnp.dot(h.astype(bf16), hw3_buf[...], preferred_element_type=f32) + hb3_ref[...]
        o_ref[...] = out.astype(o_ref.dtype)                  # (BATCH*N_PAD, OUT_PAD)


# ----------------------------- BlockSpec helpers -----------------------------
def _const_spec(shape):
    nd = len(shape)
    return pl.BlockSpec(tuple(shape), lambda d, _nd=nd: (0,) * _nd)


def _blk_spec(shape):
    # shape = (DEPTH, rows, cols); step d uses block d; the final (head) step clamps to
    # DEPTH-1 so the block index does not change -> no extra DMA on the last step.
    blk = (1,) + tuple(shape[1:])
    return pl.BlockSpec(blk, lambda d: (jnp.minimum(d, DEPTH - 1), 0, 0))


# ----------------------------- forward wrapper -----------------------------
def vit_model_forward(x, p):
    Bn = x.shape[0]
    assert Bn == BATCH
    # Patch extraction (layout plumbing done once by XLA): NCHW -> (B, N_PATCH, C*P*P),
    # flattened in (C, ph, pw) order == PyTorch Conv2d weight flatten order. Zero rows are
    # inserted at the CLS / pad token positions so the kernel's patch matmul directly
    # produces the full (B*N_PAD, D) token slab.
    xp = x.reshape(Bn, IN_CH, GRID_H, P, GRID_W, P)
    xp = jnp.transpose(xp, (0, 2, 4, 1, 3, 5))
    patches = xp.reshape(Bn, N_PATCH, CPP)
    patches_pad = jnp.zeros((Bn, N_PAD, CPP), jnp.float32).at[:, 1:N_TOK].set(patches)
    patches_pad = patches_pad.reshape(Bn * N_PAD, CPP).astype(jnp.bfloat16)

    args = [patches_pad, p["patch_w"], p["pos_full"], p["kmask"],
            p["ln1g"], p["ln1b"], p["wqkv"], p["bqkv"], p["wproj"], p["bproj"],
            p["ln2g"], p["ln2b"], p["wfc1"], p["bfc1"], p["wfc2"], p["bfc2"],
            p["lnfg"], p["lnfb"], p["hb1"], p["bnsc"], p["bnsh"], p["hb2"], p["hb3"],
            p["hw1"], p["hw2"], p["hw3"]]

    in_specs = ([_const_spec(a.shape) for a in args[:4]]
                + [_blk_spec(a.shape) for a in args[4:16]]
                + [_const_spec(a.shape) for a in args[16:23]]
                + [pl.BlockSpec(memory_space=pl.ANY)] * 3)

    out_pad = pl.pallas_call(
        vit_fused_kernel,
        grid=(DEPTH + 1,),
        in_specs=in_specs,
        out_specs=_const_spec((Bn * N_PAD, OUT_PAD)),
        out_shape=jax.ShapeDtypeStruct((Bn * N_PAD, OUT_PAD), jnp.float32),
        scratch_shapes=[
            pltpu.VMEM((Bn * N_PAD, D), jnp.float32),    # activation carry across steps
            pltpu.VMEM((D, H1), jnp.bfloat16),           # head weight buffers (manual DMA)
            pltpu.VMEM((H1, H2), jnp.bfloat16),
            pltpu.VMEM((H2, OUT_PAD), jnp.bfloat16),
            pltpu.SemaphoreType.DMA((3,)),
        ],
        compiler_params=pltpu.CompilerParams(dimension_semantics=("arbitrary",)),
    )(*args)
    # CLS rows are at token index 0 of each batch's 8-token slab; first 3 lanes are logits.
    return out_pad[0::N_PAD, :NUM_CLASSES]


# ----------------------------- deterministic parameter init -----------------------------
def init_params(key):
    keys = iter(jax.random.split(key, 64))
    nrm = lambda shape: 0.02 * jax.random.normal(next(keys), shape, jnp.float32)
    zeros = lambda shape: jnp.zeros(shape, jnp.float32)
    ones = lambda shape: jnp.ones(shape, jnp.float32)

    def block_params():
        return {
            "ln1_g": ones((1, D)), "ln1_b": zeros((1, D)),
            "wq": nrm((D, D)), "bq": zeros((1, D)),
            "wk": nrm((D, D)), "bk": zeros((1, D)),
            "wv": nrm((D, D)), "bv": zeros((1, D)),
            "wp": nrm((D, D)), "bp": zeros((1, D)),
            "ln2_g": ones((1, D)), "ln2_b": zeros((1, D)),
            "w_fc1": nrm((D, MLP_DIM)), "b_fc1": zeros((1, MLP_DIM)),
            "w_fc2": nrm((MLP_DIM, D)), "b_fc2": zeros((1, D)),
        }

    return {
        "patch_w": nrm((CPP, D)), "patch_b": zeros((1, D)),
        "cls": nrm((1, 1, D)), "pos": nrm((1, N_TOK, D)),
        "blocks": [block_params() for _ in range(DEPTH)],
        "ln_f_g": ones((1, D)), "ln_f_b": zeros((1, D)),
        "head_w1": nrm((D, H1)), "head_b1": zeros((1, H1)),
        "bn_g": ones((1, H1)), "bn_b": zeros((1, H1)),
        "bn_m": zeros((1, H1)), "bn_v": ones((1, H1)),
        "head_w2": nrm((H1, H2)), "head_b2": zeros((1, H2)),
        "head_w3": nrm((H2, NUM_CLASSES)), "head_b3": zeros((1, NUM_CLASSES)),
    }


def prepare_params(params):
    """Fuse QKV, stack per-block weights along DEPTH, fold BatchNorm + conv-bias/CLS/pos,
    pad the logits weights lane-dense, cast all matmul weights to bf16."""
    f32, bf16 = jnp.float32, jnp.bfloat16

    # CLS + conv bias + positional embedding folded into one additive table over the
    # padded token slab (padded rows stay zero), tiled over batch.
    pos = params["pos"][0]                                       # (N_TOK, D)
    patch_b = params["patch_b"][0]                               # (D,)
    pos_pad = jnp.zeros((N_PAD, D), f32)
    pos_pad = pos_pad.at[0].set(pos[0] + params["cls"][0, 0])    # CLS row (no conv bias)
    pos_pad = pos_pad.at[1:N_TOK].set(pos[1:] + patch_b)         # patch rows (+conv bias)
    pos_full = jnp.tile(pos_pad, (BATCH, 1))                     # (BATCH*N_PAD, D)

    # Attention bias masking the padded key positions.
    kmask = jnp.where(jnp.arange(N_PAD) < N_TOK, 0.0, -1e30).astype(f32).reshape(1, N_PAD)

    blocks = params["blocks"]

    def stack(name, cast=None):
        arr = jnp.stack([bp[name] for bp in blocks], axis=0)     # (DEPTH, ...)
        return arr.astype(cast) if cast is not None else arr

    wqkv = jnp.stack([jnp.concatenate([bp["wq"], bp["wk"], bp["wv"]], axis=1)
                      for bp in blocks], axis=0).astype(bf16)    # (DEPTH, D, 3D)
    bqkv = jnp.stack([jnp.concatenate([bp["bq"], bp["bk"], bp["bv"]], axis=1)
                      for bp in blocks], axis=0)                 # (DEPTH, 1, 3D)

    # BatchNorm1d (eval) folded into scale/shift.
    bn_scale = params["bn_g"] * jax.lax.rsqrt(params["bn_v"] + BN_EPS)
    bn_shift = params["bn_b"] - params["bn_m"] * bn_scale

    # Final Linear padded to a lane-dense 128-wide output.
    w3p = jnp.zeros((H2, OUT_PAD), f32).at[:, :NUM_CLASSES].set(params["head_w3"]).astype(bf16)
    b3p = jnp.zeros((1, OUT_PAD), f32).at[:, :NUM_CLASSES].set(params["head_b3"])

    return {
        "patch_w": params["patch_w"].astype(bf16),
        "pos_full": pos_full, "kmask": kmask,
        "ln1g": stack("ln1_g"), "ln1b": stack("ln1_b"),
        "wqkv": wqkv, "bqkv": bqkv,
        "wproj": stack("wp", bf16), "bproj": stack("bp"),
        "ln2g": stack("ln2_g"), "ln2b": stack("ln2_b"),
        "wfc1": stack("w_fc1", bf16), "bfc1": stack("b_fc1"),
        "wfc2": stack("w_fc2", bf16), "bfc2": stack("b_fc2"),
        "lnfg": params["ln_f_g"], "lnfb": params["ln_f_b"],
        "hb1": params["head_b1"], "bnsc": bn_scale, "bnsh": bn_shift,
        "hb2": params["head_b2"], "hb3": b3p,
        "hw1": params["head_w1"].astype(bf16),
        "hw2": params["head_w2"].astype(bf16),
        "hw3": w3p,
    }


# ----------------------------- main -----------------------------
if __name__ == "__main__":
    key = jax.random.PRNGKey(0)
    kx, kp = jax.random.split(key)
    x = jax.random.normal(kx, (BATCH, IN_CH, IMG, IMG), jnp.float32)   # NCHW, like PyTorch
    params = init_params(kp)
    flat_params = prepare_params(params)

    logits = jax.jit(vit_model_forward)(x, flat_params)
    logits = jax.block_until_ready(logits)

    assert logits.shape == (BATCH, NUM_CLASSES)
    assert logits.dtype == jnp.float32
    assert bool(jnp.all(jnp.isfinite(logits)))
    print("KERNEL_OK")
</pallas_src>

<mosaic_0001>
module attributes {stable_mosaic.version = 11 : i64} {
  func.func @vit_fused_kernel(%arg0: i32, %arg1: memref<16x768xbf16, #tpu.memory_space<vmem>>, %arg2: memref<768x64xbf16, #tpu.memory_space<vmem>>, %arg3: memref<16x64xf32, #tpu.memory_space<vmem>>, %arg4: memref<1x8xf32, #tpu.memory_space<vmem>>, %arg5: memref<1x1x64xf32, #tpu.memory_space<vmem>>, %arg6: memref<1x1x64xf32, #tpu.memory_space<vmem>>, %arg7: memref<1x64x192xbf16, #tpu.memory_space<vmem>>, %arg8: memref<1x1x192xf32, #tpu.memory_space<vmem>>, %arg9: memref<1x64x64xbf16, #tpu.memory_space<vmem>>, %arg10: memref<1x1x64xf32, #tpu.memory_space<vmem>>, %arg11: memref<1x1x64xf32, #tpu.memory_space<vmem>>, %arg12: memref<1x1x64xf32, #tpu.memory_space<vmem>>, %arg13: memref<1x64x256xbf16, #tpu.memory_space<vmem>>, %arg14: memref<1x1x256xf32, #tpu.memory_space<vmem>>, %arg15: memref<1x256x64xbf16, #tpu.memory_space<vmem>>, %arg16: memref<1x1x64xf32, #tpu.memory_space<vmem>>, %arg17: memref<1x64xf32, #tpu.memory_space<vmem>>, %arg18: memref<1x64xf32, #tpu.memory_space<vmem>>, %arg19: memref<1x1024xf32, #tpu.memory_space<vmem>>, %arg20: memref<1x1024xf32, #tpu.memory_space<vmem>>, %arg21: memref<1x1024xf32, #tpu.memory_space<vmem>>, %arg22: memref<1x512xf32, #tpu.memory_space<vmem>>, %arg23: memref<1x128xf32, #tpu.memory_space<vmem>>, %arg24: memref<64x1024xbf16, #tpu.memory_space<any>>, %arg25: memref<1024x512xbf16, #tpu.memory_space<any>>, %arg26: memref<512x128xbf16, #tpu.memory_space<any>>, %arg27: memref<16x128xf32, #tpu.memory_space<vmem>>, %arg28: memref<16x64xf32, #tpu.memory_space<vmem>>, %arg29: memref<64x1024xbf16, #tpu.memory_space<vmem>>, %arg30: memref<1024x512xbf16, #tpu.memory_space<vmem>>, %arg31: memref<512x128xbf16, #tpu.memory_space<vmem>>, %arg32: memref<3x!tpu.dma_semaphore, #tpu.memory_space<semaphore_mem>>) attributes {dimension_semantics = [#tpu.dimension_semantics<arbitrary>], iteration_bounds = array<i64: 3>, scalar_prefetch = 0 : i64, scratch_operands = 5 : i64, tpu.core_type = #tpu.core_type<tc>, window_params = [{pipeline_mode = #tpu.pipeline_mode<synchronous>, transform_indices = @transform_0, window_bounds = array<i64: 16, 768>}, {pipeline_mode = #tpu.pipeline_mode<synchronous>, transform_indices = @transform_1, window_bounds = array<i64: 768, 64>}, {pipeline_mode = #tpu.pipeline_mode<synchronous>, transform_indices = @transform_2, window_bounds = array<i64: 16, 64>}, {pipeline_mode = #tpu.pipeline_mode<synchronous>, transform_indices = @transform_3, window_bounds = array<i64: 1, 8>}, {transform_indices = @transform_4, window_bounds = array<i64: 1, 1, 64>}, {transform_indices = @transform_5, window_bounds = array<i64: 1, 1, 64>}, {transform_indices = @transform_6, window_bounds = array<i64: 1, 64, 192>}, {transform_indices = @transform_7, window_bounds = array<i64: 1, 1, 192>}, {transform_indices = @transform_8, window_bounds = array<i64: 1, 64, 64>}, {transform_indices = @transform_9, window_bounds = array<i64: 1, 1, 64>}, {transform_indices = @transform_10, window_bounds = array<i64: 1, 1, 64>}, {transform_indices = @transform_11, window_bounds = array<i64: 1, 1, 64>}, {transform_indices = @transform_12, window_bounds = array<i64: 1, 64, 256>}, {transform_indices = @transform_13, window_bounds = array<i64: 1, 1, 256>}, {transform_indices = @transform_14, window_bounds = array<i64: 1, 256, 64>}, {transform_indices = @transform_15, window_bounds = array<i64: 1, 1, 64>}, {pipeline_mode = #tpu.pipeline_mode<synchronous>, transform_indices = @transform_16, window_bounds = array<i64: 1, 64>}, {pipeline_mode = #tpu.pipeline_mode<synchronous>, transform_indices = @transform_17, window_bounds = array<i64: 1, 64>}, {pipeline_mode = #tpu.pipeline_mode<synchronous>, transform_indices = @transform_18, window_bounds = array<i64: 1, 1024>}, {pipeline_mode = #tpu.pipeline_mode<synchronous>, transform_indices = @transform_19, window_bounds = array<i64: 1, 1024>}, {pipeline_mode = #tpu.pipeline_mode<synchronous>, transform_indices = @transform_20, window_bounds = array<i64: 1, 1024>}, {pipeline_mode = #tpu.pipeline_mode<synchronous>, transform_indices = @transform_21, window_bounds = array<i64: 1, 512>}, {pipeline_mode = #tpu.pipeline_mode<synchronous>, transform_indices = @transform_22, window_bounds = array<i64: 1, 128>}, {}, {}, {}, {pipeline_mode = #tpu.pipeline_mode<synchronous>, transform_indices = @transform_26, window_bounds = array<i64: 16, 128>}]} {
    %c0_i32 = arith.constant 0 : i32
    %0 = arith.cmpi eq, %arg0, %c0_i32 : i32
    %1 = arith.extui %0 : i1 to i32
    %c0_i32_0 = arith.constant 0 : i32
    %2 = arith.cmpi ne, %1, %c0_i32_0 : i32
    scf.if %2 {
      %c0_i32_4 = arith.constant 0 : i32
      %9 = tpu.memref_slice %arg32[%c0_i32_4] : memref<3x!tpu.dma_semaphore, #tpu.memory_space<semaphore_mem>> -> memref<1x!tpu.dma_semaphore, #tpu.memory_space<semaphore_mem>>
      %10 = tpu.memref_squeeze %9 : memref<1x!tpu.dma_semaphore, #tpu.memory_space<semaphore_mem>> -> memref<!tpu.dma_semaphore, #tpu.memory_space<semaphore_mem>>
      tpu.enqueue_dma source(%arg24 : memref<64x1024xbf16, #tpu.memory_space<any>>) target(%arg29 : memref<64x1024xbf16, #tpu.memory_space<vmem>>) target_semaphore(%10 : memref<!tpu.dma_semaphore, #tpu.memory_space<semaphore_mem>>)
      %c1_i32 = arith.constant 1 : i32
      %11 = tpu.memref_slice %arg32[%c1_i32] : memref<3x!tpu.dma_semaphore, #tpu.memory_space<semaphore_mem>> -> memref<1x!tpu.dma_semaphore, #tpu.memory_space<semaphore_mem>>
      %12 = tpu.memref_squeeze %11 : memref<1x!tpu.dma_semaphore, #tpu.memory_space<semaphore_mem>> -> memref<!tpu.dma_semaphore, #tpu.memory_space<semaphore_mem>>
      tpu.enqueue_dma source(%arg25 : memref<1024x512xbf16, #tpu.memory_space<any>>) target(%arg30 : memref<1024x512xbf16, #tpu.memory_space<vmem>>) target_semaphore(%12 : memref<!tpu.dma_semaphore, #tpu.memory_space<semaphore_mem>>)
      %c2_i32_5 = arith.constant 2 : i32
      %13 = tpu.memref_slice %arg32[%c2_i32_5] : memref<3x!tpu.dma_semaphore, #tpu.memory_space<semaphore_mem>> -> memref<1x!tpu.dma_semaphore, #tpu.memory_space<semaphore_mem>>
      %14 = tpu.memref_squeeze %13 : memref<1x!tpu.dma_semaphore, #tpu.memory_space<semaphore_mem>> -> memref<!tpu.dma_semaphore, #tpu.memory_space<semaphore_mem>>
      tpu.enqueue_dma source(%arg26 : memref<512x128xbf16, #tpu.memory_space<any>>) target(%arg31 : memref<512x128xbf16, #tpu.memory_space<vmem>>) target_semaphore(%14 : memref<!tpu.dma_semaphore, #tpu.memory_space<semaphore_mem>>)
      %c0 = arith.constant 0 : index
      %c0_6 = arith.constant 0 : index
      %15 = vector.load %arg1[%c0, %c0_6] : memref<16x768xbf16, #tpu.memory_space<vmem>>, vector<16x768xbf16>
      %c0_7 = arith.constant 0 : index
      %c0_8 = arith.constant 0 : index
      %16 = vector.load %arg2[%c0_7, %c0_8] : memref<768x64xbf16, #tpu.memory_space<vmem>>, vector<768x64xbf16>
      %cst = arith.constant dense<0.000000e+00> : vector<16x64xf32>
      %17 = tpu.matmul %15, %16, %cst {dimension_numbers = #tpu.dot_dimension_numbers<[1], [0], [0], [1], [0, 0, 1, 1], [], []>} : vector<16x768xbf16>, vector<768x64xbf16>, vector<16x64xf32> -> vector<16x64xf32>
      %c0_9 = arith.constant 0 : index
      %c0_10 = arith.constant 0 : index
      %18 = vector.load %arg3[%c0_9, %c0_10] : memref<16x64xf32, #tpu.memory_space<vmem>>, vector<16x64xf32>
      %19 = arith.addf %17, %18 : vector<16x64xf32>
      %c0_11 = arith.constant 0 : index
      %c0_12 = arith.constant 0 : index
      %20 = vector.load %arg28[%c0_11, %c0_12] : memref<16x64xf32, #tpu.memory_space<vmem>>, vector<16x64xf32>
      tpu.vector_store %arg28[%c0_11, %c0_12], %19 {strides = array<i32>} : memref<16x64xf32, #tpu.memory_space<vmem>>, vector<16x64xf32>,
    } else {
    }
    %c2_i32 = arith.constant 2 : i32
    %3 = arith.cmpi slt, %arg0, %c2_i32 : i32
    %4 = arith.extui %3 : i1 to i32
    %c0_i32_1 = arith.constant 0 : i32
    %5 = arith.cmpi ne, %4, %c0_i32_1 : i32
    scf.if %5 {
      %c0 = arith.constant 0 : index
      %c0_4 = arith.constant 0 : index
      %9 = vector.load %arg4[%c0, %c0_4] : memref<1x8xf32, #tpu.memory_space<vmem>>, vector<1x8xf32>
      %10 = vector.shape_cast %9 : vector<1x8xf32> to vector<1x1x8xf32>
      %c0_5 = arith.constant 0 : index
      %c0_6 = arith.constant 0 : index
      %11 = vector.load %arg28[%c0_5, %c0_6] : memref<16x64xf32, #tpu.memory_space<vmem>>, vector<16x64xf32>
      %c0_7 = arith.constant 0 : index
      %c0_8 = arith.constant 0 : index
      %c0_9 = arith.constant 0 : index
      %12 = vector.load %arg5[%c0_7, %c0_8, %c0_9] : memref<1x1x64xf32, #tpu.memory_space<vmem>>, vector<1x1x64xf32>
      %13 = vector.shape_cast %12 : vector<1x1x64xf32> to vector<1x64xf32>
      %c0_10 = arith.constant 0 : index
      %c0_11 = arith.constant 0 : index
      %c0_12 = arith.constant 0 : index
      %14 = vector.load %arg6[%c0_10, %c0_11, %c0_12] : memref<1x1x64xf32, #tpu.memory_space<vmem>>, vector<1x1x64xf32>
      %15 = vector.shape_cast %14 : vector<1x1x64xf32> to vector<1x64xf32>
      %c0_13 = arith.constant 0 : index
      %c0_14 = arith.constant 0 : index
      %c0_15 = arith.constant 0 : index
      %16 = vector.load %arg7[%c0_13, %c0_14, %c0_15] : memref<1x64x192xbf16, #tpu.memory_space<vmem>>, vector<1x64x192xbf16>
      %17 = vector.shape_cast %16 : vector<1x64x192xbf16> to vector<64x192xbf16>
      %c0_16 = arith.constant 0 : index
      %c0_17 = arith.constant 0 : index
      %c0_18 = arith.constant 0 : index
      %18 = vector.load %arg8[%c0_16, %c0_17, %c0_18] : memref<1x1x192xf32, #tpu.memory_space<vmem>>, vector<1x1x192xf32>
      %19 = vector.shape_cast %18 : vector<1x1x192xf32> to vector<1x192xf32>
      %c0_19 = arith.constant 0 : index
      %c0_20 = arith.constant 0 : index
      %c0_21 = arith.constant 0 : index
      %20 = vector.load %arg9[%c0_19, %c0_20, %c0_21] : memref<1x64x64xbf16, #tpu.memory_space<vmem>>, vector<1x64x64xbf16>
      %21 = vector.shape_cast %20 : vector<1x64x64xbf16> to vector<64x64xbf16>
      %c0_22 = arith.constant 0 : index
      %c0_23 = arith.constant 0 : index
      %c0_24 = arith.constant 0 : index
      %22 = vector.load %arg10[%c0_22, %c0_23, %c0_24] : memref<1x1x64xf32, #tpu.memory_space<vmem>>, vector<1x1x64xf32>
      %23 = vector.shape_cast %22 : vector<1x1x64xf32> to vector<1x64xf32>
      %c0_25 = arith.constant 0 : index
      %c0_26 = arith.constant 0 : index
      %c0_27 = arith.constant 0 : index
      %24 = vector.load %arg11[%c0_25, %c0_26, %c0_27] : memref<1x1x64xf32, #tpu.memory_space<vmem>>, vector<1x1x64xf32>
      %25 = vector.shape_cast %24 : vector<1x1x64xf32> to vector<1x64xf32>
      %c0_28 = arith.constant 0 : index
      %c0_29 = arith.constant 0 : index
      %c0_30 = arith.constant 0 : index
      %26 = vector.load %arg12[%c0_28, %c0_29, %c0_30] : memref<1x1x64xf32, #tpu.memory_space<vmem>>, vector<1x1x64xf32>
      %27 = vector.shape_cast %26 : vector<1x1x64xf32> to vector<1x64xf32>
      %c0_31 = arith.constant 0 : index
      %c0_32 = arith.constant 0 : index
      %c0_33 = arith.constant 0 : index
      %28 = vector.load %arg13[%c0_31, %c0_32, %c0_33] : memref<1x64x256xbf16, #tpu.memory_space<vmem>>, vector<1x64x256xbf16>
      %29 = vector.shape_cast %28 : vector<1x64x256xbf16> to vector<64x256xbf16>
      %c0_34 = arith.constant 0 : index
      %c0_35 = arith.constant 0 : index
      %c0_36 = arith.constant 0 : index
      %30 = vector.load %arg14[%c0_34, %c0_35, %c0_36] : memref<1x1x256xf32, #tpu.memory_space<vmem>>, vector<1x1x256xf32>
      %31 = vector.shape_cast %30 : vector<1x1x256xf32> to vector<1x256xf32>
      %c0_37 = arith.constant 0 : index
      %c0_38 = arith.constant 0 : index
      %c0_39 = arith.constant 0 : index
      %32 = vector.load %arg15[%c0_37, %c0_38, %c0_39] : memref<1x256x64xbf16, #tpu.memory_space<vmem>>, vector<1x256x64xbf16>
      %33 = vector.shape_cast %32 : vector<1x256x64xbf16> to vector<256x64xbf16>
      %c0_40 = arith.constant 0 : index
      %c0_41 = arith.constant 0 : index
      %c0_42 = arith.constant 0 : index
      %34 = vector.load %arg16[%c0_40, %c0_41, %c0_42] : memref<1x1x64xf32, #tpu.memory_space<vmem>>, vector<1x1x64xf32>
      %35 = vector.shape_cast %34 : vector<1x1x64xf32> to vector<1x64xf32>
      %cst = arith.constant dense<0.000000e+00> : vector<16xf32>
      %36 = vector.multi_reduction <add>, %11, %cst [1] : vector<16x64xf32> to vector<16xf32>
      %37 = vector.shape_cast %36 : vector<16xf32> to vector<16x1xf32>
      %cst_43 = arith.constant 6.400000e+01 : f32
      %38 = vector.broadcast %cst_43 : f32 to vector<16x1xf32>
      %39 = arith.divf %37, %38 : vector<16x1xf32>
      %40 = vector.broadcast %39 : vector<16x1xf32> to vector<16x64xf32>
      %41 = arith.subf %11, %40 : vector<16x64xf32>
      %42 = arith.mulf %41, %41 : vector<16x64xf32>
      %cst_44 = arith.constant dense<0.000000e+00> : vector<16xf32>
      %43 = vector.multi_reduction <add>, %42, %cst_44 [1] : vector<16x64xf32> to vector<16xf32>
      %44 = vector.shape_cast %43 : vector<16xf32> to vector<16x1xf32>
      %cst_45 = arith.constant 6.400000e+01 : f32
      %45 = vector.broadcast %cst_45 : f32 to vector<16x1xf32>
      %46 = arith.divf %44, %45 : vector<16x1xf32>
      %47 = vector.broadcast %39 : vector<16x1xf32> to vector<16x64xf32>
      %48 = arith.subf %11, %47 : vector<16x64xf32>
      %cst_46 = arith.constant 9.99999997E-7 : f32
      %49 = vector.broadcast %cst_46 : f32 to vector<16x1xf32>
      %50 = arith.addf %46, %49 : vector<16x1xf32>
      %51 = math.rsqrt %50 : vector<16x1xf32>
      %52 = vector.broadcast %51 : vector<16x1xf32> to vector<16x64xf32>
      %53 = arith.mulf %48, %52 : vector<16x64xf32>
      %54 = vector.broadcast %13 : vector<1x64xf32> to vector<16x64xf32>
      %55 = arith.mulf %53, %54 : vector<16x64xf32>
      %56 = vector.broadcast %15 : vector<1x64xf32> to vector<16x64xf32>
      %57 = arith.addf %55, %56 : vector<16x64xf32>
      %58 = arith.truncf %57 : vector<16x64xf32> to vector<16x64xbf16>
      %cst_47 = arith.constant dense<0.000000e+00> : vector<16x192xf32>
      %59 = tpu.matmul %58, %17, %cst_47 {dimension_numbers = #tpu.dot_dimension_numbers<[1], [0], [0], [1], [0, 0, 1, 1], [], []>} : vector<16x64xbf16>, vector<64x192xbf16>, vector<16x192xf32> -> vector<16x192xf32>
      %60 = vector.broadcast %19 : vector<1x192xf32> to vector<16x192xf32>
      %61 = arith.addf %59, %60 : vector<16x192xf32>
      %62 = vector.shape_cast %61 : vector<16x192xf32> to vector<2x8x192xf32>
      %63 = vector.extract_strided_slice %62 {offsets = [0, 0, 0], sizes = [2, 8, 16], strides = [1, 1, 1]} : vector<2x8x192xf32> to vector<2x8x16xf32>
      %64 = vector.extract_strided_slice %62 {offsets = [0, 0, 16], sizes = [2, 8, 16], strides = [1, 1, 1]} : vector<2x8x192xf32> to vector<2x8x16xf32>
      %65 = vector.extract_strided_slice %62 {offsets = [0, 0, 32], sizes = [2, 8, 16], strides = [1, 1, 1]} : vector<2x8x192xf32> to vector<2x8x16xf32>
      %66 = vector.extract_strided_slice %62 {offsets = [0, 0, 48], sizes = [2, 8, 16], strides = [1, 1, 1]} : vector<2x8x192xf32> to vector<2x8x16xf32>
      %67 = tpu.concatenate %63, %64, %65, %66 in 0 : vector<2x8x16xf32>, vector<2x8x16xf32>, vector<2x8x16xf32>, vector<2x8x16xf32> -> vector<8x8x16xf32>
      %68 = arith.truncf %67 : vector<8x8x16xf32> to vector<8x8x16xbf16>
      %69 = vector.extract_strided_slice %62 {offsets = [0, 0, 64], sizes = [2, 8, 16], strides = [1, 1, 1]} : vector<2x8x192xf32> to vector<2x8x16xf32>
      %70 = vector.extract_strided_slice %62 {offsets = [0, 0, 80], sizes = [2, 8, 16], strides = [1, 1, 1]} : vector<2x8x192xf32> to vector<2x8x16xf32>
      %71 = vector.extract_strided_slice %62 {offsets = [0, 0, 96], sizes = [2, 8, 16], strides = [1, 1, 1]} : vector<2x8x192xf32> to vector<2x8x16xf32>
      %72 = vector.extract_strided_slice %62 {offsets = [0, 0, 112], sizes = [2, 8, 16], strides = [1, 1, 1]} : vector<2x8x192xf32> to vector<2x8x16xf32>
      %73 = tpu.concatenate %69, %70, %71, %72 in 0 : vector<2x8x16xf32>, vector<2x8x16xf32>, vector<2x8x16xf32>, vector<2x8x16xf32> -> vector<8x8x16xf32>
      %74 = arith.truncf %73 : vector<8x8x16xf32> to vector<8x8x16xbf16>
      %75 = vector.extract_strided_slice %62 {offsets = [0, 0, 128], sizes = [2, 8, 16], strides = [1, 1, 1]} : vector<2x8x192xf32> to vector<2x8x16xf32>
      %76 = vector.extract_strided_slice %62 {offsets = [0, 0, 144], sizes = [2, 8, 16], strides = [1, 1, 1]} : vector<2x8x192xf32> to vector<2x8x16xf32>
      %77 = vector.extract_strided_slice %62 {offsets = [0, 0, 160], sizes = [2, 8, 16], strides = [1, 1, 1]} : vector<2x8x192xf32> to vector<2x8x16xf32>
      %78 = vector.extract_strided_slice %62 {offsets = [0, 0, 176], sizes = [2, 8, 16], strides = [1, 1, 1]} : vector<2x8x192xf32> to vector<2x8x16xf32>
      %79 = tpu.concatenate %75, %76, %77, %78 in 0 : vector<2x8x16xf32>, vector<2x8x16xf32>, vector<2x8x16xf32>, vector<2x8x16xf32> -> vector<8x8x16xf32>
      %80 = arith.truncf %79 : vector<8x8x16xf32> to vector<8x8x16xbf16>
      "tpu.trace_start"() <{level = 10 : i32, message = "bqd,bkd->bqk"}> : () -> ()
      %cst_48 = arith.constant dense<0.000000e+00> : vector<8x8x8xf32>
      %81 = tpu.matmul %68, %74, %cst_48 {dimension_numbers = #tpu.dot_dimension_numbers<[2], [2], [1], [1], [0, 0, 0, 1, 1, 1], [0], [0]>} : vector<8x8x16xbf16>, vector<8x8x16xbf16>, vector<8x8x8xf32> -> vector<8x8x8xf32>
      "tpu.trace_stop"() : () -> ()
      %cst_49 = arith.constant 2.500000e-01 : f32
      %82 = vector.broadcast %cst_49 : f32 to vector<8x8x8xf32>
      %83 = arith.mulf %81, %82 : vector<8x8x8xf32>
      %84 = vector.broadcast %10 : vector<1x1x8xf32> to vector<8x8x8xf32>
      %85 = arith.addf %83, %84 : vector<8x8x8xf32>
      %cst_50 = arith.constant dense<0xFF800000> : vector<8x8xf32>
      %86 = vector.multi_reduction <maximumf>, %85, %cst_50 [2] : vector<8x8x8xf32> to vector<8x8xf32>
      %87 = vector.shape_cast %86 : vector<8x8xf32> to vector<8x8x1xf32>
      %88 = vector.broadcast %87 : vector<8x8x1xf32> to vector<8x8x8xf32>
      %89 = arith.subf %85, %88 : vector<8x8x8xf32>
      %90 = math.exp %89 : vector<8x8x8xf32>
      %cst_51 = arith.constant dense<0.000000e+00> : vector<8x8xf32>
      %91 = vector.multi_reduction <add>, %90, %cst_51 [2] : vector<8x8x8xf32> to vector<8x8xf32>
      %92 = vector.shape_cast %91 : vector<8x8xf32> to vector<8x8x1xf32>
      %93 = tpu.reciprocal %92 {approx = true} : vector<8x8x1xf32> -> vector<8x8x1xf32>
      %94 = vector.broadcast %93 : vector<8x8x1xf32> to vector<8x8x8xf32>
      %95 = arith.mulf %90, %94 : vector<8x8x8xf32>
      %96 = arith.truncf %95 : vector<8x8x8xf32> to vector<8x8x8xbf16>
      "tpu.trace_start"() <{level = 10 : i32, message = "bqk,bkd->bqd"}> : () -> ()
      %cst_52 = arith.constant dense<0.000000e+00> : vector<8x8x16xf32>
      %97 = tpu.matmul %96, %80, %cst_52 {dimension_numbers = #tpu.dot_dimension_numbers<[2], [1], [1], [2], [0, 0, 0, 1, 1, 2], [0], [0]>} : vector<8x8x8xbf16>, vector<8x8x16xbf16>, vector<8x8x16xf32> -> vector<8x8x16xf32>
      "tpu.trace_stop"() : () -> ()
      %98 = vector.extract_strided_slice %97 {offsets = [0, 0, 0], sizes = [2, 8, 16], strides = [1, 1, 1]} : vector<8x8x16xf32> to vector<2x8x16xf32>
      %99 = vector.extract_strided_slice %97 {offsets = [2, 0, 0], sizes = [2, 8, 16], strides = [1, 1, 1]} : vector<8x8x16xf32> to vector<2x8x16xf32>
      %100 = vector.extract_strided_slice %97 {offsets = [4, 0, 0], sizes = [2, 8, 16], strides = [1, 1, 1]} : vector<8x8x16xf32> to vector<2x8x16xf32>
      %101 = vector.extract_strided_slice %97 {offsets = [6, 0, 0], sizes = [2, 8, 16], strides = [1, 1, 1]} : vector<8x8x16xf32> to vector<2x8x16xf32>
      %102 = tpu.concatenate %98, %99, %100, %101 in 2 : vector<2x8x16xf32>, vector<2x8x16xf32>, vector<2x8x16xf32>, vector<2x8x16xf32> -> vector<2x8x64xf32>
      %103 = vector.shape_cast %102 : vector<2x8x64xf32> to vector<16x64xf32>
      %104 = arith.truncf %103 : vector<16x64xf32> to vector<16x64xbf16>
      %cst_53 = arith.constant dense<0.000000e+00> : vector<16x64xf32>
      %105 = tpu.matmul %104, %21, %cst_53 {dimension_numbers = #tpu.dot_dimension_numbers<[1], [0], [0], [1], [0, 0, 1, 1], [], []>} : vector<16x64xbf16>, vector<64x64xbf16>, vector<16x64xf32> -> vector<16x64xf32>
      %106 = vector.broadcast %23 : vector<1x64xf32> to vector<16x64xf32>
      %107 = arith.addf %105, %106 : vector<16x64xf32>
      %108 = arith.addf %11, %107 : vector<16x64xf32>
      %cst_54 = arith.constant dense<0.000000e+00> : vector<16xf32>
      %109 = vector.multi_reduction <add>, %108, %cst_54 [1] : vector<16x64xf32> to vector<16xf32>
      %110 = vector.shape_cast %109 : vector<16xf32> to vector<16x1xf32>
      %cst_55 = arith.constant 6.400000e+01 : f32
      %111 = vector.broadcast %cst_55 : f32 to vector<16x1xf32>
      %112 = arith.divf %110, %111 : vector<16x1xf32>
      %113 = vector.broadcast %112 : vector<16x1xf32> to vector<16x64xf32>
      %114 = arith.subf %108, %113 : vector<16x64xf32>
      %115 = arith.mulf %114, %114 : vector<16x64xf32>
      %cst_56 = arith.constant dense<0.000000e+00> : vector<16xf32>
      %116 = vector.multi_reduction <add>, %115, %cst_56 [1] : vector<16x64xf32> to vector<16xf32>
      %117 = vector.shape_cast %116 : vector<16xf32> to vector<16x1xf32>
      %cst_57 = arith.constant 6.400000e+01 : f32
      %118 = vector.broadcast %cst_57 : f32 to vector<16x1xf32>
      %119 = arith.divf %117, %118 : vector<16x1xf32>
      %120 = vector.broadcast %112 : vector<16x1xf32> to vector<16x64xf32>
      %121 = arith.subf %108, %120 : vector<16x64xf32>
      %cst_58 = arith.constant 9.99999997E-7 : f32
      %122 = vector.broadcast %cst_58 : f32 to vector<16x1xf32>
      %123 = arith.addf %119, %122 : vector<16x1xf32>
      %124 = math.rsqrt %123 : vector<16x1xf32>
      %125 = vector.broadcast %124 : vector<16x1xf32> to vector<16x64xf32>
      %126 = arith.mulf %121, %125 : vector<16x64xf32>
      %127 = vector.broadcast %25 : vector<1x64xf32> to vector<16x64xf32>
      %128 = arith.mulf %126, %127 : vector<16x64xf32>
      %129 = vector.broadcast %27 : vector<1x64xf32> to vector<16x64xf32>
      %130 = arith.addf %128, %129 : vector<16x64xf32>
      %131 = arith.truncf %130 : vector<16x64xf32> to vector<16x64xbf16>
      %cst_59 = arith.constant dense<0.000000e+00> : vector<16x256xf32>
      %132 = tpu.matmul %131, %29, %cst_59 {dimension_numbers = #tpu.dot_dimension_numbers<[1], [0], [0], [1], [0, 0, 1, 1], [], []>} : vector<16x64xbf16>, vector<64x256xbf16>, vector<16x256xf32> -> vector<16x256xf32>
      %133 = vector.broadcast %31 : vector<1x256xf32> to vector<16x256xf32>
      %134 = arith.addf %132, %133 : vector<16x256xf32>
      %cst_60 = arith.constant 5.000000e-01 : f32
      %135 = vector.broadcast %cst_60 : f32 to vector<16x256xf32>
      %136 = arith.mulf %135, %134 : vector<16x256xf32>
      %cst_61 = arith.constant 4.471500e-02 : f32
      %137 = vector.broadcast %cst_61 : f32 to vector<16x256xf32>
      %138 = arith.mulf %137, %134 : vector<16x256xf32>
      %139 = arith.mulf %138, %134 : vector<16x256xf32>
      %140 = arith.mulf %139, %134 : vector<16x256xf32>
      %141 = arith.addf %134, %140 : vector<16x256xf32>
      %cst_62 = arith.constant 0.797884583 : f32
      %142 = vector.broadcast %cst_62 : f32 to vector<16x256xf32>
      %143 = arith.mulf %142, %141 : vector<16x256xf32>
      %144 = math.tanh %143 : vector<16x256xf32>
      %cst_63 = arith.constant 1.000000e+00 : f32
      %145 = vector.broadcast %cst_63 : f32 to vector<16x256xf32>
      %146 = arith.addf %145, %144 : vector<16x256xf32>
      %147 = arith.mulf %136, %146 : vector<16x256xf32>
      %148 = arith.truncf %147 : vector<16x256xf32> to vector<16x256xbf16>
      %cst_64 = arith.constant dense<0.000000e+00> : vector<16x64xf32>
      %149 = tpu.matmul %148, %33, %cst_64 {dimension_numbers = #tpu.dot_dimension_numbers<[1], [0], [0], [1], [0, 0, 1, 1], [], []>} : vector<16x256xbf16>, vector<256x64xbf16>, vector<16x64xf32> -> vector<16x64xf32>
      %150 = vector.broadcast %35 : vector<1x64xf32> to vector<16x64xf32>
      %151 = arith.addf %149, %150 : vector<16x64xf32>
      %152 = arith.addf %108, %151 : vector<16x64xf32>
      %c0_65 = arith.constant 0 : index
      %c0_66 = arith.constant 0 : index
      %153 = vector.load %arg28[%c0_65, %c0_66] : memref<16x64xf32, #tpu.memory_space<vmem>>, vector<16x64xf32>
      tpu.vector_store %arg28[%c0_65, %c0_66], %152 {strides = array<i32>} : memref<16x64xf32, #tpu.memory_space<vmem>>, vector<16x64xf32>,
    } else {
    }
    %c2_i32_2 = arith.constant 2 : i32
    %6 = arith.cmpi eq, %arg0, %c2_i32_2 : i32
    %7 = arith.extui %6 : i1 to i32
    %c0_i32_3 = arith.constant 0 : i32
    %8 = arith.cmpi ne, %7, %c0_i32_3 : i32
    scf.if %8 {
      %c0_i32_4 = arith.constant 0 : i32
      %9 = tpu.memref_slice %arg32[%c0_i32_4] : memref<3x!tpu.dma_semaphore, #tpu.memory_space<semaphore_mem>> -> memref<1x!tpu.dma_semaphore, #tpu.memory_space<semaphore_mem>>
      %10 = tpu.memref_squeeze %9 : memref<1x!tpu.dma_semaphore, #tpu.memory_space<semaphore_mem>> -> memref<!tpu.dma_semaphore, #tpu.memory_space<semaphore_mem>>
      tpu.wait_dma2 semaphore(%10 : memref<!tpu.dma_semaphore, #tpu.memory_space<semaphore_mem>>) src(%arg24 : memref<64x1024xbf16, #tpu.memory_space<any>>) dst(%arg29 : memref<64x1024xbf16, #tpu.memory_space<vmem>>)
      %c1_i32 = arith.constant 1 : i32
      %11 = tpu.memref_slice %arg32[%c1_i32] : memref<3x!tpu.dma_semaphore, #tpu.memory_space<semaphore_mem>> -> memref<1x!tpu.dma_semaphore, #tpu.memory_space<semaphore_mem>>
      %12 = tpu.memref_squeeze %11 : memref<1x!tpu.dma_semaphore, #tpu.memory_space<semaphore_mem>> -> memref<!tpu.dma_semaphore, #tpu.memory_space<semaphore_mem>>
      tpu.wait_dma2 semaphore(%12 : memref<!tpu.dma_semaphore, #tpu.memory_space<semaphore_mem>>) src(%arg25 : memref<1024x512xbf16, #tpu.memory_space<any>>) dst(%arg30 : memref<1024x512xbf16, #tpu.memory_space<vmem>>)
      %c2_i32_5 = arith.constant 2 : i32
      %13 = tpu.memref_slice %arg32[%c2_i32_5] : memref<3x!tpu.dma_semaphore, #tpu.memory_space<semaphore_mem>> -> memref<1x!tpu.dma_semaphore, #tpu.memory_space<semaphore_mem>>
      %14 = tpu.memref_squeeze %13 : memref<1x!tpu.dma_semaphore, #tpu.memory_space<semaphore_mem>> -> memref<!tpu.dma_semaphore, #tpu.memory_space<semaphore_mem>>
      tpu.wait_dma2 semaphore(%14 : memref<!tpu.dma_semaphore, #tpu.memory_space<semaphore_mem>>) src(%arg26 : memref<512x128xbf16, #tpu.memory_space<any>>) dst(%arg31 : memref<512x128xbf16, #tpu.memory_space<vmem>>)
      %c0 = arith.constant 0 : index
      %c0_6 = arith.constant 0 : index
      %15 = vector.load %arg28[%c0, %c0_6] : memref<16x64xf32, #tpu.memory_space<vmem>>, vector<16x64xf32>
      %c0_7 = arith.constant 0 : index
      %c0_8 = arith.constant 0 : index
      %16 = vector.load %arg17[%c0_7, %c0_8] : memref<1x64xf32, #tpu.memory_space<vmem>>, vector<1x64xf32>
      %c0_9 = arith.constant 0 : index
      %c0_10 = arith.constant 0 : index
      %17 = vector.load %arg18[%c0_9, %c0_10] : memref<1x64xf32, #tpu.memory_space<vmem>>, vector<1x64xf32>
      %cst = arith.constant dense<0.000000e+00> : vector<16xf32>
      %18 = vector.multi_reduction <add>, %15, %cst [1] : vector<16x64xf32> to vector<16xf32>
      %19 = vector.shape_cast %18 : vector<16xf32> to vector<16x1xf32>
      %cst_11 = arith.constant 6.400000e+01 : f32
      %20 = vector.broadcast %cst_11 : f32 to vector<16x1xf32>
      %21 = arith.divf %19, %20 : vector<16x1xf32>
      %22 = vector.broadcast %21 : vector<16x1xf32> to vector<16x64xf32>
      %23 = arith.subf %15, %22 : vector<16x64xf32>
      %24 = arith.mulf %23, %23 : vector<16x64xf32>
      %cst_12 = arith.constant dense<0.000000e+00> : vector<16xf32>
      %25 = vector.multi_reduction <add>, %24, %cst_12 [1] : vector<16x64xf32> to vector<16xf32>
      %26 = vector.shape_cast %25 : vector<16xf32> to vector<16x1xf32>
      %cst_13 = arith.constant 6.400000e+01 : f32
      %27 = vector.broadcast %cst_13 : f32 to vector<16x1xf32>
      %28 = arith.divf %26, %27 : vector<16x1xf32>
      %29 = vector.broadcast %21 : vector<16x1xf32> to vector<16x64xf32>
      %30 = arith.subf %15, %29 : vector<16x64xf32>
      %cst_14 = arith.constant 9.99999997E-7 : f32
      %31 = vector.broadcast %cst_14 : f32 to vector<16x1xf32>
      %32 = arith.addf %28, %31 : vector<16x1xf32>
      %33 = math.rsqrt %32 : vector<16x1xf32>
      %34 = vector.broadcast %33 : vector<16x1xf32> to vector<16x64xf32>
      %35 = arith.mulf %30, %34 : vector<16x64xf32>
      %36 = vector.broadcast %16 : vector<1x64xf32> to vector<16x64xf32>
      %37 = arith.mulf %35, %36 : vector<16x64xf32>
      %38 = vector.broadcast %17 : vector<1x64xf32> to vector<16x64xf32>
      %39 = arith.addf %37, %38 : vector<16x64xf32>
      %40 = arith.truncf %39 : vector<16x64xf32> to vector<16x64xbf16>
      %c0_15 = arith.constant 0 : index
      %c0_16 = arith.constant 0 : index
      %41 = vector.load %arg29[%c0_15, %c0_16] : memref<64x1024xbf16, #tpu.memory_space<vmem>>, vector<64x1024xbf16>
      %cst_17 = arith.constant dense<0.000000e+00> : vector<16x1024xf32>
      %42 = tpu.matmul %40, %41, %cst_17 {dimension_numbers = #tpu.dot_dimension_numbers<[1], [0], [0], [1], [0, 0, 1, 1], [], []>} : vector<16x64xbf16>, vector<64x1024xbf16>, vector<16x1024xf32> -> vector<16x1024xf32>
      %c0_18 = arith.constant 0 : index
      %c0_19 = arith.constant 0 : index
      %43 = vector.load %arg19[%c0_18, %c0_19] : memref<1x1024xf32, #tpu.memory_space<vmem>>, vector<1x1024xf32>
      %44 = vector.broadcast %43 : vector<1x1024xf32> to vector<16x1024xf32>
      %45 = arith.addf %42, %44 : vector<16x1024xf32>
      %cst_20 = arith.constant 0.000000e+00 : f32
      %46 = vector.broadcast %cst_20 : f32 to vector<16x1024xf32>
      %47 = arith.maximumf %45, %46 : vector<16x1024xf32>
      %c0_21 = arith.constant 0 : index
      %c0_22 = arith.constant 0 : index
      %48 = vector.load %arg20[%c0_21, %c0_22] : memref<1x1024xf32, #tpu.memory_space<vmem>>, vector<1x1024xf32>
      %49 = vector.broadcast %48 : vector<1x1024xf32> to vector<16x1024xf32>
      %50 = arith.mulf %47, %49 : vector<16x1024xf32>
      %c0_23 = arith.constant 0 : index
      %c0_24 = arith.constant 0 : index
      %51 = vector.load %arg21[%c0_23, %c0_24] : memref<1x1024xf32, #tpu.memory_space<vmem>>, vector<1x1024xf32>
      %52 = vector.broadcast %51 : vector<1x1024xf32> to vector<16x1024xf32>
      %53 = arith.addf %50, %52 : vector<16x1024xf32>
      %54 = arith.truncf %53 : vector<16x1024xf32> to vector<16x1024xbf16>
      %c0_25 = arith.constant 0 : index
      %c0_26 = arith.constant 0 : index
      %55 = vector.load %arg30[%c0_25, %c0_26] : memref<1024x512xbf16, #tpu.memory_space<vmem>>, vector<1024x512xbf16>
      %cst_27 = arith.constant dense<0.000000e+00> : vector<16x512xf32>
      %56 = tpu.matmul %54, %55, %cst_27 {dimension_numbers = #tpu.dot_dimension_numbers<[1], [0], [0], [1], [0, 0, 1, 1], [], []>} : vector<16x1024xbf16>, vector<1024x512xbf16>, vector<16x512xf32> -> vector<16x512xf32>
      %c0_28 = arith.constant 0 : index
      %c0_29 = arith.constant 0 : index
      %57 = vector.load %arg22[%c0_28, %c0_29] : memref<1x512xf32, #tpu.memory_space<vmem>>, vector<1x512xf32>
      %58 = vector.broadcast %57 : vector<1x512xf32> to vector<16x512xf32>
      %59 = arith.addf %56, %58 : vector<16x512xf32>
      %cst_30 = arith.constant 0.000000e+00 : f32
      %60 = vector.broadcast %cst_30 : f32 to vector<16x512xf32>
      %61 = arith.maximumf %59, %60 : vector<16x512xf32>
      %62 = arith.truncf %61 : vector<16x512xf32> to vector<16x512xbf16>
      %c0_31 = arith.constant 0 : index
      %c0_32 = arith.constant 0 : index
      %63 = vector.load %arg31[%c0_31, %c0_32] : memref<512x128xbf16, #tpu.memory_space<vmem>>, vector<512x128xbf16>
      %cst_33 = arith.constant dense<0.000000e+00> : vector<16x128xf32>
      %64 = tpu.matmul %62, %63, %cst_33 {dimension_numbers = #tpu.dot_dimension_numbers<[1], [0], [0], [1], [0, 0, 1, 1], [], []>} : vector<16x512xbf16>, vector<512x128xbf16>, vector<16x128xf32> -> vector<16x128xf32>
      %c0_34 = arith.constant 0 : index
      %c0_35 = arith.constant 0 : index
      %65 = vector.load %arg23[%c0_34, %c0_35] : memref<1x128xf32, #tpu.memory_space<vmem>>, vector<1x128xf32>
      %66 = vector.broadcast %65 : vector<1x128xf32> to vector<16x128xf32>
      %67 = arith.addf %64, %66 : vector<16x128xf32>
      %c0_36 = arith.constant 0 : index
      %c0_37 = arith.constant 0 : index
      %68 = vector.load %arg27[%c0_36, %c0_37] : memref<16x128xf32, #tpu.memory_space<vmem>>, vector<16x128xf32>
      tpu.vector_store %arg27[%c0_36, %c0_37], %67 {strides = array<i32>} : memref<16x128xf32, #tpu.memory_space<vmem>>, vector<16x128xf32>,
    } else {
    }
    return
  }
  func.func @transform_0(%arg0: i32) -> (i32, i32) {
    %c0_i32 = arith.constant 0 : i32
    %c0_i32_0 = arith.constant 0 : i32
    %c0_i32_1 = arith.constant 0 : i32
    return %c0_i32, %c0_i32_0 : i32, i32
  }
  func.func @transform_1(%arg0: i32) -> (i32, i32) {
    %c0_i32 = arith.constant 0 : i32
    %c0_i32_0 = arith.constant 0 : i32
    %c0_i32_1 = arith.constant 0 : i32
    return %c0_i32, %c0_i32_0 : i32, i32
  }
  func.func @transform_2(%arg0: i32) -> (i32, i32) {
    %c0_i32 = arith.constant 0 : i32
    %c0_i32_0 = arith.constant 0 : i32
    %c0_i32_1 = arith.constant 0 : i32
    return %c0_i32, %c0_i32_0 : i32, i32
  }
  func.func @transform_3(%arg0: i32) -> (i32, i32) {
    %c0_i32 = arith.constant 0 : i32
    %c0_i32_0 = arith.constant 0 : i32
    %c0_i32_1 = arith.constant 0 : i32
    return %c0_i32, %c0_i32_0 : i32, i32
  }
  func.func @transform_4(%arg0: i32) -> (i32, i32, i32) {
    %c1_i32 = arith.constant 1 : i32
    %0 = arith.minsi %arg0, %c1_i32 : i32
    %c0_i32 = arith.constant 0 : i32
    %c0_i32_0 = arith.constant 0 : i32
    %c0_i32_1 = arith.constant 0 : i32
    return %0, %c0_i32, %c0_i32_0 : i32, i32, i32
  }
  func.func @transform_5(%arg0: i32) -> (i32, i32, i32) {
    %c1_i32 = arith.constant 1 : i32
    %0 = arith.minsi %arg0, %c1_i32 : i32
    %c0_i32 = arith.constant 0 : i32
    %c0_i32_0 = arith.constant 0 : i32
    %c0_i32_1 = arith.constant 0 : i32
    return %0, %c0_i32, %c0_i32_0 : i32, i32, i32
  }
  func.func @transform_6(%arg0: i32) -> (i32, i32, i32) {
    %c1_i32 = arith.constant 1 : i32
    %0 = arith.minsi %arg0, %c1_i32 : i32
    %c0_i32 = arith.constant 0 : i32
    %c0_i32_0 = arith.constant 0 : i32
    %c0_i32_1 = arith.constant 0 : i32
    return %0, %c0_i32, %c0_i32_0 : i32, i32, i32
  }
  func.func @transform_7(%arg0: i32) -> (i32, i32, i32) {
    %c1_i32 = arith.constant 1 : i32
    %0 = arith.minsi %arg0, %c1_i32 : i32
    %c0_i32 = arith.constant 0 : i32
    %c0_i32_0 = arith.constant 0 : i32
    %c0_i32_1 = arith.constant 0 : i32
    return %0, %c0_i32, %c0_i32_0 : i32, i32, i32
  }
  func.func @transform_8(%arg0: i32) -> (i32, i32, i32) {
    %c1_i32 = arith.constant 1 : i32
    %0 = arith.minsi %arg0, %c1_i32 : i32
    %c0_i32 = arith.constant 0 : i32
    %c0_i32_0 = arith.constant 0 : i32
    %c0_i32_1 = arith.constant 0 : i32
    return %0, %c0_i32, %c0_i32_0 : i32, i32, i32
  }
  func.func @transform_9(%arg0: i32) -> (i32, i32, i32) {
    %c1_i32 = arith.constant 1 : i32
    %0 = arith.minsi %arg0, %c1_i32 : i32
    %c0_i32 = arith.constant 0 : i32
    %c0_i32_0 = arith.constant 0 : i32
    %c0_i32_1 = arith.constant 0 : i32
    return %0, %c0_i32, %c0_i32_0 : i32, i32, i32
  }
  func.func @transform_10(%arg0: i32) -> (i32, i32, i32) {
    %c1_i32 = arith.constant 1 : i32
    %0 = arith.minsi %arg0, %c1_i32 : i32
    %c0_i32 = arith.constant 0 : i32
    %c0_i32_0 = arith.constant 0 : i32
    %c0_i32_1 = arith.constant 0 : i32
    return %0, %c0_i32, %c0_i32_0 : i32, i32, i32
  }
  func.func @transform_11(%arg0: i32) -> (i32, i32, i32) {
    %c1_i32 = arith.constant 1 : i32
    %0 = arith.minsi %arg0, %c1_i32 : i32
    %c0_i32 = arith.constant 0 : i32
    %c0_i32_0 = arith.constant 0 : i32
    %c0_i32_1 = arith.constant 0 : i32
    return %0, %c0_i32, %c0_i32_0 : i32, i32, i32
  }
  func.func @transform_12(%arg0: i32) -> (i32, i32, i32) {
    %c1_i32 = arith.constant 1 : i32
    %0 = arith.minsi %arg0, %c1_i32 : i32
    %c0_i32 = arith.constant 0 : i32
    %c0_i32_0 = arith.constant 0 : i32
    %c0_i32_1 = arith.constant 0 : i32
    return %0, %c0_i32, %c0_i32_0 : i32, i32, i32
  }
  func.func @transform_13(%arg0: i32) -> (i32, i32, i32) {
    %c1_i32 = arith.constant 1 : i32
    %0 = arith.minsi %arg0, %c1_i32 : i32
    %c0_i32 = arith.constant 0 : i32
    %c0_i32_0 = arith.constant 0 : i32
    %c0_i32_1 = arith.constant 0 : i32
    return %0, %c0_i32, %c0_i32_0 : i32, i32, i32
  }
  func.func @transform_14(%arg0: i32) -> (i32, i32, i32) {
    %c1_i32 = arith.constant 1 : i32
    %0 = arith.minsi %arg0, %c1_i32 : i32
    %c0_i32 = arith.constant 0 : i32
    %c0_i32_0 = arith.constant 0 : i32
    %c0_i32_1 = arith.constant 0 : i32
    return %0, %c0_i32, %c0_i32_0 : i32, i32, i32
  }
  func.func @transform_15(%arg0: i32) -> (i32, i32, i32) {
    %c1_i32 = arith.constant 1 : i32
    %0 = arith.minsi %arg0, %c1_i32 : i32
    %c0_i32 = arith.constant 0 : i32
    %c0_i32_0 = arith.constant 0 : i32
    %c0_i32_1 = arith.constant 0 : i32
    return %0, %c0_i32, %c0_i32_0 : i32, i32, i32
  }
  func.func @transform_16(%arg0: i32) -> (i32, i32) {
    %c0_i32 = arith.constant 0 : i32
    %c0_i32_0 = arith.constant 0 : i32
    %c0_i32_1 = arith.constant 0 : i32
    return %c0_i32, %c0_i32_0 : i32, i32
  }
  func.func @transform_17(%arg0: i32) -> (i32, i32) {
    %c0_i32 = arith.constant 0 : i32
    %c0_i32_0 = arith.constant 0 : i32
    %c0_i32_1 = arith.constant 0 : i32
    return %c0_i32, %c0_i32_0 : i32, i32
  }
  func.func @transform_18(%arg0: i32) -> (i32, i32) {
    %c0_i32 = arith.constant 0 : i32
    %c0_i32_0 = arith.constant 0 : i32
    %c0_i32_1 = arith.constant 0 : i32
    return %c0_i32, %c0_i32_0 : i32, i32
  }
  func.func @transform_19(%arg0: i32) -> (i32, i32) {
    %c0_i32 = arith.constant 0 : i32
    %c0_i32_0 = arith.constant 0 : i32
    %c0_i32_1 = arith.constant 0 : i32
    return %c0_i32, %c0_i32_0 : i32, i32
  }
  func.func @transform_20(%arg0: i32) -> (i32, i32) {
    %c0_i32 = arith.constant 0 : i32
    %c0_i32_0 = arith.constant 0 : i32
    %c0_i32_1 = arith.constant 0 : i32
    return %c0_i32, %c0_i32_0 : i32, i32
  }
  func.func @transform_21(%arg0: i32) -> (i32, i32) {
    %c0_i32 = arith.constant 0 : i32
    %c0_i32_0 = arith.constant 0 : i32
    %c0_i32_1 = arith.constant 0 : i32
    return %c0_i32, %c0_i32_0 : i32, i32
  }
  func.func @transform_22(%arg0: i32) -> (i32, i32) {
    %c0_i32 = arith.constant 0 : i32
    %c0_i32_0 = arith.constant 0 : i32
    %c0_i32_1 = arith.constant 0 : i32
    return %c0_i32, %c0_i32_0 : i32, i32
  }
  func.func @transform_26(%arg0: i32) -> (i32, i32) {
    %c0_i32 = arith.constant 0 : i32
    %c0_i32_0 = arith.constant 0 : i32
    %c0_i32_1 = arith.constant 0 : i32
    return %c0_i32, %c0_i32_0 : i32, i32
  }
}

</mosaic_0001>

<bundles_post_ra>
// kernel: vit_model_forward.1
= control target key start
LH: loop header
LB: loop body
LE: loop exit
PB: predicated region body
PF: predicated region fallthrough
CT: control target
= control target key end

     0   :  { %s13343_s0 = inlined_call_operand.vmem [shape: bf16[16,768], index: 0, kind: input, shape index: {}]   ;;  %s13344_s1 = inlined_call_operand.vmem [shape: bf16[768,64], index: 1, kind: input, shape index: {}]   ;;  %s13345_s2 = inlined_call_operand.vmem [shape: f32[16,64], index: 2, kind: input, shape index: {}]   ;;  %s13346_s3 = inlined_call_operand.hbm [shape: f32[1,8], index: 3, kind: input, shape index: {}]   ;;  %s13347_s4 = inlined_call_operand.hbm [shape: f32[2,1,64], index: 4, kind: input, shape index: {}]   ;;  %s13348_s5 = inlined_call_operand.hbm [shape: f32[2,1,64], index: 5, kind: input, shape index: {}]   ;;  %s13349_s6 = inlined_call_operand.hbm [shape: bf16[2,64,192], index: 6, kind: input, shape index: {}]   ;;  %s13350_s7 = inlined_call_operand.vmem [shape: f32[2,1,192], index: 7, kind: input, shape index: {}]   ;;  %s13351_s8 = inlined_call_operand.hbm [shape: bf16[2,64,64], index: 8, kind: input, shape index: {}]   ;;  %s13352_s9 = inlined_call_operand.hbm [shape: f32[2,1,64], index: 9, kind: input, shape index: {}]   ;;  %s13353_s10 = inlined_call_operand.hbm [shape: f32[2,1,64], index: 10, kind: input, shape index: {}]   ;;  %s13354_s11 = inlined_call_operand.hbm [shape: f32[2,1,64], index: 11, kind: input, shape index: {}]   ;;  %s13355_s12 = inlined_call_operand.hbm [shape: bf16[2,64,256], index: 12, kind: input, shape index: {}]   ;;  %s13356_s13 = inlined_call_operand.hbm [shape: f32[2,1,256], index: 13, kind: input, shape index: {}]   ;;  %s13357_s14 = inlined_call_operand.vmem [shape: bf16[2,256,64], index: 14, kind: input, shape index: {}]   ;;  %s13358_s15 = inlined_call_operand.hbm [shape: f32[2,1,64], index: 15, kind: input, shape index: {}]   ;;  %s13359_s16 = inlined_call_operand.hbm [shape: f32[1,64], index: 16, kind: input, shape index: {}]   ;;  %s13360_s17 = inlined_call_operand.hbm [shape: f32[1,64], index: 17, kind: input, shape index: {}]   ;;  %s13361_s18 = inlined_call_operand.vmem [shape: f32[1,1024], index: 18, kind: input, shape index: {}]   ;;  %s13362_s19 = inlined_call_operand.hbm [shape: f32[1,1024], index: 19, kind: input, shape index: {}]   ;;  %s13363_s20 = inlined_call_operand.hbm [shape: f32[1,1024], index: 20, kind: input, shape index: {}]   ;;  %s13364_s21 = inlined_call_operand.hbm [shape: f32[1,512], index: 21, kind: input, shape index: {}]   ;;  %s13365_s22 = inlined_call_operand.hbm [shape: f32[1,128], index: 22, kind: input, shape index: {}]   ;;  %s13366_s23 = inlined_call_operand.hbm [shape: bf16[64,1024], index: 23, kind: input, shape index: {}]   ;;  %s13367_s24 = inlined_call_operand.vmem [shape: bf16[1024,512], index: 24, kind: input, shape index: {}]   ;;  %s13368_s25 = inlined_call_operand.hbm [shape: bf16[512,128], index: 25, kind: input, shape index: {}]   ;;  %s13369_s26 = inlined_call_operand.vmem [shape: f32[16,128], index: 26, kind: output, shape index: {}]  }
   0x1   :  { %13416 = sst [smem:[#allocation59_spill]] %s13343_s0 }
   0x2   :  { %13417 = sst [smem:[#allocation60_spill]] %s13344_s1 }
   0x3   :  { %13418 = sst [smem:[#allocation61_spill]] %s13345_s2 }
   0x4   :  { %13419 = sst [smem:[#allocation62_spill]] %s13346_s3 }
   0x5   :  { %13420 = sst [smem:[#allocation63_spill]] %s13347_s4 }
   0x6   :  { %13421 = sst [smem:[#allocation64_spill]] %s13348_s5 }
   0x7   :  { %13422 = sst [smem:[#allocation65_spill]] %s13349_s6 }
   0x8   :  { %13423 = sst [smem:[#allocation66_spill]] %s13350_s7 }
   0x9   :  { %13424 = sst [smem:[#allocation67_spill]] %s13351_s8 }
   0xa   :  { %13425 = sst [smem:[#allocation68_spill]] %s13352_s9 }
   0xb   :  { %13426 = sst [smem:[#allocation69_spill]] %s13353_s10 }
   0xc   :  { %13427 = sst [smem:[#allocation70_spill]] %s13354_s11 }
   0xd   :  { %13428 = sst [smem:[#allocation71_spill]] %s13355_s12 }
   0xe   :  { %13429 = sst [smem:[#allocation72_spill]] %s13356_s13 }
   0xf   :  { %13430 = sst [smem:[#allocation73_spill]] %s13357_s14 }
  0x10   :  { %13431 = sst [smem:[#allocation74_spill]] %s13359_s16 }
  0x11   :  { %13432 = sst [smem:[#allocation75_spill]] %s13361_s18 }
  0x12   :  { %13433 = sst [smem:[#allocation76_spill]] %s13362_s19 }
  0x13   :  { %13434 = sst [smem:[#allocation77_spill]] %s13364_s21 }
  0x14   :  { %13435 = sst [smem:[#allocation78_spill]] %s13366_s23 }
  0x15   :  { %13436 = sst [smem:[#allocation79_spill]] %s13367_s24 }
  0x16   :  { %13437 = sst [smem:[#allocation80_spill]] %s13368_s25 }
  0x17   :  { %13438 = sst [smem:[#allocation81_spill]] %s13369_s26 }
  0x18   :  { %31 = vsyncpa [#allocation8], 0 }
  0x19   :  { %32 = vsyncpa [#allocation10], 0 }
  0x1a   :  { %34 = vsyncpa [#allocation10 + $0x1], 0 }
  0x1b   :  { %35 = vsyncpa [#allocation13], 0 }
  0x1c   :  { %37 = vsyncpa [#allocation13 + $0x1], 0 }
  0x1d   :  { %38 = vsyncpa [#allocation16], 0 }
  0x1e   :  { %40 = vsyncpa [#allocation16 + $0x1], 0 }
  0x1f   :  { %41 = vsyncpa [#allocation19], 0 }
  0x20   :  { %43 = vsyncpa [#allocation19 + $0x1], 0 }
  0x21   :  { %44 = vsyncpa [#allocation22], 0 }
  0x22   :  { %46 = vsyncpa [#allocation22 + $0x1], 0 }
  0x23   :  { %47 = vsyncpa [#allocation25], 0 }
  0x24   :  { %48 = vsyncpa [#allocation28], 0 }
  0x25   :  { %49 = vsyncpa [#allocation31], 0  ;;  %s10857_s27 = smov 0   ;;  %s10859_s3 = smov 0  }
  0x26   :  { %s10861_s7 = smov 0   ;;  %s10863_s28 = smov 0  }
  0x27 LB: > { %13439 = sst [smem:[#allocation52_spill]] %s10669_s3  ;;  %s10679_s8 = smov [#allocation24]   ;;  %s10677_s28 = sphi %s10863_s28, %s13517_s28   ;;  %s10673_s7 = sphi %s10861_s7, %s13520_s7   ;;  %s10669_s3 = sphi %s10859_s3, %s13519_s3   ;;  %s10665_s27 = sphi %s10857_s27, %s13518_s27  }
  0x28   : > { %13440 = sst [smem:[#allocation53_spill]] %s10673_s7  ;;  %s705_s4 = sshll.u32 %s10679_s8, 4  ;;  %s706_s4 = int_to_ptr.vmem [resolvable:$true] %s705_s4 }
  0x29   : > { %s10878_s29 = sadd.s32 4294967295, %s10677_s28   ;;  %p9207_p0 = scmp.ge.s32.totalorder %s10677_s28, 1 }
  0x2a   : > { %13441 = sst [smem:[#allocation54_spill]] %s10878_s29  ;;  %p13382_p1 = scmp.eq.s32.totalorder %s10878_s29, 0 }
  0x2b   : > { %p672_p2 = scmp.lt.s32.totalorder %s10677_s28, 4  ;;  %s10680_s9 = smov [#allocation27]  }
  0x2c   : > { %s730_s30 = sshll.u32 %s10680_s9, 4  ;;  %s10681_s2 = smov [#allocation30]   ;;  %s10890_s30 = int_to_ptr.vmem [resolvable:$true] %s730_s30 }
  0x2d   : > { %p10884_p4 = pnand %p9207_p0, %p672_p2  ;;  %s752_s5 = sshll.u32 %s10681_s2, 4  ;;  %s10898_s5 = int_to_ptr.vmem [resolvable:$true] %s752_s5 }
  0x2e   : > { %s13445_s16 = sld [smem:[#allocation74_spill]] }
  0x2f   : > { %s13442_s0 = scalar_select %p10884_p4, 1, 0 }
  0x30   : > { %p9754_p5 = pneg %p10884_p4 }
  0x31   : > { %13443 = sst [smem:[#allocation55_spill]] %s13442_s0 }
  0x32   : > { %p10894_p6 = pnand %p9754_p5, %p13382_p1 }
  0x34   : > { %s13444_s10 = scalar_select %p10894_p6, 1, 0 }
  0x35   : > { %s10087_s8 = scalar_lea.hbm %s13445_s16, 16  ;;  %p10908_p8 = pneg %p10894_p6 }
  0x36   : > { %p10088_p7 = scmp.ne.s32.totalorder %s13445_s16, %s10087_s8  ;;  %p10094_p11 = scmp.lt.u32.totalorder %s10087_s8, %s13445_s16 }
  0x37   : > { %s13446_s9 = scalar_select %p10908_p8, 1, 0 }
  0x38   : > { %p10090_p9 = pnand %p10908_p8, %p10088_p7 }
  0x3a   : > { %p10091_p10 = pneg %p10090_p9 }
  0x3c   : > { %p10096_p12 = pnand %p10094_p11, %p10091_p10 }
  0x3e   : > { %10099 = shalt.err (!%p10096_p12)
}
  0x3f   : > { %s10100_s6 = scalar_lea.vmem %s706_s4, 16  ;;  %s10107_s18 = scalar_lea.vmem %s706_s4, 32 }
  0x40   : > { %p10101_p13 = scmp.ne.s32.totalorder %s706_s4, %s10100_s6  ;;  %p10108_p5 = scmp.lt.s32.totalorder %s706_s4, %s706_s4 }
  0x41   : > { %p10109_p3 = scmp.lt.s32.totalorder %s10107_s18, %s10100_s6 }
  0x42   : > { %p10103_p0 = pnand %p10101_p13, %p10908_p8 }
  0x43   : > { %p10110_p1 = por %p10109_p3, %p10108_p5 }
  0x44   : > { %p10104_p2 = pneg %p10103_p0 }
  0x46   : > { %p10111_p4 = pnand %p10110_p1, %p10104_p2 }
  0x48   : > { %10114 = shalt.err (!%p10111_p4)
}
  0x49   : > { %9760 = dma.hbm_to_vmem [thread:$0]  (!%p10894_p6), %s13445_s16, 16, %s706_s4, [#allocation25]  }
  0x4a   : > { %s13447_s19 = sld [smem:[#allocation76_spill]] }
  0x50   : > { %s10115_s2 = scalar_lea.hbm %s13447_s19, 128 }
  0x51   : > { %p10116_p7 = scmp.ne.s32.totalorder %s13447_s19, %s10115_s2  ;;  %p10122_p1 = scmp.lt.u32.totalorder %s10115_s2, %s13447_s19 }
  0x53   : > { %p10118_p9 = pnand %p10116_p7, %p10908_p8 }
  0x55   : > { %p10119_p3 = pneg %p10118_p9 }
  0x57   : > { %p10124_p4 = pnand %p10122_p1, %p10119_p3 }
  0x59   : > { %10127 = shalt.err (!%p10124_p4)
}
  0x5a   : > { %s10128_s4 = scalar_lea.vmem %s10890_s30, 128  ;;  %p10136_p13 = scmp.lt.s32.totalorder %s10890_s30, %s10890_s30 }
  0x5b   : > { %p10129_p10 = scmp.ne.s32.totalorder %s10890_s30, %s10128_s4  ;;  %p10137_p0 = scmp.lt.s32.totalorder %s10128_s4, %s10128_s4 }
  0x5d   : > { %p10131_p11 = pnand %p10129_p10, %p10908_p8  ;;  %p10138_p2 = por %p10137_p0, %p10136_p13 }
  0x5f   : > { %p10132_p12 = pneg %p10131_p11 }
  0x61   : > { %p10139_p5 = pnand %p10138_p2, %p10132_p12 }
  0x63   : > { %10142 = shalt.err (!%p10139_p5)
}
  0x64   : > { %9766 = dma.hbm_to_vmem [thread:$0]  (!%p10894_p6), %s13447_s19, 128, %s10890_s30, [#allocation28]  }
  0x65   : > { %s13448_s21 = sld [smem:[#allocation77_spill]] }
  0x6b   : > { %s10143_s25 = scalar_lea.hbm %s13448_s21, 64 }
  0x6c   : > { %p10144_p7 = scmp.ne.s32.totalorder %s13448_s21, %s10143_s25  ;;  %p10150_p1 = scmp.lt.u32.totalorder %s10143_s25, %s13448_s21 }
  0x6e   : > { %p10146_p9 = pnand %p10144_p7, %p10908_p8 }
  0x70   : > { %p10147_p3 = pneg %p10146_p9 }
  0x72   : > { %p10152_p4 = pnand %p10150_p1, %p10147_p3 }
  0x74   : > { %10155 = shalt.err (!%p10152_p4)
}
  0x75   : > { %s10156_s30 = scalar_lea.vmem %s10898_s5, 64  ;;  %p10164_p13 = scmp.lt.s32.totalorder %s10898_s5, %s10898_s5 }
  0x76   : > { %p10157_p10 = scmp.ne.s32.totalorder %s10898_s5, %s10156_s30  ;;  %p10165_p0 = scmp.lt.s32.totalorder %s10156_s30, %s10156_s30 }
  0x78   : > { %p10159_p11 = pnand %p10157_p10, %p10908_p8  ;;  %p10166_p2 = por %p10165_p0, %p10164_p13 }
  0x7a   : > { %p10160_p12 = pneg %p10159_p11 }
  0x7c   : > { %p10167_p5 = pnand %p10166_p2, %p10160_p12 }
  0x7e   : > { %10170 = shalt.err (!%p10167_p5)
}
  0x7f   : > { %9772 = dma.hbm_to_vmem [thread:$0]  (!%p10894_p6), %s13448_s21, 64, %s10898_s5, [#allocation31]  }
  0x80   : > { %s10971_s24 = sadd.s32 1, %s10677_s28   ;;  %p143_p7 = scmp.lt.s32.totalorder %s10677_s28, 1 }
  0x81   : > { %13449 = sst [smem:[#allocation56_spill]] %s10971_s24  ;;  %p145_p9 = scmp.lt.s32.totalorder %s10971_s24, 1 }
  0x82   : > { %s150_s26 = sadd.s32 1, %s10673_s7  ;;  %p157_p3 = scmp.ne.s32.totalorder %s10673_s7, %s10669_s3 }
  0x83   : > { %s10979_s1 = scalar_select %p143_p7, %s10677_s28, 1 }
  0x84   : > { %s146_s25 = scalar_select %p145_p9, %s10971_s24, 1 }
  0x85   : > { %p158_p1 = scmp.eq.s32.totalorder %s10677_s28, 0  ;;  %p163_p4 = scmp.ne.s32.totalorder %s10669_s3, %s10665_s27 }
  0x86   : > { %s147_s8 = ssub.s32 %s10979_s1, %s146_s25  ;;  %p9814_p10 = scmp.lt.s32.totalorder %s10677_s28, 3 }
  0x87   : > { %p148_p11 = scmp.eq.s32.totalorder %s147_s8, 0  ;;  %p159_p12 = por %p158_p1, %p157_p3 }
  0x88   : > { %p13450_p13 = scmp.eq.s32.totalorder %s10878_s29, 0  ;;  %s10994_s2 = sand.u32 1, %s10677_s28  }
  0x89   : > { %s10997_s6 = scalar_select %p148_p11, %s10673_s7, %s150_s26  }
  0x8a   : > { %p10989_p0 = por %p13450_p13, %p163_p4  ;;  %s11000_s18 = sand.u32 1, %s10673_s7  }
  0x8b   : > { %13453 = sst [smem:[#allocation58_spill]] %s10997_s6  ;;  %s11003_s30 = sshll.u32 %s10979_s1, 4 }
  0x8c   : > { %s13451_s5 = scalar_select %p10989_p0, 1, 0 }
  0x8d   : > { %s13454_s23 = sld [smem:[#allocation63_spill]]  ;;  %s777_s28 = scalar_lea.vmem [#allocation9], %s11000_s18 }
  0x8e   : > { %13452 = sst [smem:[#allocation57_spill]] %s13451_s5  ;;  %s786_s8 = sshll.u32 %s777_s28, 4  ;;  %s11012_s8 = int_to_ptr.vmem [resolvable:$true] %s786_s8 }
  0x8f   : > { %p11014_p2 = pnand %p9814_p10, %p159_p12  ;;  %s13397_s19 = scalar_lea.sflag [#allocation10], %s10994_s2 }
  0x91   : > { %s13455_s26 = scalar_select %p11014_p2, 1, 0 }
  0x92   : > { %p11024_p7 = pneg %p11014_p2 }
  0x93   : > { %s11009_s25 = scalar_lea.hbm %s13454_s23, %s11003_s30  ;;  %s10176_s6 = scalar_lea.hbm %s13454_s23, 32 }
  0x94   : > { %s10171_s21 = scalar_lea.hbm %s11009_s25, 16  ;;  %p10177_p1 = scmp.lt.u32.totalorder %s11009_s25, %s13454_s23 }
  0x95   : > { %p10172_p5 = scmp.ne.s32.totalorder %s11009_s25, %s10171_s21  ;;  %p10178_p4 = scmp.lt.u32.totalorder %s10176_s6, %s10171_s21 }
  0x96   : > { %s13456_s27 = scalar_select %p11024_p7, 1, 0 }
  0x97   : > { %p10174_p9 = pnand %p11024_p7, %p10172_p5  ;;  %p10179_p10 = por %p10178_p4, %p10177_p1 }
  0x98   : > { %p10180_p11 = scmp.lt.u32.totalorder %s10171_s21, %s11009_s25 }
  0x99   : > { %p10175_p3 = pneg %p10174_p9 }
  0x9a   : > { %p10181_p12 = por %p10180_p11, %p10179_p10 }
  0x9c   : > { %p10182_p13 = pnand %p10181_p12, %p10175_p3 }
  0x9e   : > { %10185 = shalt.err (!%p10182_p13)
}
  0x9f   : > { %s10186_s16 = scalar_lea.vmem %s11012_s8, 16  ;;  %s10682_s4 = smov [#allocation9]  }
  0xa0   : > { %p10187_p5 = scmp.ne.s32.totalorder %s11012_s8, %s10186_s16  ;;  %s10191_s28 = sshll.u32 %s10682_s4, 4  ;;  %s10192_s28 = int_to_ptr.vmem [resolvable:$false] %s10191_s28 }
  0xa1   : > { %s10193_s7 = scalar_lea.vmem %s10192_s28, 32  ;;  %p10194_p6 = scmp.lt.s32.totalorder %s11012_s8, %s10192_s28 }
  0xa2   : > { %p10189_p9 = pnand %p10187_p5, %p11024_p7  ;;  %p10195_p8 = scmp.lt.s32.totalorder %s10193_s7, %s10186_s16 }
  0xa4   : > { %p10190_p0 = pneg %p10189_p9  ;;  %p10196_p1 = por %p10195_p8, %p10194_p6 }
  0xa6   : > { %p10197_p4 = pnand %p10196_p1, %p10190_p0 }
  0xa8   : > { %10200 = shalt.err (!%p10197_p4)
}
  0xa9   : > { %9779 = dma.hbm_to_vmem [thread:$0]  (!%p11014_p2), %s11009_s25, 16, %s11012_s8, %s13397_s19  }
  0xaa   : > { %s9392_s21 = sshll.u32 %s10979_s1, 10  ;;  %s13457_s24 = sshll.u32 %s11000_s18, 6 }
  0xab   : > { %s816_s6 = scalar_lea.vmem [#allocation12], %s13457_s24  ;;  %s13458_s7 = sld [smem:[#allocation65_spill]] }
  0xac   : > { %s825_s4 = sshll.u32 %s816_s6, 4  ;;  %s13409_s5 = scalar_lea.sflag [#allocation13], %s10994_s2  ;;  %s11059_s4 = int_to_ptr.vmem [resolvable:$true] %s825_s4 }
  0xb1   : > { %s13459_s23 = smov %s13458_s7  ;;  %s11057_s14 = scalar_lea.hbm %s13458_s7, %s9392_s21 }
  0xb2   : > { %s10201_s3 = scalar_lea.hbm %s11057_s14, 1024  ;;  %s10206_s24 = scalar_lea.hbm %s13459_s23, 2048 }
  0xb3   : > { %p10202_p6 = scmp.ne.s32.totalorder %s11057_s14, %s10201_s3  ;;  %p10207_p3 = scmp.lt.u32.totalorder %s11057_s14, %s13459_s23 }
  0xb4   : > { %p10208_p10 = scmp.lt.u32.totalorder %s10206_s24, %s10201_s3  ;;  %p10210_p12 = scmp.lt.u32.totalorder %s10201_s3, %s11057_s14 }
  0xb5   : > { %p10204_p8 = pnand %p10202_p6, %p11024_p7 }
  0xb6   : > { %p10209_p11 = por %p10208_p10, %p10207_p3 }
  0xb7   : > { %p10205_p0 = pneg %p10204_p8 }
  0xb8   : > { %p10211_p13 = por %p10210_p12, %p10209_p11 }
  0xba   : > { %p10212_p5 = pnand %p10211_p13, %p10205_p0 }
  0xbc   : > { %10215 = shalt.err (!%p10212_p5)
}
  0xbd   : > { %s10216_s28 = scalar_lea.vmem %s11059_s4, 1024  ;;  %s10683_s7 = smov [#allocation12]  }
  0xbe   : > { %p10217_p9 = scmp.ne.s32.totalorder %s11059_s4, %s10216_s28  ;;  %s10221_s25 = sshll.u32 %s10683_s7, 4  ;;  %s10222_s25 = int_to_ptr.vmem [resolvable:$false] %s10221_s25 }
  0xbf   : > { %s10223_s8 = scalar_lea.vmem %s10222_s25, 2048  ;;  %p10224_p6 = scmp.lt.s32.totalorder %s11059_s4, %s10222_s25 }
  0xc0   : > { %p10219_p1 = pnand %p10217_p9, %p11024_p7  ;;  %p10225_p8 = scmp.lt.s32.totalorder %s10223_s8, %s10216_s28 }
  0xc2   : > { %p10220_p4 = pneg %p10219_p1  ;;  %p10226_p3 = por %p10225_p8, %p10224_p6 }
  0xc4   : > { %p10227_p10 = pnand %p10226_p3, %p10220_p4 }
  0xc6   : > { %10230 = shalt.err (!%p10227_p10)
}
  0xc7   : > { %s13402_s3 = smov 128   ;;  %s13403_s24 = smov 8  }
  0xc8   : > { %9785 = dma.hbm_to_vmem [thread:$0]  (!%p11014_p2), %s11057_s14, 1024, %s11059_s4, %s13409_s5, %s13402_s3, %s13402_s3, %s13403_s24  }
  0xc9   : > { %s13460_s12 = sld [smem:[#allocation71_spill]]  ;;  %s13461_s7 = sshll.u32 %s11000_s18, 6 }
  0xca   : > { %s930_s25 = scalar_lea.vmem [#allocation20], %s13461_s7  ;;  %s13462_s29 = sld [smem:[#allocation68_spill]] }
  0xcb   : > { %s939_s8 = sshll.u32 %s930_s25, 4  ;;  %s872_s14 = scalar_lea.vmem [#allocation15], %s11000_s18  ;;  %s11097_s8 = int_to_ptr.vmem [resolvable:$true] %s939_s8 }
  0xcc   : > { %s881_s4 = sshll.u32 %s872_s14, 4  ;;  %s13406_s6 = scalar_lea.sflag [#allocation16], %s10994_s2  ;;  %s882_s4 = int_to_ptr.vmem [resolvable:$true] %s881_s4 }
  0xcf   : > { %s11093_s28 = scalar_lea.hbm %s13460_s12, %s9392_s21 }
  0xd0   : > { %s11103_s0 = scalar_lea.hbm %s13462_s29, %s11003_s30  ;;  %s10236_s25 = scalar_lea.hbm %s13462_s29, 32 }
  0xd1   : > { %s10231_s21 = scalar_lea.hbm %s11103_s0, 16  ;;  %p10237_p13 = scmp.lt.u32.totalorder %s11103_s0, %s13462_s29 }
  0xd2   : > { %p10232_p0 = scmp.ne.s32.totalorder %s11103_s0, %s10231_s21  ;;  %p10238_p5 = scmp.lt.u32.totalorder %s10236_s25, %s10231_s21 }
  0xd3   : > { %p10240_p1 = scmp.lt.u32.totalorder %s10231_s21, %s11103_s0 }
  0xd4   : > { %p10234_p11 = pnand %p10232_p0, %p11024_p7  ;;  %p10239_p9 = por %p10238_p5, %p10237_p13 }
  0xd6   : > { %p10235_p12 = pneg %p10234_p11  ;;  %p10241_p4 = por %p10240_p1, %p10239_p9 }
  0xd8   : > { %p10242_p6 = pnand %p10241_p4, %p10235_p12 }
  0xda   : > { %10245 = shalt.err (!%p10242_p6)
}
  0xdb   : > { %s10246_s14 = scalar_lea.vmem %s882_s4, 16  ;;  %s10686_s3 = smov [#allocation15]  }
  0xdc   : > { %p10247_p8 = scmp.ne.s32.totalorder %s882_s4, %s10246_s14  ;;  %s10251_s24 = sshll.u32 %s10686_s3, 4  ;;  %s10252_s24 = int_to_ptr.vmem [resolvable:$false] %s10251_s24 }
  0xdd   : > { %s10253_s16 = scalar_lea.vmem %s10252_s24, 32  ;;  %p10254_p0 = scmp.lt.s32.totalorder %s882_s4, %s10252_s24 }
  0xde   : > { %p10249_p3 = pnand %p10247_p8, %p11024_p7  ;;  %p10255_p11 = scmp.lt.s32.totalorder %s10253_s16, %s10246_s14 }
  0xe0   : > { %p10250_p10 = pneg %p10249_p3  ;;  %p10256_p2 = por %p10255_p11, %p10254_p0 }
  0xe2   : > { %p10257_p5 = pnand %p10256_p2, %p10250_p10 }
  0xe4   : > { %10260 = shalt.err (!%p10257_p5)
}
  0xe5   : > { %p13463_p13 = scmp.ne.s32.totalorder %s13455_s26, 0  ;;  %s13464_s11 = sld [smem:[#allocation70_spill]] }
  0xe6   : > { %s910_s24 = scalar_lea.vmem [#allocation18], %s11000_s18  ;;  %s9230_s19 = sshll.u32 %s11000_s18, 1 }
  0xe7   : > { %9791 = dma.hbm_to_vmem [thread:$0]  (!%p13463_p13), %s11103_s0, 16, %s882_s4, %s13406_s6  }
  0xe8   : > { %s919_s25 = sshll.u32 %s910_s24, 4  ;;  %s13407_s23 = scalar_lea.sflag [#allocation19], %s10994_s2  ;;  %s11133_s25 = int_to_ptr.vmem [resolvable:$true] %s919_s25 }
  0xeb   : > { %s11130_s7 = scalar_lea.hbm %s13464_s11, %s11003_s30  ;;  %s10266_s16 = scalar_lea.hbm %s13464_s11, 32 }
  0xec   : > { %s10261_s14 = scalar_lea.hbm %s11130_s7, 16  ;;  %p10267_p1 = scmp.lt.u32.totalorder %s11130_s7, %s13464_s11 }
  0xed   : > { %p10262_p2 = scmp.ne.s32.totalorder %s11130_s7, %s10261_s14  ;;  %p10268_p4 = scmp.lt.u32.totalorder %s10266_s16, %s10261_s14 }
  0xee   : > { %p10270_p8 = scmp.lt.u32.totalorder %s10261_s14, %s11130_s7 }
  0xef   : > { %p10264_p12 = pnand %p10262_p2, %p11024_p7  ;;  %p10269_p6 = por %p10268_p4, %p10267_p1 }
  0xf1   : > { %p10265_p9 = pneg %p10264_p12  ;;  %p10271_p3 = por %p10270_p8, %p10269_p6 }
  0xf3   : > { %p10272_p10 = pnand %p10271_p3, %p10265_p9 }
  0xf5   : > { %10275 = shalt.err (!%p10272_p10)
}
  0xf6   : > { %s10276_s24 = scalar_lea.vmem %s11133_s25, 16  ;;  %s10687_s0 = smov [#allocation18]  }
  0xf7   : > { %p10277_p0 = scmp.ne.s32.totalorder %s11133_s25, %s10276_s24  ;;  %s10281_s4 = sshll.u32 %s10687_s0, 4  ;;  %s10282_s4 = int_to_ptr.vmem [resolvable:$false] %s10281_s4 }
  0xf8   : > { %s10283_s21 = scalar_lea.vmem %s10282_s4, 32  ;;  %p10284_p2 = scmp.lt.s32.totalorder %s11133_s25, %s10282_s4 }
  0xf9   : > { %p10279_p11 = pnand %p10277_p0, %p11024_p7  ;;  %p10285_p12 = scmp.lt.s32.totalorder %s10283_s21, %s10276_s24 }
  0xfb   : > { %p10280_p5 = pneg %p10279_p11  ;;  %p10286_p1 = por %p10285_p12, %p10284_p2 }
  0xfd   : > { %p10287_p4 = pnand %p10286_p1, %p10280_p5 }
  0xff   : > { %10290 = shalt.err (!%p10287_p4)
}
 0x100   : > { %9797 = dma.hbm_to_vmem [thread:$0]  (!%p13463_p13), %s11130_s7, 16, %s11133_s25, %s13407_s23  }
 0x101   : > { %s9395_s14 = sshll.u32 %s10979_s1, 5  ;;  %s13465_s13 = sld [smem:[#allocation72_spill]] }
 0x102   : > { %s953_s24 = scalar_lea.vmem [#allocation21], %s9230_s19  ;;  %s950_s21 = scalar_lea.sflag [#allocation22], %s10994_s2 }
 0x103   : > { %s963_s4 = sshll.u32 %s953_s24, 4  ;;  %s964_s4 = int_to_ptr.vmem [resolvable:$true] %s963_s4 }
 0x107   : > { %s11164_s0 = scalar_lea.hbm %s13465_s13, %s9395_s14  ;;  %s10296_s16 = scalar_lea.hbm %s13465_s13, 64 }
 0x108   : > { %s10291_s6 = scalar_lea.hbm %s11164_s0, 32  ;;  %p10297_p3 = scmp.lt.u32.totalorder %s11164_s0, %s13465_s13 }
 0x109   : > { %p10292_p9 = scmp.ne.s32.totalorder %s11164_s0, %s10291_s6  ;;  %p10298_p10 = scmp.lt.u32.totalorder %s10296_s16, %s10291_s6 }
 0x10a   : > { %p10300_p11 = scmp.lt.u32.totalorder %s10291_s6, %s11164_s0 }
 0x10b   : > { %p10294_p6 = pnand %p10292_p9, %p11024_p7  ;;  %p10299_p0 = por %p10298_p10, %p10297_p3 }
 0x10d   : > { %p10295_p8 = pneg %p10294_p6  ;;  %p10301_p5 = por %p10300_p11, %p10299_p0 }
 0x10f   : > { %p10302_p2 = pnand %p10301_p5, %p10295_p8 }
 0x111   : > { %10305 = shalt.err (!%p10302_p2)
}
 0x112   : > { %s10306_s19 = scalar_lea.vmem %s964_s4, 32  ;;  %s10688_s24 = smov [#allocation21]  }
 0x113   : > { %p10307_p12 = scmp.ne.s32.totalorder %s964_s4, %s10306_s19  ;;  %s10311_s23 = sshll.u32 %s10688_s24, 4  ;;  %s10312_s23 = int_to_ptr.vmem [resolvable:$false] %s10311_s23 }
 0x114   : > { %s10313_s7 = scalar_lea.vmem %s10312_s23, 64  ;;  %p10314_p9 = scmp.lt.s32.totalorder %s964_s4, %s10312_s23 }
 0x115   : > { %p10309_p1 = pnand %p10307_p12, %p11024_p7  ;;  %p10315_p6 = scmp.lt.s32.totalorder %s10313_s7, %s10306_s19 }
 0x117   : > { %p10310_p4 = pneg %p10309_p1  ;;  %p10316_p13 = por %p10315_p6, %p10314_p9 }
 0x119   : > { %p10317_p3 = pnand %p10316_p13, %p10310_p4 }
 0x11b   : > { %10320 = shalt.err (!%p10317_p3)
}
 0x11c   : > { %p13466_p10 = scmp.ne.s32.totalorder %s13455_s26, 0  ;;  %s10689_s6 = smov [#allocation7]  }
 0x11d   : > { %s694_s25 = sshll.u32 %s10689_s6, 4  ;;  %s10690_s16 = smov [#allocation26]   ;;  %s695_s25 = int_to_ptr.vmem [resolvable:$true] %s694_s25 }
 0x11e   : > { %9803 = dma.hbm_to_vmem [thread:$0]  (!%p13466_p10), %s11164_s0, 32, %s964_s4, %s950_s21  }
 0x11f   : > { %s716_s14 = sshll.u32 %s10690_s16, 4  ;;  %s13467_s5 = sld [smem:[#allocation62_spill]]  ;;  %s717_s14 = int_to_ptr.vmem [resolvable:$true] %s716_s14 }
 0x120   : > { %p13468_p8 = scmp.ne.s32.totalorder %s13446_s9, 0 }
 0x125   : > { %s10321_s23 = scalar_lea.hbm %s13467_s5, 16 }
 0x126   : > { %p10322_p13 = scmp.ne.s32.totalorder %s13467_s5, %s10321_s23  ;;  %p10328_p5 = scmp.lt.u32.totalorder %s10321_s23, %s13467_s5 }
 0x128   : > { %p10324_p0 = pnand %p10322_p13, %p13468_p8 }
 0x12a   : > { %p10325_p11 = pneg %p10324_p0 }
 0x12c   : > { %p10330_p2 = pnand %p10328_p5, %p10325_p11 }
 0x12e   : > { %10333 = shalt.err (!%p10330_p2)
}
 0x12f   : > { %s10334_s0 = scalar_lea.vmem %s695_s25, 16  ;;  %s10341_s4 = scalar_lea.vmem %s695_s25, 32 }
 0x130   : > { %p10335_p12 = scmp.ne.s32.totalorder %s695_s25, %s10334_s0  ;;  %p10342_p9 = scmp.lt.s32.totalorder %s695_s25, %s695_s25 }
 0x131   : > { %p10343_p6 = scmp.lt.s32.totalorder %s10341_s4, %s10334_s0 }
 0x132   : > { %p10337_p1 = pnand %p10335_p12, %p13468_p8 }
 0x133   : > { %p10344_p3 = por %p10343_p6, %p10342_p9 }
 0x134   : > { %p10338_p4 = pneg %p10337_p1 }
 0x136   : > { %p10345_p10 = pnand %p10344_p3, %p10338_p4 }
 0x138   : > { %10348 = shalt.err (!%p10345_p10)
}
 0x139   : > { %p13469_p13 = scmp.ne.s32.totalorder %s13444_s10, 0  ;;  %s10349_s3 = scalar_lea.hbm %s13360_s17, 16 }
 0x13a   : > { %p10350_p0 = scmp.ne.s32.totalorder %s13360_s17, %s10349_s3  ;;  %p10356_p10 = scmp.lt.u32.totalorder %s10349_s3, %s13360_s17 }
 0x13b   : > { %9757 = dma.hbm_to_vmem [thread:$0]  (!%p13469_p13), %s13467_s5, 16, %s695_s25, [#allocation8]  }
 0x13c   : > { %p10352_p11 = pnand %p10350_p0, %p13468_p8 }
 0x13e   : > { %p10353_p5 = pneg %p10352_p11 }
 0x140   : > { %p10358_p2 = pnand %p10356_p10, %p10353_p5 }
 0x142   : > { %10361 = shalt.err (!%p10358_p2)
}
 0x143   : > { %s10362_s0 = scalar_lea.vmem %s717_s14, 16  ;;  %s10369_s25 = scalar_lea.vmem %s717_s14, 32 }
 0x144   : > { %p10363_p12 = scmp.ne.s32.totalorder %s717_s14, %s10362_s0  ;;  %p10370_p9 = scmp.lt.s32.totalorder %s717_s14, %s717_s14 }
 0x145   : > { %p10371_p6 = scmp.lt.s32.totalorder %s10369_s25, %s10362_s0 }
 0x146   : > { %p10365_p1 = pnand %p10363_p12, %p13468_p8 }
 0x147   : > { %p10372_p3 = por %p10371_p6, %p10370_p9 }
 0x148   : > { %p10366_p4 = pneg %p10365_p1 }
 0x14a   : > { %p10373_p7 = pnand %p10372_p3, %p10366_p4 }
 0x14c   : > { %10376 = shalt.err (!%p10373_p7)
}
 0x14d   : > { %9763 = dma.hbm_to_vmem [thread:$0]  (!%p13469_p13), %s13360_s17, 16, %s717_s14, [#allocation25]  }
 0x14e   : > { %s10691_s16 = smov [#allocation29]   ;;  %s10692_s13 = smov [#allocation32]  }
 0x14f   : > { %s741_s11 = sshll.u32 %s10691_s16, 4  ;;  %s763_s3 = sshll.u32 %s10692_s13, 4  ;;  %s742_s11 = int_to_ptr.vmem [resolvable:$true] %s741_s11  ;;  %s764_s3 = int_to_ptr.vmem [resolvable:$true] %s763_s3 }
 0x150   : > { %s10377_s19 = scalar_lea.hbm %s13363_s20, 128 }
 0x151   : > { %p10378_p7 = scmp.ne.s32.totalorder %s13363_s20, %s10377_s19  ;;  %p10384_p5 = scmp.lt.u32.totalorder %s10377_s19, %s13363_s20 }
 0x153   : > { %p10380_p0 = pnand %p10378_p7, %p13468_p8 }
 0x155   : > { %p10381_p11 = pneg %p10380_p0 }
 0x157   : > { %p10386_p10 = pnand %p10384_p5, %p10381_p11 }
 0x159   : > { %10389 = shalt.err (!%p10386_p10)
}
 0x15a   : > { %s10390_s14 = scalar_lea.vmem %s742_s11, 128  ;;  %p10398_p4 = scmp.lt.s32.totalorder %s742_s11, %s742_s11 }
 0x15b   : > { %p10391_p2 = scmp.ne.s32.totalorder %s742_s11, %s10390_s14  ;;  %p10399_p9 = scmp.lt.s32.totalorder %s10390_s14, %s10390_s14 }
 0x15d   : > { %p10393_p12 = pnand %p10391_p2, %p13468_p8  ;;  %p10400_p6 = por %p10399_p9, %p10398_p4 }
 0x15f   : > { %p10394_p1 = pneg %p10393_p12 }
 0x161   : > { %p10401_p3 = pnand %p10400_p6, %p10394_p1 }
 0x163   : > { %10404 = shalt.err (!%p10401_p3)
}
 0x164   : > { %9769 = dma.hbm_to_vmem [thread:$0]  (!%p13469_p13), %s13363_s20, 128, %s742_s11, [#allocation28]  }
 0x165   : > { %s10405_s23 = scalar_lea.hbm %s13365_s22, 16 }
 0x166   : > { %p10406_p7 = scmp.ne.s32.totalorder %s13365_s22, %s10405_s23  ;;  %p10412_p5 = scmp.lt.u32.totalorder %s10405_s23, %s13365_s22 }
 0x168   : > { %p10408_p0 = pnand %p10406_p7, %p13468_p8 }
 0x16a   : > { %p10409_p11 = pneg %p10408_p0 }
 0x16c   : > { %p10414_p10 = pnand %p10412_p5, %p10409_p11 }
 0x16e   : > { %10417 = shalt.err (!%p10414_p10)
}
 0x16f   : > { %s10418_s4 = scalar_lea.vmem %s764_s3, 16  ;;  %s10425_s11 = scalar_lea.vmem %s764_s3, 32 }
 0x170   : > { %p10419_p2 = scmp.ne.s32.totalorder %s764_s3, %s10418_s4  ;;  %p10426_p4 = scmp.lt.s32.totalorder %s764_s3, %s764_s3 }
 0x171   : > { %p10427_p9 = scmp.lt.s32.totalorder %s10425_s11, %s10418_s4 }
 0x172   : > { %p10421_p12 = pnand %p10419_p2, %p13468_p8 }
 0x173   : > { %p10428_p6 = por %p10427_p9, %p10426_p4 }
 0x174   : > { %p10422_p1 = pneg %p10421_p12 }
 0x176   : > { %p10429_p3 = pnand %p10428_p6, %p10422_p1 }
 0x178   : > { %10432 = shalt.err (!%p10429_p3)
}
 0x179   : > { %9775 = dma.hbm_to_vmem [thread:$0]  (!%p13469_p13), %s13365_s22, 16, %s764_s3, [#allocation31]  }
 0x17a   : > { %s13470_s13 = sld [smem:[#allocation64_spill]]  ;;  %s796_s23 = scalar_lea.vmem [#allocation11], %s11000_s18 }
 0x17b   : > { %s805_s19 = sshll.u32 %s796_s23, 4  ;;  %s9221_s10 = sshll.u32 %s11000_s18, 5  ;;  %s806_s19 = int_to_ptr.vmem [resolvable:$true] %s805_s19 }
 0x17c   : > { %p13471_p7 = scmp.ne.s32.totalorder %s13456_s27, 0 }
 0x180   : > { %s11264_s24 = scalar_lea.hbm %s13470_s13, %s11003_s30  ;;  %s10438_s25 = scalar_lea.hbm %s13470_s13, 32 }
 0x181   : > { %s10433_s7 = scalar_lea.hbm %s11264_s24, 16  ;;  %p10439_p13 = scmp.lt.u32.totalorder %s11264_s24, %s13470_s13 }
 0x182   : > { %p10434_p8 = scmp.ne.s32.totalorder %s11264_s24, %s10433_s7  ;;  %p10440_p5 = scmp.lt.u32.totalorder %s10438_s25, %s10433_s7 }
 0x183   : > { %p10442_p2 = scmp.lt.u32.totalorder %s10433_s7, %s11264_s24 }
 0x184   : > { %p10436_p0 = pnand %p10434_p8, %p13471_p7  ;;  %p10441_p10 = por %p10440_p5, %p10439_p13 }
 0x186   : > { %p10437_p11 = pneg %p10436_p0  ;;  %p10443_p12 = por %p10442_p2, %p10441_p10 }
 0x188   : > { %p10444_p1 = pnand %p10443_p12, %p10437_p11 }
 0x18a   : > { %10447 = shalt.err (!%p10444_p1)
}
 0x18b   : > { %s10448_s14 = scalar_lea.vmem %s806_s19, 16  ;;  %s10693_s6 = smov [#allocation11]  }
 0x18c   : > { %p10449_p4 = scmp.ne.s32.totalorder %s806_s19, %s10448_s14  ;;  %s10453_s16 = sshll.u32 %s10693_s6, 4  ;;  %s10454_s16 = int_to_ptr.vmem [resolvable:$false] %s10453_s16 }
 0x18d   : > { %s10455_s9 = scalar_lea.vmem %s10454_s16, 32  ;;  %p10456_p3 = scmp.lt.s32.totalorder %s806_s19, %s10454_s16 }
 0x18e   : > { %p10451_p9 = pnand %p10449_p4, %p13471_p7  ;;  %p10457_p8 = scmp.lt.s32.totalorder %s10455_s9, %s10448_s14 }
 0x190   : > { %p10452_p6 = pneg %p10451_p9  ;;  %p10458_p0 = por %p10457_p8, %p10456_p3 }
 0x192   : > { %p10459_p5 = pnand %p10458_p0, %p10452_p6 }
 0x194   : > { %10462 = shalt.err (!%p10459_p5)
}
 0x195   : > { %p13472_p13 = scmp.ne.s32.totalorder %s13455_s26, 0  ;;  %s13473_s23 = scalar_lea.sflag [#allocation10], %s10994_s2 }
 0x196   : > { %s9393_s7 = sshll.u32 %s10979_s1, 9  ;;  %s13474_s25 = sld [smem:[#allocation67_spill]] }
 0x197   : > { %9782 = dma.hbm_to_vmem [thread:$0]  (!%p13472_p13), %s11264_s24, 16, %s806_s19, %s13473_s23  }
 0x198   : > { %s850_s11 = scalar_lea.vmem [#allocation14], %s9221_s10 }
 0x199   : > { %s859_s14 = sshll.u32 %s850_s11, 4  ;;  %s11295_s14 = int_to_ptr.vmem [resolvable:$true] %s859_s14 }
 0x19c   : > { %s11291_s4 = scalar_lea.hbm %s13474_s25, %s9393_s7  ;;  %s10468_s19 = scalar_lea.hbm %s13474_s25, 1024 }
 0x19d   : > { %s10463_s6 = scalar_lea.hbm %s11291_s4, 512  ;;  %p10469_p12 = scmp.lt.u32.totalorder %s11291_s4, %s13474_s25 }
 0x19e   : > { %p10464_p11 = scmp.ne.s32.totalorder %s11291_s4, %s10463_s6  ;;  %p10470_p1 = scmp.lt.u32.totalorder %s10468_s19, %s10463_s6 }
 0x19f   : > { %p10472_p9 = scmp.lt.u32.totalorder %s10463_s6, %s11291_s4 }
 0x1a0   : > { %p10466_p10 = pnand %p10464_p11, %p13471_p7  ;;  %p10471_p4 = por %p10470_p1, %p10469_p12 }
 0x1a2   : > { %p10467_p2 = pneg %p10466_p10  ;;  %p10473_p6 = por %p10472_p9, %p10471_p4 }
 0x1a4   : > { %p10474_p3 = pnand %p10473_p6, %p10467_p2 }
 0x1a6   : > { %10477 = shalt.err (!%p10474_p3)
}
 0x1a7   : > { %s10478_s10 = scalar_lea.vmem %s11295_s14, 512  ;;  %s10694_s23 = smov [#allocation14]  }
 0x1a8   : > { %p10479_p8 = scmp.ne.s32.totalorder %s11295_s14, %s10478_s10  ;;  %s10483_s7 = sshll.u32 %s10694_s23, 4  ;;  %s10484_s7 = int_to_ptr.vmem [resolvable:$false] %s10483_s7 }
 0x1a9   : > { %s10485_s0 = scalar_lea.vmem %s10484_s7, 1024  ;;  %p10486_p11 = scmp.lt.s32.totalorder %s11295_s14, %s10484_s7 }
 0x1aa   : > { %p10481_p0 = pnand %p10479_p8, %p13471_p7  ;;  %p10487_p10 = scmp.lt.s32.totalorder %s10485_s0, %s10478_s10 }
 0x1ac   : > { %p10482_p5 = pneg %p10481_p0  ;;  %p10488_p12 = por %p10487_p10, %p10486_p11 }
 0x1ae   : > { %p10489_p1 = pnand %p10488_p12, %p10482_p5 }
 0x1b0   : > { %10492 = shalt.err (!%p10489_p1)
}
 0x1b1   : > { %s10695_s3 = smov 64   ;;  %s10696_s11 = smov 4  }
 0x1b2   : > { %s13475_s6 = scalar_lea.sflag [#allocation13], %s10994_s2  ;;  %s13476_s19 = sld [smem:[#allocation69_spill]] }
 0x1b3   : > { %9788 = dma.hbm_to_vmem [thread:$0]  (!%p13472_p13), %s11291_s4, 512, %s11295_s14, %s13475_s6, %s10695_s3, %s10695_s3, %s10696_s11  }
 0x1b4   : > { %s891_s9 = scalar_lea.vmem [#allocation17], %s11000_s18 }
 0x1b5   : > { %s900_s10 = sshll.u32 %s891_s9, 4  ;;  %s901_s10 = int_to_ptr.vmem [resolvable:$true] %s900_s10 }
 0x1b8   : > { %s11324_s16 = scalar_lea.hbm %s13476_s19, %s11003_s30  ;;  %s10498_s4 = scalar_lea.hbm %s13476_s19, 32 }
 0x1b9   : > { %s10493_s23 = scalar_lea.hbm %s11324_s16, 16  ;;  %p10499_p6 = scmp.lt.u32.totalorder %s11324_s16, %s13476_s19 }
 0x1ba   : > { %p10494_p2 = scmp.ne.s32.totalorder %s11324_s16, %s10493_s23  ;;  %p10500_p3 = scmp.lt.u32.totalorder %s10498_s4, %s10493_s23 }
 0x1bb   : > { %p10502_p0 = scmp.lt.u32.totalorder %s10493_s23, %s11324_s16 }
 0x1bc   : > { %p10496_p4 = pnand %p10494_p2, %p13471_p7  ;;  %p10501_p8 = por %p10500_p3, %p10499_p6 }
 0x1be   : > { %p10497_p9 = pneg %p10496_p4  ;;  %p10503_p5 = por %p10502_p0, %p10501_p8 }
 0x1c0   : > { %p10504_p11 = pnand %p10503_p5, %p10497_p9 }
 0x1c2   : > { %10507 = shalt.err (!%p10504_p11)
}
 0x1c3   : > { %s10508_s11 = scalar_lea.vmem %s901_s10, 16  ;;  %s10697_s6 = smov [#allocation17]  }
 0x1c4   : > { %p10509_p10 = scmp.ne.s32.totalorder %s901_s10, %s10508_s11  ;;  %s10513_s1 = sshll.u32 %s10697_s6, 4  ;;  %s10514_s1 = int_to_ptr.vmem [resolvable:$false] %s10513_s1 }
 0x1c5   : > { %s10515_s24 = scalar_lea.vmem %s10514_s1, 32  ;;  %p10516_p2 = scmp.lt.s32.totalorder %s901_s10, %s10514_s1 }
 0x1c6   : > { %p10511_p12 = pnand %p10509_p10, %p13471_p7  ;;  %p10517_p4 = scmp.lt.s32.totalorder %s10515_s24, %s10508_s11 }
 0x1c8   : > { %p10512_p1 = pneg %p10511_p12  ;;  %p10518_p13 = por %p10517_p4, %p10516_p2 }
 0x1ca   : > { %p10519_p3 = pnand %p10518_p13, %p10512_p1 }
 0x1cc   : > { %10522 = shalt.err (!%p10519_p3)
}
 0x1cd   : > { %p13477_p6 = scmp.ne.s32.totalorder %s13455_s26, 0  ;;  %s13478_s9 = scalar_lea.sflag [#allocation16], %s10994_s2 }
 0x1ce   : > { %s10523_s23 = scalar_lea.hbm %s11093_s28, 1024  ;;  %s10528_s4 = scalar_lea.hbm %s13460_s12, 2048 }
 0x1cf   : > { %9794 = dma.hbm_to_vmem [thread:$0]  (!%p13477_p6), %s11324_s16, 16, %s901_s10, %s13478_s9  }
 0x1d0   : > { %p10524_p9 = scmp.ne.s32.totalorder %s11093_s28, %s10523_s23  ;;  %p10529_p13 = scmp.lt.u32.totalorder %s11093_s28, %s13460_s12 }
 0x1d1   : > { %p10530_p5 = scmp.lt.u32.totalorder %s10528_s4, %s10523_s23  ;;  %p10532_p10 = scmp.lt.u32.totalorder %s10523_s23, %s11093_s28 }
 0x1d2   : > { %p10526_p8 = pnand %p10524_p9, %p13471_p7 }
 0x1d3   : > { %p10531_p11 = por %p10530_p5, %p10529_p13 }
 0x1d4   : > { %p10527_p0 = pneg %p10526_p8 }
 0x1d5   : > { %p10533_p12 = por %p10532_p10, %p10531_p11 }
 0x1d7   : > { %p10534_p1 = pnand %p10533_p12, %p10527_p0 }
 0x1d9   : > { %10537 = shalt.err (!%p10534_p1)
}
 0x1da   : > { %s10538_s16 = scalar_lea.vmem %s11097_s8, 1024  ;;  %s10698_s10 = smov [#allocation20]  }
 0x1db   : > { %p10539_p2 = scmp.ne.s32.totalorder %s11097_s8, %s10538_s16  ;;  %s10543_s11 = sshll.u32 %s10698_s10, 4  ;;  %s10544_s11 = int_to_ptr.vmem [resolvable:$false] %s10543_s11 }
 0x1dc   : > { %s10545_s6 = scalar_lea.vmem %s10544_s11, 2048  ;;  %p10546_p9 = scmp.lt.s32.totalorder %s11097_s8, %s10544_s11 }
 0x1dd   : > { %p10541_p4 = pnand %p10539_p2, %p13471_p7  ;;  %p10547_p8 = scmp.lt.s32.totalorder %s10545_s6, %s10538_s16 }
 0x1df   : > { %p10542_p3 = pneg %p10541_p4  ;;  %p10548_p13 = por %p10547_p8, %p10546_p9 }
 0x1e1   : > { %p10549_p5 = pnand %p10548_p13, %p10542_p3 }
 0x1e3   : > { %10552 = shalt.err (!%p10549_p5)
}
 0x1e4   : > { %s13479_s1 = smov 8   ;;  %s13480_s24 = smov 128  }
 0x1e5   : > { %s13481_s9 = scalar_lea.sflag [#allocation19], %s10994_s2  ;;  %s11376_s0 = scalar_lea.hbm %s13358_s15, %s11003_s30 }
 0x1e6   : > { %9800 = dma.hbm_to_vmem [thread:$0]  (!%p13477_p6), %s11093_s28, 1024, %s11097_s8, %s13481_s9, %s13480_s24, %s13480_s24, %s13479_s1  }
 0x1e7   : > { %s985_s4 = scalar_lea.vmem [#allocation23], %s11000_s18  ;;  %s10553_s3 = scalar_lea.hbm %s11376_s0, 16 }
 0x1e8   : > { %s994_s14 = sshll.u32 %s985_s4, 4  ;;  %p10554_p0 = scmp.ne.s32.totalorder %s11376_s0, %s10553_s3  ;;  %s995_s14 = int_to_ptr.vmem [resolvable:$true] %s994_s14 }
 0x1e9   : > { %s10558_s28 = scalar_lea.hbm %s13358_s15, 32  ;;  %p10559_p12 = scmp.lt.u32.totalorder %s11376_s0, %s13358_s15 }
 0x1ea   : > { %p10556_p11 = pnand %p10554_p0, %p13471_p7  ;;  %p10560_p1 = scmp.lt.u32.totalorder %s10558_s28, %s10553_s3 }
 0x1eb   : > { %p10562_p4 = scmp.lt.u32.totalorder %s10553_s3, %s11376_s0 }
 0x1ec   : > { %p10557_p10 = pneg %p10556_p11  ;;  %p10561_p2 = por %p10560_p1, %p10559_p12 }
 0x1ee   : > { %p10563_p3 = por %p10562_p4, %p10561_p2 }
 0x1f0   : > { %p10564_p9 = pnand %p10563_p3, %p10557_p10 }
 0x1f2   : > { %10567 = shalt.err (!%p10564_p9)
}
 0x1f3   : > { %s10568_s18 = scalar_lea.vmem %s995_s14, 16  ;;  %s10699_s30 = smov [#allocation23]  }
 0x1f4   : > { %p10569_p8 = scmp.ne.s32.totalorder %s995_s14, %s10568_s18  ;;  %s10573_s6 = sshll.u32 %s10699_s30, 4  ;;  %s10574_s6 = int_to_ptr.vmem [resolvable:$false] %s10573_s6 }
 0x1f5   : > { %s10575_s1 = scalar_lea.vmem %s10574_s6, 32  ;;  %p10576_p0 = scmp.lt.s32.totalorder %s995_s14, %s10574_s6 }
 0x1f6   : > { %p10571_p13 = pnand %p10569_p8, %p13471_p7  ;;  %p10577_p11 = scmp.lt.s32.totalorder %s10575_s1, %s10568_s18 }
 0x1f8   : > { %p10572_p5 = pneg %p10571_p13  ;;  %p10578_p6 = por %p10577_p11, %p10576_p0 }
 0x1fa   : > { %p10579_p1 = pnand %p10578_p6, %p10572_p5 }
 0x1fc   : > { %10582 = shalt.err (!%p10579_p1)
}
 0x1fd   : > { %p13482_p12 = scmp.ne.s32.totalorder %s13455_s26, 0  ;;  %s13483_s24 = sld [smem:[#allocation55_spill]] }
 0x1ff   : > { %9806 = dma.hbm_to_vmem [thread:$0]  (!%p13482_p12), %s11376_s0, 16, %s995_s14, %s950_s21  }
 0x203   : > { %p13484_p10 = scmp.ne.s32.totalorder %s13483_s24, 0 }
 0x204   : > { %s13485_s27 = sld [smem:[#allocation54_spill]] (!%p13484_p10) }
 0x205   : > { %1003 = sbr.rel (%p13484_p10) target bundleno = 5029 (0x13a5), region = 112 }
 0x20a   : > { %p13486_p7 = scmp.eq.s32.totalorder (!%p13484_p10), %s13485_s27, 0 }
 0x20c   : > { %10622 = dma.done.wait (%p13486_p7), [#allocation8], 16   ;;  %p13487_p2 = pmov %p13486_p7 }
 0x20d   : > { %s13488_s9 = sld [smem:[#allocation52_spill]]  ;;  %s13489_s23 = sld [smem:[#allocation57_spill]] }
 0x20e   : > { %10624 = vsyncadd (%p13487_p2), [#allocation8], 4294967280  ;;  %s1009_s7 = sand.u32 1, %s13485_s27  }
 0x20f   : > { %s1010_s26 = scalar_lea.sflag [#allocation10], %s1009_s7 }
 0x213   : > { %s11406_s4 = sand.u32 1, %s13488_s9   ;;  %p13490_p6 = scmp.ne.s32.totalorder %s13489_s23, 0 }
 0x215   : > { %10626 = dma.done.wait (%p13490_p6), %s1010_s26, 32  }
 0x216   : > { %10628 = vsyncadd (%p13490_p6), %s1010_s26, 4294967264  ;;  %s9236_s21 = sshll.u32 %s11406_s4, 6  ;;  %s1026_s14 = scalar_lea.sflag [#allocation13], %s1009_s7 }
 0x217   : > { %s11415_s3 = scalar_lea.vmem [#allocation12], %s9236_s21 }
 0x218   : > { %10630 = dma.done.wait (%p13490_p6), %s1026_s14, 1536  }
 0x219   : > { %10632 = vsyncadd (%p13490_p6), %s1026_s14, 4294965760  ;;  %s9237_s16 = sshll.u32 %s11406_s4, 5  ;;  %s1044_s28 = scalar_lea.sflag [#allocation16], %s1009_s7 }
 0x21a   : > { %s11422_s10 = scalar_lea.vmem [#allocation14], %s9237_s16 }
 0x21b   : > { %10634 = dma.done.wait (%p13490_p6), %s1044_s28, 32  }
 0x21c   : > { %10636 = vsyncadd (%p13490_p6), %s1044_s28, 4294967264  ;;  %s1060_s18 = scalar_lea.sflag [#allocation19], %s1009_s7 }
 0x21d   : > { %10638 = dma.done.wait (%p13490_p6), %s1060_s18, 1040  }
 0x21e   : > { %10640 = vsyncadd (%p13490_p6), %s1060_s18, 4294966256  ;;  %s9239_s6 = sshll.u32 %s11406_s4, 1  ;;  %s11436_s1 = scalar_lea.vmem [#allocation20], %s9236_s21 }
 0x21f   : > { %s1077_s24 = scalar_lea.sflag [#allocation22], %s1009_s7  ;;  %s11438_s9 = scalar_lea.vmem [#allocation21], %s9239_s6 }
 0x220   : > { %10642 = dma.done.wait (%p13490_p6), %s1077_s24, 48  }
 0x221   : > { %10644 = vsyncadd (%p13490_p6), %s1077_s24, 4294967248  ;;  %p13491_p4 = pmov %p13487_p2 }
 0x222   : > { %p13492_p3 = pmov %p13487_p2 }
 0x223   : > { %10646 = dma.done.wait (%p13491_p4), [#allocation25], 32  }
 0x224   : > { %10648 = vsyncadd (%p13492_p3), [#allocation25], 4294967264  ;;  %p13493_p9 = pmov %p13487_p2 }
 0x225   : > { %p13494_p8 = pmov %p13487_p2 }
 0x226   : > { %10650 = dma.done.wait (%p13493_p9), [#allocation28], 256  }
 0x227   : > { %10652 = vsyncadd (%p13494_p8), [#allocation28], 4294967040  ;;  %p13495_p13 = pmov %p13487_p2 }
 0x228   : > { %p13496_p5 = pmov %p13487_p2 }
 0x229   : > { %10654 = dma.done.wait (%p13495_p13), [#allocation31], 80  }
 0x22a   : > { %10656 = vsyncadd (%p13496_p5), [#allocation31], 4294967216  ;;  %p1228_p0 = scmp.lt.s32.totalorder %s13485_s27, 1  ;;  %s13497_s28 = sld [smem:[#allocation66_spill]] }
 0x22b   : > { %s13498_s26 = sld [smem:[#allocation73_spill]]  ;;  %p13499_p11 = scmp.ne.s32.totalorder %s13485_s27, 0 }
 0x22c   : > { %s1229_s23 = scalar_select %p1228_p0, %s13485_s27, 1 }
 0x22d   : > { %1263 = sbr.rel (%p13499_p11) target bundleno = 1151 (0x47f), region = 184 }
 0x22e   : > { %s13522_s23 = smov (!%p1228_p0, %s1229_s23), 1 }
 0x22f   : > { %s9249_s7 = sshll.u32 %s13522_s23, 1  ;;  %s9396_s21 = sshll.u32 %s13522_s23, 7 }
 0x230   : > { %s11462_s18 = scalar_lea.vmem %s13497_s28, %s9249_s7 }
 0x231   : > { %s11467_s30 = scalar_lea.vmem %s13498_s26, %s9396_s21 }
 0x234   : > { %s1268_s11 = sld [smem:[#allocation0]]   ;;  %s10700_s8 = smov [#allocation3]  }
 0x235   : > { %s1276_s0 = sshll.u32 %s10700_s8, 4  ;;  %s10701_s2 = smov 1024   ;;  %s1277_s0 = int_to_ptr.vmem [resolvable:$true] %s1276_s0 }
 0x236   : > { %1280 = sst [smem:[#allocation34]] %s10701_s2  ;;  %s10702_s23 = smov 8  }
 0x237   : > { %1282 = sst [smem:[#allocation34 + $0x1]] %s10701_s2  ;;  %s10703_s14 = smov 64  }
 0x238   : > { %1284 = sst [smem:[#allocation34 + $0x2]] %s10702_s23  ;;  %s10704_s16 = smov 128  }
 0x239   : > { %1286 = sst [smem:[#allocation34 + $0x3]] %s10703_s14  ;;  %s10705_s26 = smov 2  }
 0x23a   : > { %s9256_s7 = sshll.u32 %s1268_s11, 26  ;;  %1288 = sst [smem:[#allocation34 + $0x4]] %s10704_s16 }
 0x23b   : > { %s9257_s28 = sadd.s32 134217728, %s9256_s7  ;;  %1290 = sst [smem:[#allocation34 + $0x5]] %s10705_s26 }
 0x23c   : > { %s10706_s21 = smov 512   ;;  %1294 = sst [smem:[#allocation34 + $0x7]] %s10703_s14 }
 0x23d   : > { %1292 = sst [smem:[#allocation34 + $0x6]] %s10706_s21  ;;  %s10707_s27 = smov 4  }
 0x23e   : > { %1296 = sst [smem:[#allocation34 + $0x8]] %s10707_s27  ;;  %s10708_s8 = smov [#allocation6]  }
 0x23f   : > { %s10709_s6 = smov [#allocation33]   ;;  %s13500_s2 = sld [smem:[#allocation78_spill]] }
 0x245   : > { %1298 = dma.general %s13500_s2, 4096, %s1277_s0, %s10708_s8, %s10709_s6, [#allocation34], %s9257_s28, 0  }
 0x246   : > { %s13501_s13 = sld [smem:[#allocation79_spill]]  ;;  %s13502_s7 = sld [smem:[#allocation60_spill]] }
 0x247   : > { %s13504_s5 = sld [smem:[#allocation59_spill]] }
 0x24c   : > { %v1317_v0 = vld [vmem:[%s13501_s13] sm:$0xf]  ;;  %v1319_v1 = vld [vmem:[%s13501_s13 + $0x10] sm:$0xf]  ;;  %v1321_v2 = vld [vmem:[%s13501_s13 + $0x4] sm:$0xf]  ;;  %s13503_s26 = smov %s13502_s7 }
 0x24d   : > { %1318 = vst [vmem:[#allocation4] sm:$0xf] %v1317_v0  ;;  %1320 = vst [vmem:[#allocation4 + $0x4] sm:$0xf] %v1319_v1  ;;  %v1323_v3 = vld [vmem:[%s13501_s13 + $0x14] sm:$0xf] }
 0x24e   : > { %1322 = vst [vmem:[#allocation4 + $0x8] sm:$0xf] %v1321_v2  ;;  %v1325_v4 = vld [vmem:[%s13501_s13 + $0x8] sm:$0xf]  ;;  %v1327_v5 = vld [vmem:[%s13501_s13 + $0x18] sm:$0xf] }
 0x24f   : > { %1324 = vst [vmem:[#allocation4 + $0xc] sm:$0xf] %v1323_v3  ;;  %1326 = vst [vmem:[#allocation4 + $0x10] sm:$0xf] %v1325_v4  ;;  %v1329_v6 = vld [vmem:[%s13501_s13 + $0xc] sm:$0xf] }
 0x250   : > { %1328 = vst [vmem:[#allocation4 + $0x14] sm:$0xf] %v1327_v5  ;;  %v1331_v7 = vld [vmem:[%s13501_s13 + $0x1c] sm:$0xff]   ;;  %v1335_v8 = vld [vmem:[%s13501_s13 + $0x30] sm:$0xf] }
 0x251   : > { %1330 = vst [vmem:[#allocation4 + $0x18] sm:$0xf] %v1329_v6  ;;  %1332 = vst [vmem:[#allocation4 + $0x1c] sm:$0xff] %v1331_v7   ;;  %v1337_v9 = vld [vmem:[%s13501_s13 + $0x24] sm:$0xf]  ;;  %v1347_v14 = vld [vmem:[%s13501_s13 + $0x3c] sm:$0xff]  }
 0x252   : > { %1336 = vst [vmem:[#allocation4 + $0x24] sm:$0xf] %v1335_v8  ;;  %v1339_v10 = vld [vmem:[%s13501_s13 + $0x34] sm:$0xf]  ;;  %v1341_v11 = vld [vmem:[%s13501_s13 + $0x28] sm:$0xf] }
 0x253   : > { %1338 = vst [vmem:[#allocation4 + $0x28] sm:$0xf] %v1337_v9  ;;  %1340 = vst [vmem:[#allocation4 + $0x2c] sm:$0xf] %v1339_v10  ;;  %v1343_v12 = vld [vmem:[%s13501_s13 + $0x38] sm:$0xf] }
 0x254   : > { %1342 = vst [vmem:[#allocation4 + $0x30] sm:$0xf] %v1341_v11  ;;  %v1345_v13 = vld [vmem:[%s13501_s13 + $0x2c] sm:$0xf]  ;;  %1344 = vst [vmem:[#allocation4 + $0x34] sm:$0xf] %v1343_v12 }
 0x255   : > { %1346 = vst [vmem:[#allocation4 + $0x38] sm:$0xf] %v1345_v13  ;;  %1348 = vst [vmem:[#allocation4 + $0x3c] sm:$0xff] %v1347_v14   ;;  %v1351_v15 = vld [vmem:[%s13501_s13 + $0x50] sm:$0xf]  ;;  %v1363_v21 = vld [vmem:[%s13501_s13 + $0x5c] sm:$0xff]  }
 0x256   : > { %v1353_v16 = vld [vmem:[%s13501_s13 + $0x44] sm:$0xf]  ;;  %v1355_v17 = vld [vmem:[%s13501_s13 + $0x54] sm:$0xf]  ;;  %1352 = vst [vmem:[#allocation4 + $0x44] sm:$0xf] %v1351_v15 }
 0x257   : > { %1354 = vst [vmem:[#allocation4 + $0x48] sm:$0xf] %v1353_v16  ;;  %1356 = vst [vmem:[#allocation4 + $0x4c] sm:$0xf] %v1355_v17  ;;  %v1357_v18 = vld [vmem:[%s13501_s13 + $0x48] sm:$0xf] }
 0x258   : > { %v1359_v19 = vld [vmem:[%s13501_s13 + $0x58] sm:$0xf]  ;;  %v1361_v20 = vld [vmem:[%s13501_s13 + $0x4c] sm:$0xf]  ;;  %1358 = vst [vmem:[#allocation4 + $0x50] sm:$0xf] %v1357_v18 }
 0x259   : > { %1360 = vst [vmem:[#allocation4 + $0x54] sm:$0xf] %v1359_v19  ;;  %1362 = vst [vmem:[#allocation4 + $0x58] sm:$0xf] %v1361_v20  ;;  %v1367_v22 = vld [vmem:[%s13501_s13 + $0x70] sm:$0xf] }
 0x25a   : > { %v1369_v23 = vld [vmem:[%s13501_s13 + $0x64] sm:$0xf]  ;;  %1364 = vst [vmem:[#allocation4 + $0x5c] sm:$0xff] %v1363_v21   ;;  %1368 = vst [vmem:[#allocation4 + $0x64] sm:$0xf] %v1367_v22  ;;  %v1379_v28 = vld [vmem:[%s13501_s13 + $0x7c] sm:$0xff]  }
 0x25b   : > { %1370 = vst [vmem:[#allocation4 + $0x68] sm:$0xf] %v1369_v23  ;;  %v1371_v24 = vld [vmem:[%s13501_s13 + $0x74] sm:$0xf]  ;;  %v1373_v25 = vld [vmem:[%s13501_s13 + $0x68] sm:$0xf] }
 0x25c   : > { %v1375_v26 = vld [vmem:[%s13501_s13 + $0x78] sm:$0xf]  ;;  %1372 = vst [vmem:[#allocation4 + $0x6c] sm:$0xf] %v1371_v24  ;;  %1374 = vst [vmem:[#allocation4 + $0x70] sm:$0xf] %v1373_v25 }
 0x25d   : > { %1376 = vst [vmem:[#allocation4 + $0x74] sm:$0xf] %v1375_v26  ;;  %v1377_v27 = vld [vmem:[%s13501_s13 + $0x6c] sm:$0xf]  ;;  %v1383_v29 = vld [vmem:[%s13501_s13 + $0x90] sm:$0xf] }
 0x25e   : > { %1378 = vst [vmem:[#allocation4 + $0x78] sm:$0xf] %v1377_v27  ;;  %1380 = vst [vmem:[#allocation4 + $0x7c] sm:$0xff] %v1379_v28   ;;  %v1385_v30 = vld [vmem:[%s13501_s13 + $0x84] sm:$0xf]  ;;  %v1395_v35 = vld [vmem:[%s13501_s13 + $0x9c] sm:$0xff]  }
 0x25f   : > { %1384 = vst [vmem:[#allocation4 + $0x84] sm:$0xf] %v1383_v29  ;;  %v1387_v31 = vld [vmem:[%s13501_s13 + $0x94] sm:$0xf]  ;;  %v1389_v32 = vld [vmem:[%s13501_s13 + $0x88] sm:$0xf] }
 0x260   : > { %1386 = vst [vmem:[#allocation4 + $0x88] sm:$0xf] %v1385_v30  ;;  %1388 = vst [vmem:[#allocation4 + $0x8c] sm:$0xf] %v1387_v31  ;;  %v1391_v33 = vld [vmem:[%s13501_s13 + $0x98] sm:$0xf] }
 0x261   : > { %1390 = vst [vmem:[#allocation4 + $0x90] sm:$0xf] %v1389_v32  ;;  %v1393_v34 = vld [vmem:[%s13501_s13 + $0x8c] sm:$0xf]  ;;  %1392 = vst [vmem:[#allocation4 + $0x94] sm:$0xf] %v1391_v33 }
 0x262   : > { %1394 = vst [vmem:[#allocation4 + $0x98] sm:$0xf] %v1393_v34  ;;  %1396 = vst [vmem:[#allocation4 + $0x9c] sm:$0xff] %v1395_v35   ;;  %v1399_v36 = vld [vmem:[%s13501_s13 + $0xb0] sm:$0xf]  ;;  %v1411_v42 = vld [vmem:[%s13501_s13 + $0xbc] sm:$0xff]  }
 0x263   : > { %v1401_v37 = vld [vmem:[%s13501_s13 + $0xa4] sm:$0xf]  ;;  %v1403_v38 = vld [vmem:[%s13501_s13 + $0xb4] sm:$0xf]  ;;  %1400 = vst [vmem:[#allocation4 + $0xa4] sm:$0xf] %v1399_v36 }
 0x264   : > { %1402 = vst [vmem:[#allocation4 + $0xa8] sm:$0xf] %v1401_v37  ;;  %1404 = vst [vmem:[#allocation4 + $0xac] sm:$0xf] %v1403_v38  ;;  %v1405_v39 = vld [vmem:[%s13501_s13 + $0xa8] sm:$0xf] }
 0x265   : > { %v1407_v40 = vld [vmem:[%s13501_s13 + $0xb8] sm:$0xf]  ;;  %v1409_v41 = vld [vmem:[%s13501_s13 + $0xac] sm:$0xf]  ;;  %1406 = vst [vmem:[#allocation4 + $0xb0] sm:$0xf] %v1405_v39 }
 0x266   : > { %1408 = vst [vmem:[#allocation4 + $0xb4] sm:$0xf] %v1407_v40  ;;  %1410 = vst [vmem:[#allocation4 + $0xb8] sm:$0xf] %v1409_v41  ;;  %v1415_v43 = vld [vmem:[%s13501_s13 + $0xd0] sm:$0xf] }
 0x267   : > { %v1417_v44 = vld [vmem:[%s13501_s13 + $0xc4] sm:$0xf]  ;;  %1412 = vst [vmem:[#allocation4 + $0xbc] sm:$0xff] %v1411_v42   ;;  %1416 = vst [vmem:[#allocation4 + $0xc4] sm:$0xf] %v1415_v43  ;;  %v1427_v49 = vld [vmem:[%s13501_s13 + $0xdc] sm:$0xff]  }
 0x268   : > { %1418 = vst [vmem:[#allocation4 + $0xc8] sm:$0xf] %v1417_v44  ;;  %v1419_v45 = vld [vmem:[%s13501_s13 + $0xd4] sm:$0xf]  ;;  %v1421_v46 = vld [vmem:[%s13501_s13 + $0xc8] sm:$0xf] }
 0x269   : > { %v1423_v47 = vld [vmem:[%s13501_s13 + $0xd8] sm:$0xf]  ;;  %1420 = vst [vmem:[#allocation4 + $0xcc] sm:$0xf] %v1419_v45  ;;  %1422 = vst [vmem:[#allocation4 + $0xd0] sm:$0xf] %v1421_v46 }
 0x26a   : > { %1424 = vst [vmem:[#allocation4 + $0xd4] sm:$0xf] %v1423_v47  ;;  %v1425_v48 = vld [vmem:[%s13501_s13 + $0xcc] sm:$0xf]  ;;  %v1431_v50 = vld [vmem:[%s13501_s13 + $0xf0] sm:$0xf] }
 0x26b   : > { %1426 = vst [vmem:[#allocation4 + $0xd8] sm:$0xf] %v1425_v48  ;;  %1428 = vst [vmem:[#allocation4 + $0xdc] sm:$0xff] %v1427_v49   ;;  %v1433_v51 = vld [vmem:[%s13501_s13 + $0xe4] sm:$0xf]  ;;  %v1443_v56 = vld [vmem:[%s13501_s13 + $0xfc] sm:$0xff]  }
 0x26c   : > { %1432 = vst [vmem:[#allocation4 + $0xe4] sm:$0xf] %v1431_v50  ;;  %v1435_v52 = vld [vmem:[%s13501_s13 + $0xf4] sm:$0xf]  ;;  %v1437_v53 = vld [vmem:[%s13501_s13 + $0xe8] sm:$0xf] }
 0x26d   : > { %1434 = vst [vmem:[#allocation4 + $0xe8] sm:$0xf] %v1433_v51  ;;  %1436 = vst [vmem:[#allocation4 + $0xec] sm:$0xf] %v1435_v52  ;;  %v1439_v54 = vld [vmem:[%s13501_s13 + $0xf8] sm:$0xf] }
 0x26e   : > { %1438 = vst [vmem:[#allocation4 + $0xf0] sm:$0xf] %v1437_v53  ;;  %v1441_v55 = vld [vmem:[%s13501_s13 + $0xec] sm:$0xf]  ;;  %1440 = vst [vmem:[#allocation4 + $0xf4] sm:$0xf] %v1439_v54 }
 0x26f   : > { %1442 = vst [vmem:[#allocation4 + $0xf8] sm:$0xf] %v1441_v55  ;;  %1444 = vst [vmem:[#allocation4 + $0xfc] sm:$0xff] %v1443_v56   ;;  %v1447_v57 = vld [vmem:[%s13501_s13 + $0x110] sm:$0xf]  ;;  %v1459_v63 = vld [vmem:[%s13501_s13 + $0x11c] sm:$0xff]  }
 0x270   : > { %v1449_v58 = vld [vmem:[%s13501_s13 + $0x104] sm:$0xf]  ;;  %v1451_v59 = vld [vmem:[%s13501_s13 + $0x114] sm:$0xf]  ;;  %1448 = vst [vmem:[#allocation4 + $0x104] sm:$0xf] %v1447_v57 }
 0x271   : > { %1450 = vst [vmem:[#allocation4 + $0x108] sm:$0xf] %v1449_v58  ;;  %1452 = vst [vmem:[#allocation4 + $0x10c] sm:$0xf] %v1451_v59  ;;  %v1453_v60 = vld [vmem:[%s13501_s13 + $0x108] sm:$0xf] }
 0x272   : > { %v1455_v61 = vld [vmem:[%s13501_s13 + $0x118] sm:$0xf]  ;;  %v1457_v62 = vld [vmem:[%s13501_s13 + $0x10c] sm:$0xf]  ;;  %1454 = vst [vmem:[#allocation4 + $0x110] sm:$0xf] %v1453_v60 }
 0x273   : > { %1456 = vst [vmem:[#allocation4 + $0x114] sm:$0xf] %v1455_v61  ;;  %1458 = vst [vmem:[#allocation4 + $0x118] sm:$0xf] %v1457_v62  ;;  %v1463_v0 = vld [vmem:[%s13501_s13 + $0x130] sm:$0xf] }
 0x274   : > { %v1465_v1 = vld [vmem:[%s13501_s13 + $0x124] sm:$0xf]  ;;  %1460 = vst [vmem:[#allocation4 + $0x11c] sm:$0xff] %v1459_v63   ;;  %1464 = vst [vmem:[#allocation4 + $0x124] sm:$0xf] %v1463_v0  ;;  %v1475_v6 = vld [vmem:[%s13501_s13 + $0x13c] sm:$0xff]  }
 0x275   : > { %1466 = vst [vmem:[#allocation4 + $0x128] sm:$0xf] %v1465_v1  ;;  %v1467_v2 = vld [vmem:[%s13501_s13 + $0x134] sm:$0xf]  ;;  %v1469_v3 = vld [vmem:[%s13501_s13 + $0x128] sm:$0xf] }
 0x276   : > { %v1471_v4 = vld [vmem:[%s13501_s13 + $0x138] sm:$0xf]  ;;  %1468 = vst [vmem:[#allocation4 + $0x12c] sm:$0xf] %v1467_v2  ;;  %1470 = vst [vmem:[#allocation4 + $0x130] sm:$0xf] %v1469_v3 }
 0x277   : > { %1472 = vst [vmem:[#allocation4 + $0x134] sm:$0xf] %v1471_v4  ;;  %v1473_v5 = vld [vmem:[%s13501_s13 + $0x12c] sm:$0xf]  ;;  %v1479_v7 = vld [vmem:[%s13501_s13 + $0x150] sm:$0xf] }
 0x278   : > { %1474 = vst [vmem:[#allocation4 + $0x138] sm:$0xf] %v1473_v5  ;;  %1476 = vst [vmem:[#allocation4 + $0x13c] sm:$0xff] %v1475_v6   ;;  %v1481_v8 = vld [vmem:[%s13501_s13 + $0x144] sm:$0xf]  ;;  %v1491_v13 = vld [vmem:[%s13501_s13 + $0x15c] sm:$0xff]  }
 0x279   : > { %1480 = vst [vmem:[#allocation4 + $0x144] sm:$0xf] %v1479_v7  ;;  %v1483_v9 = vld [vmem:[%s13501_s13 + $0x154] sm:$0xf]  ;;  %v1485_v10 = vld [vmem:[%s13501_s13 + $0x148] sm:$0xf] }
 0x27a   : > { %1482 = vst [vmem:[#allocation4 + $0x148] sm:$0xf] %v1481_v8  ;;  %1484 = vst [vmem:[#allocation4 + $0x14c] sm:$0xf] %v1483_v9  ;;  %v1487_v11 = vld [vmem:[%s13501_s13 + $0x158] sm:$0xf] }
 0x27b   : > { %1486 = vst [vmem:[#allocation4 + $0x150] sm:$0xf] %v1485_v10  ;;  %v1489_v12 = vld [vmem:[%s13501_s13 + $0x14c] sm:$0xf]  ;;  %1488 = vst [vmem:[#allocation4 + $0x154] sm:$0xf] %v1487_v11 }
 0x27c   : > { %1490 = vst [vmem:[#allocation4 + $0x158] sm:$0xf] %v1489_v12  ;;  %1492 = vst [vmem:[#allocation4 + $0x15c] sm:$0xff] %v1491_v13   ;;  %v1495_v14 = vld [vmem:[%s13501_s13 + $0x170] sm:$0xf]  ;;  %v1507_v20 = vld [vmem:[%s13501_s13 + $0x17c] sm:$0xff]  }
 0x27d   : > { %v1497_v15 = vld [vmem:[%s13501_s13 + $0x164] sm:$0xf]  ;;  %v1499_v16 = vld [vmem:[%s13501_s13 + $0x174] sm:$0xf]  ;;  %1496 = vst [vmem:[#allocation4 + $0x164] sm:$0xf] %v1495_v14 }
 0x27e   : > { %1498 = vst [vmem:[#allocation4 + $0x168] sm:$0xf] %v1497_v15  ;;  %1500 = vst [vmem:[#allocation4 + $0x16c] sm:$0xf] %v1499_v16  ;;  %v1501_v17 = vld [vmem:[%s13501_s13 + $0x168] sm:$0xf] }
 0x27f   : > { %v1503_v18 = vld [vmem:[%s13501_s13 + $0x178] sm:$0xf]  ;;  %v1505_v19 = vld [vmem:[%s13501_s13 + $0x16c] sm:$0xf]  ;;  %1502 = vst [vmem:[#allocation4 + $0x170] sm:$0xf] %v1501_v17 }
 0x280   : > { %1504 = vst [vmem:[#allocation4 + $0x174] sm:$0xf] %v1503_v18  ;;  %1506 = vst [vmem:[#allocation4 + $0x178] sm:$0xf] %v1505_v19  ;;  %v1511_v21 = vld [vmem:[%s13501_s13 + $0x190] sm:$0xf] }
 0x281   : > { %v1513_v22 = vld [vmem:[%s13501_s13 + $0x184] sm:$0xf]  ;;  %1508 = vst [vmem:[#allocation4 + $0x17c] sm:$0xff] %v1507_v20   ;;  %1512 = vst [vmem:[#allocation4 + $0x184] sm:$0xf] %v1511_v21  ;;  %v1523_v27 = vld [vmem:[%s13501_s13 + $0x19c] sm:$0xff]  }
 0x282   : > { %1514 = vst [vmem:[#allocation4 + $0x188] sm:$0xf] %v1513_v22  ;;  %v1515_v23 = vld [vmem:[%s13501_s13 + $0x194] sm:$0xf]  ;;  %v1517_v24 = vld [vmem:[%s13501_s13 + $0x188] sm:$0xf] }
 0x283   : > { %v1519_v25 = vld [vmem:[%s13501_s13 + $0x198] sm:$0xf]  ;;  %1516 = vst [vmem:[#allocation4 + $0x18c] sm:$0xf] %v1515_v23  ;;  %1518 = vst [vmem:[#allocation4 + $0x190] sm:$0xf] %v1517_v24 }
 0x284   : > { %1520 = vst [vmem:[#allocation4 + $0x194] sm:$0xf] %v1519_v25  ;;  %v1521_v26 = vld [vmem:[%s13501_s13 + $0x18c] sm:$0xf]  ;;  %v1527_v28 = vld [vmem:[%s13501_s13 + $0x1b0] sm:$0xf] }
 0x285   : > { %1522 = vst [vmem:[#allocation4 + $0x198] sm:$0xf] %v1521_v26  ;;  %1524 = vst [vmem:[#allocation4 + $0x19c] sm:$0xff] %v1523_v27   ;;  %v1529_v29 = vld [vmem:[%s13501_s13 + $0x1a4] sm:$0xf]  ;;  %v1539_v34 = vld [vmem:[%s13501_s13 + $0x1bc] sm:$0xff]  }
 0x286   : > { %1528 = vst [vmem:[#allocation4 + $0x1a4] sm:$0xf] %v1527_v28  ;;  %v1531_v30 = vld [vmem:[%s13501_s13 + $0x1b4] sm:$0xf]  ;;  %v1533_v31 = vld [vmem:[%s13501_s13 + $0x1a8] sm:$0xf] }
 0x287   : > { %1530 = vst [vmem:[#allocation4 + $0x1a8] sm:$0xf] %v1529_v29  ;;  %1532 = vst [vmem:[#allocation4 + $0x1ac] sm:$0xf] %v1531_v30  ;;  %v1535_v32 = vld [vmem:[%s13501_s13 + $0x1b8] sm:$0xf] }
 0x288   : > { %1534 = vst [vmem:[#allocation4 + $0x1b0] sm:$0xf] %v1533_v31  ;;  %v1537_v33 = vld [vmem:[%s13501_s13 + $0x1ac] sm:$0xf]  ;;  %1536 = vst [vmem:[#allocation4 + $0x1b4] sm:$0xf] %v1535_v32 }
 0x289   : > { %1538 = vst [vmem:[#allocation4 + $0x1b8] sm:$0xf] %v1537_v33  ;;  %1540 = vst [vmem:[#allocation4 + $0x1bc] sm:$0xff] %v1539_v34   ;;  %v1543_v35 = vld [vmem:[%s13501_s13 + $0x1d0] sm:$0xf]  ;;  %v1555_v41 = vld [vmem:[%s13501_s13 + $0x1dc] sm:$0xff]  }
 0x28a   : > { %v1545_v36 = vld [vmem:[%s13501_s13 + $0x1c4] sm:$0xf]  ;;  %v1547_v37 = vld [vmem:[%s13501_s13 + $0x1d4] sm:$0xf]  ;;  %1544 = vst [vmem:[#allocation4 + $0x1c4] sm:$0xf] %v1543_v35 }
 0x28b   : > { %1546 = vst [vmem:[#allocation4 + $0x1c8] sm:$0xf] %v1545_v36  ;;  %1548 = vst [vmem:[#allocation4 + $0x1cc] sm:$0xf] %v1547_v37  ;;  %v1549_v38 = vld [vmem:[%s13501_s13 + $0x1c8] sm:$0xf] }
 0x28c   : > { %v1551_v39 = vld [vmem:[%s13501_s13 + $0x1d8] sm:$0xf]  ;;  %v1553_v40 = vld [vmem:[%s13501_s13 + $0x1cc] sm:$0xf]  ;;  %1550 = vst [vmem:[#allocation4 + $0x1d0] sm:$0xf] %v1549_v38 }
 0x28d   : > { %1552 = vst [vmem:[#allocation4 + $0x1d4] sm:$0xf] %v1551_v39  ;;  %1554 = vst [vmem:[#allocation4 + $0x1d8] sm:$0xf] %v1553_v40  ;;  %v1559_v42 = vld [vmem:[%s13501_s13 + $0x1f0] sm:$0xf] }
 0x28e   : > { %v1561_v43 = vld [vmem:[%s13501_s13 + $0x1e4] sm:$0xf]  ;;  %1556 = vst [vmem:[#allocation4 + $0x1dc] sm:$0xff] %v1555_v41   ;;  %1560 = vst [vmem:[#allocation4 + $0x1e4] sm:$0xf] %v1559_v42  ;;  %v1571_v48 = vld [vmem:[%s13501_s13 + $0x1fc] sm:$0xff]  }
 0x28f   : > { %1562 = vst [vmem:[#allocation4 + $0x1e8] sm:$0xf] %v1561_v43  ;;  %v1563_v44 = vld [vmem:[%s13501_s13 + $0x1f4] sm:$0xf]  ;;  %v1565_v45 = vld [vmem:[%s13501_s13 + $0x1e8] sm:$0xf] }
 0x290   : > { %v1567_v46 = vld [vmem:[%s13501_s13 + $0x1f8] sm:$0xf]  ;;  %1564 = vst [vmem:[#allocation4 + $0x1ec] sm:$0xf] %v1563_v44  ;;  %1566 = vst [vmem:[#allocation4 + $0x1f0] sm:$0xf] %v1565_v45 }
 0x291   : > { %1568 = vst [vmem:[#allocation4 + $0x1f4] sm:$0xf] %v1567_v46  ;;  %v1569_v47 = vld [vmem:[%s13501_s13 + $0x1ec] sm:$0xf]  ;;  %v1575_v49 = vld [vmem:[%s13501_s13 + $0x210] sm:$0xf] }
 0x292   : > { %1570 = vst [vmem:[#allocation4 + $0x1f8] sm:$0xf] %v1569_v47  ;;  %1572 = vst [vmem:[#allocation4 + $0x1fc] sm:$0xff] %v1571_v48   ;;  %v1577_v50 = vld [vmem:[%s13501_s13 + $0x204] sm:$0xf]  ;;  %v1587_v55 = vld [vmem:[%s13501_s13 + $0x21c] sm:$0xff]  }
 0x293   : > { %1576 = vst [vmem:[#allocation4 + $0x204] sm:$0xf] %v1575_v49  ;;  %v1579_v51 = vld [vmem:[%s13501_s13 + $0x214] sm:$0xf]  ;;  %v1581_v52 = vld [vmem:[%s13501_s13 + $0x208] sm:$0xf] }
 0x294   : > { %1578 = vst [vmem:[#allocation4 + $0x208] sm:$0xf] %v1577_v50  ;;  %1580 = vst [vmem:[#allocation4 + $0x20c] sm:$0xf] %v1579_v51  ;;  %v1583_v53 = vld [vmem:[%s13501_s13 + $0x218] sm:$0xf] }
 0x295   : > { %1582 = vst [vmem:[#allocation4 + $0x210] sm:$0xf] %v1581_v52  ;;  %v1585_v54 = vld [vmem:[%s13501_s13 + $0x20c] sm:$0xf]  ;;  %1584 = vst [vmem:[#allocation4 + $0x214] sm:$0xf] %v1583_v53 }
 0x296   : > { %1586 = vst [vmem:[#allocation4 + $0x218] sm:$0xf] %v1585_v54  ;;  %1588 = vst [vmem:[#allocation4 + $0x21c] sm:$0xff] %v1587_v55   ;;  %v1591_v56 = vld [vmem:[%s13501_s13 + $0x230] sm:$0xf]  ;;  %v1603_v62 = vld [vmem:[%s13501_s13 + $0x23c] sm:$0xff]  }
 0x297   : > { %v1593_v57 = vld [vmem:[%s13501_s13 + $0x224] sm:$0xf]  ;;  %v1595_v58 = vld [vmem:[%s13501_s13 + $0x234] sm:$0xf]  ;;  %1592 = vst [vmem:[#allocation4 + $0x224] sm:$0xf] %v1591_v56 }
 0x298   : > { %1594 = vst [vmem:[#allocation4 + $0x228] sm:$0xf] %v1593_v57  ;;  %1596 = vst [vmem:[#allocation4 + $0x22c] sm:$0xf] %v1595_v58  ;;  %v1597_v59 = vld [vmem:[%s13501_s13 + $0x228] sm:$0xf] }
 0x299   : > { %v1599_v60 = vld [vmem:[%s13501_s13 + $0x238] sm:$0xf]  ;;  %v1601_v61 = vld [vmem:[%s13501_s13 + $0x22c] sm:$0xf]  ;;  %1598 = vst [vmem:[#allocation4 + $0x230] sm:$0xf] %v1597_v59 }
 0x29a   : > { %1600 = vst [vmem:[#allocation4 + $0x234] sm:$0xf] %v1599_v60  ;;  %1602 = vst [vmem:[#allocation4 + $0x238] sm:$0xf] %v1601_v61  ;;  %v1607_v63 = vld [vmem:[%s13501_s13 + $0x250] sm:$0xf] }
 0x29b   : > { %v1609_v0 = vld [vmem:[%s13501_s13 + $0x244] sm:$0xf]  ;;  %1604 = vst [vmem:[#allocation4 + $0x23c] sm:$0xff] %v1603_v62   ;;  %1608 = vst [vmem:[#allocation4 + $0x244] sm:$0xf] %v1607_v63  ;;  %v1619_v5 = vld [vmem:[%s13501_s13 + $0x25c] sm:$0xff]  }
 0x29c   : > { %1610 = vst [vmem:[#allocation4 + $0x248] sm:$0xf] %v1609_v0  ;;  %v1611_v1 = vld [vmem:[%s13501_s13 + $0x254] sm:$0xf]  ;;  %v1613_v2 = vld [vmem:[%s13501_s13 + $0x248] sm:$0xf] }
 0x29d   : > { %v1615_v3 = vld [vmem:[%s13501_s13 + $0x258] sm:$0xf]  ;;  %1612 = vst [vmem:[#allocation4 + $0x24c] sm:$0xf] %v1611_v1  ;;  %1614 = vst [vmem:[#allocation4 + $0x250] sm:$0xf] %v1613_v2 }
 0x29e   : > { %1616 = vst [vmem:[#allocation4 + $0x254] sm:$0xf] %v1615_v3  ;;  %v1617_v4 = vld [vmem:[%s13501_s13 + $0x24c] sm:$0xf]  ;;  %v1623_v6 = vld [vmem:[%s13501_s13 + $0x270] sm:$0xf] }
 0x29f   : > { %1618 = vst [vmem:[#allocation4 + $0x258] sm:$0xf] %v1617_v4  ;;  %1620 = vst [vmem:[#allocation4 + $0x25c] sm:$0xff] %v1619_v5   ;;  %v1625_v7 = vld [vmem:[%s13501_s13 + $0x264] sm:$0xf]  ;;  %v1635_v12 = vld [vmem:[%s13501_s13 + $0x27c] sm:$0xff]  }
 0x2a0   : > { %1624 = vst [vmem:[#allocation4 + $0x264] sm:$0xf] %v1623_v6  ;;  %v1627_v8 = vld [vmem:[%s13501_s13 + $0x274] sm:$0xf]  ;;  %v1629_v9 = vld [vmem:[%s13501_s13 + $0x268] sm:$0xf] }
 0x2a1   : > { %1626 = vst [vmem:[#allocation4 + $0x268] sm:$0xf] %v1625_v7  ;;  %1628 = vst [vmem:[#allocation4 + $0x26c] sm:$0xf] %v1627_v8  ;;  %v1631_v10 = vld [vmem:[%s13501_s13 + $0x278] sm:$0xf] }
 0x2a2   : > { %1630 = vst [vmem:[#allocation4 + $0x270] sm:$0xf] %v1629_v9  ;;  %v1633_v11 = vld [vmem:[%s13501_s13 + $0x26c] sm:$0xf]  ;;  %1632 = vst [vmem:[#allocation4 + $0x274] sm:$0xf] %v1631_v10 }
 0x2a3   : > { %1634 = vst [vmem:[#allocation4 + $0x278] sm:$0xf] %v1633_v11  ;;  %1636 = vst [vmem:[#allocation4 + $0x27c] sm:$0xff] %v1635_v12   ;;  %v1639_v13 = vld [vmem:[%s13501_s13 + $0x290] sm:$0xf]  ;;  %v1651_v19 = vld [vmem:[%s13501_s13 + $0x29c] sm:$0xff]  }
 0x2a4   : > { %v1641_v14 = vld [vmem:[%s13501_s13 + $0x284] sm:$0xf]  ;;  %v1643_v15 = vld [vmem:[%s13501_s13 + $0x294] sm:$0xf]  ;;  %1640 = vst [vmem:[#allocation4 + $0x284] sm:$0xf] %v1639_v13 }
 0x2a5   : > { %1642 = vst [vmem:[#allocation4 + $0x288] sm:$0xf] %v1641_v14  ;;  %1644 = vst [vmem:[#allocation4 + $0x28c] sm:$0xf] %v1643_v15  ;;  %v1645_v16 = vld [vmem:[%s13501_s13 + $0x288] sm:$0xf] }
 0x2a6   : > { %v1647_v17 = vld [vmem:[%s13501_s13 + $0x298] sm:$0xf]  ;;  %v1649_v18 = vld [vmem:[%s13501_s13 + $0x28c] sm:$0xf]  ;;  %1646 = vst [vmem:[#allocation4 + $0x290] sm:$0xf] %v1645_v16 }
 0x2a7   : > { %1648 = vst [vmem:[#allocation4 + $0x294] sm:$0xf] %v1647_v17  ;;  %1650 = vst [vmem:[#allocation4 + $0x298] sm:$0xf] %v1649_v18  ;;  %v1655_v20 = vld [vmem:[%s13501_s13 + $0x2b0] sm:$0xf] }
 0x2a8   : > { %v1657_v21 = vld [vmem:[%s13501_s13 + $0x2a4] sm:$0xf]  ;;  %1652 = vst [vmem:[#allocation4 + $0x29c] sm:$0xff] %v1651_v19   ;;  %1656 = vst [vmem:[#allocation4 + $0x2a4] sm:$0xf] %v1655_v20  ;;  %v1667_v26 = vld [vmem:[%s13501_s13 + $0x2bc] sm:$0xff]  }
 0x2a9   : > { %1658 = vst [vmem:[#allocation4 + $0x2a8] sm:$0xf] %v1657_v21  ;;  %v1659_v22 = vld [vmem:[%s13501_s13 + $0x2b4] sm:$0xf]  ;;  %v1661_v23 = vld [vmem:[%s13501_s13 + $0x2a8] sm:$0xf] }
 0x2aa   : > { %v1663_v24 = vld [vmem:[%s13501_s13 + $0x2b8] sm:$0xf]  ;;  %1660 = vst [vmem:[#allocation4 + $0x2ac] sm:$0xf] %v1659_v22  ;;  %1662 = vst [vmem:[#allocation4 + $0x2b0] sm:$0xf] %v1661_v23 }
 0x2ab   : > { %1664 = vst [vmem:[#allocation4 + $0x2b4] sm:$0xf] %v1663_v24  ;;  %v1665_v25 = vld [vmem:[%s13501_s13 + $0x2ac] sm:$0xf]  ;;  %v1671_v27 = vld [vmem:[%s13501_s13 + $0x2d0] sm:$0xf] }
 0x2ac   : > { %1666 = vst [vmem:[#allocation4 + $0x2b8] sm:$0xf] %v1665_v25  ;;  %1668 = vst [vmem:[#allocation4 + $0x2bc] sm:$0xff] %v1667_v26   ;;  %v1673_v28 = vld [vmem:[%s13501_s13 + $0x2c4] sm:$0xf]  ;;  %v1683_v33 = vld [vmem:[%s13501_s13 + $0x2dc] sm:$0xff]  }
 0x2ad   : > { %1672 = vst [vmem:[#allocation4 + $0x2c4] sm:$0xf] %v1671_v27  ;;  %v1675_v29 = vld [vmem:[%s13501_s13 + $0x2d4] sm:$0xf]  ;;  %v1677_v30 = vld [vmem:[%s13501_s13 + $0x2c8] sm:$0xf] }
 0x2ae   : > { %1674 = vst [vmem:[#allocation4 + $0x2c8] sm:$0xf] %v1673_v28  ;;  %1676 = vst [vmem:[#allocation4 + $0x2cc] sm:$0xf] %v1675_v29  ;;  %v1679_v31 = vld [vmem:[%s13501_s13 + $0x2d8] sm:$0xf] }
 0x2af   : > { %1678 = vst [vmem:[#allocation4 + $0x2d0] sm:$0xf] %v1677_v30  ;;  %v1681_v32 = vld [vmem:[%s13501_s13 + $0x2cc] sm:$0xf]  ;;  %1680 = vst [vmem:[#allocation4 + $0x2d4] sm:$0xf] %v1679_v31 }
 0x2b0   : > { %1682 = vst [vmem:[#allocation4 + $0x2d8] sm:$0xf] %v1681_v32  ;;  %1684 = vst [vmem:[#allocation4 + $0x2dc] sm:$0xff] %v1683_v33   ;;  %v1687_v34 = vld [vmem:[%s13501_s13 + $0x2f0] sm:$0xf]  ;;  %v1699_v40 = vld [vmem:[%s13501_s13 + $0x2fc] sm:$0xff]  }
 0x2b1   : > { %v1689_v35 = vld [vmem:[%s13501_s13 + $0x2e4] sm:$0xf]  ;;  %v1691_v36 = vld [vmem:[%s13501_s13 + $0x2f4] sm:$0xf]  ;;  %1688 = vst [vmem:[#allocation4 + $0x2e4] sm:$0xf] %v1687_v34 }
 0x2b2   : > { %1690 = vst [vmem:[#allocation4 + $0x2e8] sm:$0xf] %v1689_v35  ;;  %1692 = vst [vmem:[#allocation4 + $0x2ec] sm:$0xf] %v1691_v36  ;;  %v1693_v37 = vld [vmem:[%s13501_s13 + $0x2e8] sm:$0xf] }
 0x2b3   : > { %v1695_v38 = vld [vmem:[%s13501_s13 + $0x2f8] sm:$0xf]  ;;  %v1697_v39 = vld [vmem:[%s13501_s13 + $0x2ec] sm:$0xf]  ;;  %1694 = vst [vmem:[#allocation4 + $0x2f0] sm:$0xf] %v1693_v37 }
 0x2b4   : > { %1696 = vst [vmem:[#allocation4 + $0x2f4] sm:$0xf] %v1695_v38  ;;  %1698 = vst [vmem:[#allocation4 + $0x2f8] sm:$0xf] %v1697_v39  ;;  %v1703_v41 = vld [vmem:[%s13501_s13 + $0x310] sm:$0xf] }
 0x2b5   : > { %v1705_v42 = vld [vmem:[%s13501_s13 + $0x304] sm:$0xf]  ;;  %1700 = vst [vmem:[#allocation4 + $0x2fc] sm:$0xff] %v1699_v40   ;;  %1704 = vst [vmem:[#allocation4 + $0x304] sm:$0xf] %v1703_v41  ;;  %v1715_v47 = vld [vmem:[%s13501_s13 + $0x31c] sm:$0xff]  }
 0x2b6   : > { %1706 = vst [vmem:[#allocation4 + $0x308] sm:$0xf] %v1705_v42  ;;  %v1707_v43 = vld [vmem:[%s13501_s13 + $0x314] sm:$0xf]  ;;  %v1709_v44 = vld [vmem:[%s13501_s13 + $0x308] sm:$0xf] }
 0x2b7   : > { %v1711_v45 = vld [vmem:[%s13501_s13 + $0x318] sm:$0xf]  ;;  %1708 = vst [vmem:[#allocation4 + $0x30c] sm:$0xf] %v1707_v43  ;;  %1710 = vst [vmem:[#allocation4 + $0x310] sm:$0xf] %v1709_v44 }
 0x2b8   : > { %1712 = vst [vmem:[#allocation4 + $0x314] sm:$0xf] %v1711_v45  ;;  %v1713_v46 = vld [vmem:[%s13501_s13 + $0x30c] sm:$0xf]  ;;  %v1719_v48 = vld [vmem:[%s13501_s13 + $0x330] sm:$0xf] }
 0x2b9   : > { %1714 = vst [vmem:[#allocation4 + $0x318] sm:$0xf] %v1713_v46  ;;  %1716 = vst [vmem:[#allocation4 + $0x31c] sm:$0xff] %v1715_v47   ;;  %v1721_v49 = vld [vmem:[%s13501_s13 + $0x324] sm:$0xf]  ;;  %v1731_v54 = vld [vmem:[%s13501_s13 + $0x33c] sm:$0xff]  }
 0x2ba   : > { %1720 = vst [vmem:[#allocation4 + $0x324] sm:$0xf] %v1719_v48  ;;  %v1723_v50 = vld [vmem:[%s13501_s13 + $0x334] sm:$0xf]  ;;  %v1725_v51 = vld [vmem:[%s13501_s13 + $0x328] sm:$0xf] }
 0x2bb   : > { %1722 = vst [vmem:[#allocation4 + $0x328] sm:$0xf] %v1721_v49  ;;  %1724 = vst [vmem:[#allocation4 + $0x32c] sm:$0xf] %v1723_v50  ;;  %v1727_v52 = vld [vmem:[%s13501_s13 + $0x338] sm:$0xf] }
 0x2bc   : > { %1726 = vst [vmem:[#allocation4 + $0x330] sm:$0xf] %v1725_v51  ;;  %v1729_v53 = vld [vmem:[%s13501_s13 + $0x32c] sm:$0xf]  ;;  %1728 = vst [vmem:[#allocation4 + $0x334] sm:$0xf] %v1727_v52 }
 0x2bd   : > { %1730 = vst [vmem:[#allocation4 + $0x338] sm:$0xf] %v1729_v53  ;;  %1732 = vst [vmem:[#allocation4 + $0x33c] sm:$0xff] %v1731_v54   ;;  %v1735_v55 = vld [vmem:[%s13501_s13 + $0x350] sm:$0xf]  ;;  %v1747_v61 = vld [vmem:[%s13501_s13 + $0x35c] sm:$0xff]  }
 0x2be   : > { %v1737_v56 = vld [vmem:[%s13501_s13 + $0x344] sm:$0xf]  ;;  %v1739_v57 = vld [vmem:[%s13501_s13 + $0x354] sm:$0xf]  ;;  %1736 = vst [vmem:[#allocation4 + $0x344] sm:$0xf] %v1735_v55 }
 0x2bf   : > { %1738 = vst [vmem:[#allocation4 + $0x348] sm:$0xf] %v1737_v56  ;;  %1740 = vst [vmem:[#allocation4 + $0x34c] sm:$0xf] %v1739_v57  ;;  %v1741_v58 = vld [vmem:[%s13501_s13 + $0x348] sm:$0xf] }
 0x2c0   : > { %v1743_v59 = vld [vmem:[%s13501_s13 + $0x358] sm:$0xf]  ;;  %v1745_v60 = vld [vmem:[%s13501_s13 + $0x34c] sm:$0xf]  ;;  %1742 = vst [vmem:[#allocation4 + $0x350] sm:$0xf] %v1741_v58 }
 0x2c1   : > { %1744 = vst [vmem:[#allocation4 + $0x354] sm:$0xf] %v1743_v59  ;;  %1746 = vst [vmem:[#allocation4 + $0x358] sm:$0xf] %v1745_v60  ;;  %v1751_v62 = vld [vmem:[%s13501_s13 + $0x370] sm:$0xf] }
 0x2c2   : > { %v1753_v63 = vld [vmem:[%s13501_s13 + $0x364] sm:$0xf]  ;;  %1748 = vst [vmem:[#allocation4 + $0x35c] sm:$0xff] %v1747_v61   ;;  %1752 = vst [vmem:[#allocation4 + $0x364] sm:$0xf] %v1751_v62  ;;  %v1763_v4 = vld [vmem:[%s13501_s13 + $0x37c] sm:$0xff]  }
 0x2c3   : > { %1754 = vst [vmem:[#allocation4 + $0x368] sm:$0xf] %v1753_v63  ;;  %v1755_v0 = vld [vmem:[%s13501_s13 + $0x374] sm:$0xf]  ;;  %v1757_v1 = vld [vmem:[%s13501_s13 + $0x368] sm:$0xf] }
 0x2c4   : > { %v1759_v2 = vld [vmem:[%s13501_s13 + $0x378] sm:$0xf]  ;;  %1756 = vst [vmem:[#allocation4 + $0x36c] sm:$0xf] %v1755_v0  ;;  %1758 = vst [vmem:[#allocation4 + $0x370] sm:$0xf] %v1757_v1 }
 0x2c5   : > { %1760 = vst [vmem:[#allocation4 + $0x374] sm:$0xf] %v1759_v2  ;;  %v1761_v3 = vld [vmem:[%s13501_s13 + $0x36c] sm:$0xf]  ;;  %v1767_v5 = vld [vmem:[%s13501_s13 + $0x390] sm:$0xf] }
 0x2c6   : > { %1762 = vst [vmem:[#allocation4 + $0x378] sm:$0xf] %v1761_v3  ;;  %1764 = vst [vmem:[#allocation4 + $0x37c] sm:$0xff] %v1763_v4   ;;  %v1769_v6 = vld [vmem:[%s13501_s13 + $0x384] sm:$0xf]  ;;  %v1779_v11 = vld [vmem:[%s13501_s13 + $0x39c] sm:$0xff]  }
 0x2c7   : > { %1768 = vst [vmem:[#allocation4 + $0x384] sm:$0xf] %v1767_v5  ;;  %v1771_v7 = vld [vmem:[%s13501_s13 + $0x394] sm:$0xf]  ;;  %v1773_v8 = vld [vmem:[%s13501_s13 + $0x388] sm:$0xf] }
 0x2c8   : > { %1770 = vst [vmem:[#allocation4 + $0x388] sm:$0xf] %v1769_v6  ;;  %1772 = vst [vmem:[#allocation4 + $0x38c] sm:$0xf] %v1771_v7  ;;  %v1775_v9 = vld [vmem:[%s13501_s13 + $0x398] sm:$0xf] }
 0x2c9   : > { %1774 = vst [vmem:[#allocation4 + $0x390] sm:$0xf] %v1773_v8  ;;  %v1777_v10 = vld [vmem:[%s13501_s13 + $0x38c] sm:$0xf]  ;;  %1776 = vst [vmem:[#allocation4 + $0x394] sm:$0xf] %v1775_v9 }
 0x2ca   : > { %1778 = vst [vmem:[#allocation4 + $0x398] sm:$0xf] %v1777_v10  ;;  %1780 = vst [vmem:[#allocation4 + $0x39c] sm:$0xff] %v1779_v11   ;;  %v1783_v12 = vld [vmem:[%s13501_s13 + $0x3b0] sm:$0xf]  ;;  %v1795_v18 = vld [vmem:[%s13501_s13 + $0x3bc] sm:$0xff]  }
 0x2cb   : > { %v1785_v13 = vld [vmem:[%s13501_s13 + $0x3a4] sm:$0xf]  ;;  %v1787_v14 = vld [vmem:[%s13501_s13 + $0x3b4] sm:$0xf]  ;;  %1784 = vst [vmem:[#allocation4 + $0x3a4] sm:$0xf] %v1783_v12 }
 0x2cc   : > { %1786 = vst [vmem:[#allocation4 + $0x3a8] sm:$0xf] %v1785_v13  ;;  %1788 = vst [vmem:[#allocation4 + $0x3ac] sm:$0xf] %v1787_v14  ;;  %v1789_v15 = vld [vmem:[%s13501_s13 + $0x3a8] sm:$0xf] }
 0x2cd   : > { %v1791_v16 = vld [vmem:[%s13501_s13 + $0x3b8] sm:$0xf]  ;;  %v1793_v17 = vld [vmem:[%s13501_s13 + $0x3ac] sm:$0xf]  ;;  %1790 = vst [vmem:[#allocation4 + $0x3b0] sm:$0xf] %v1789_v15 }
 0x2ce   : > { %1792 = vst [vmem:[#allocation4 + $0x3b4] sm:$0xf] %v1791_v16  ;;  %1794 = vst [vmem:[#allocation4 + $0x3b8] sm:$0xf] %v1793_v17  ;;  %v1799_v19 = vld [vmem:[%s13501_s13 + $0x3d0] sm:$0xf] }
 0x2cf   : > { %v1801_v20 = vld [vmem:[%s13501_s13 + $0x3c4] sm:$0xf]  ;;  %1796 = vst [vmem:[#allocation4 + $0x3bc] sm:$0xff] %v1795_v18   ;;  %1800 = vst [vmem:[#allocation4 + $0x3c4] sm:$0xf] %v1799_v19  ;;  %v1811_v25 = vld [vmem:[%s13501_s13 + $0x3dc] sm:$0xff]  }
 0x2d0   : > { %1802 = vst [vmem:[#allocation4 + $0x3c8] sm:$0xf] %v1801_v20  ;;  %v1803_v21 = vld [vmem:[%s13501_s13 + $0x3d4] sm:$0xf]  ;;  %v1805_v22 = vld [vmem:[%s13501_s13 + $0x3c8] sm:$0xf] }
 0x2d1   : > { %v1807_v23 = vld [vmem:[%s13501_s13 + $0x3d8] sm:$0xf]  ;;  %1804 = vst [vmem:[#allocation4 + $0x3cc] sm:$0xf] %v1803_v21  ;;  %1806 = vst [vmem:[#allocation4 + $0x3d0] sm:$0xf] %v1805_v22 }
 0x2d2   : > { %1808 = vst [vmem:[#allocation4 + $0x3d4] sm:$0xf] %v1807_v23  ;;  %v1809_v24 = vld [vmem:[%s13501_s13 + $0x3cc] sm:$0xf]  ;;  %v1815_v26 = vld [vmem:[%s13501_s13 + $0x3f0] sm:$0xf] }
 0x2d3   : > { %1810 = vst [vmem:[#allocation4 + $0x3d8] sm:$0xf] %v1809_v24  ;;  %1812 = vst [vmem:[#allocation4 + $0x3dc] sm:$0xff] %v1811_v25   ;;  %v1817_v27 = vld [vmem:[%s13501_s13 + $0x3e4] sm:$0xf]  ;;  %v1827_v32 = vld [vmem:[%s13501_s13 + $0x3fc] sm:$0xff]  }
 0x2d4   : > { %1816 = vst [vmem:[#allocation4 + $0x3e4] sm:$0xf] %v1815_v26  ;;  %v1819_v28 = vld [vmem:[%s13501_s13 + $0x3f4] sm:$0xf]  ;;  %v1821_v29 = vld [vmem:[%s13501_s13 + $0x3e8] sm:$0xf] }
 0x2d5   : > { %1818 = vst [vmem:[#allocation4 + $0x3e8] sm:$0xf] %v1817_v27  ;;  %1820 = vst [vmem:[#allocation4 + $0x3ec] sm:$0xf] %v1819_v28  ;;  %v1823_v30 = vld [vmem:[%s13501_s13 + $0x3f8] sm:$0xf] }
 0x2d6   : > { %1822 = vst [vmem:[#allocation4 + $0x3f0] sm:$0xf] %v1821_v29  ;;  %v1825_v31 = vld [vmem:[%s13501_s13 + $0x3ec] sm:$0xf]  ;;  %1824 = vst [vmem:[#allocation4 + $0x3f4] sm:$0xf] %v1823_v30 }
 0x2d7   : > { %1826 = vst [vmem:[#allocation4 + $0x3f8] sm:$0xf] %v1825_v31  ;;  %1828 = vst [vmem:[#allocation4 + $0x3fc] sm:$0xff] %v1827_v32   ;;  %v1831_v33 = vld [vmem:[%s13501_s13 + $0x410] sm:$0xf]  ;;  %v1843_v39 = vld [vmem:[%s13501_s13 + $0x41c] sm:$0xff]  }
 0x2d8   : > { %v1833_v34 = vld [vmem:[%s13501_s13 + $0x404] sm:$0xf]  ;;  %v1835_v35 = vld [vmem:[%s13501_s13 + $0x414] sm:$0xf]  ;;  %1832 = vst [vmem:[#allocation4 + $0x404] sm:$0xf] %v1831_v33 }
 0x2d9   : > { %1834 = vst [vmem:[#allocation4 + $0x408] sm:$0xf] %v1833_v34  ;;  %1836 = vst [vmem:[#allocation4 + $0x40c] sm:$0xf] %v1835_v35  ;;  %v1837_v36 = vld [vmem:[%s13501_s13 + $0x408] sm:$0xf] }
 0x2da   : > { %v1839_v37 = vld [vmem:[%s13501_s13 + $0x418] sm:$0xf]  ;;  %v1841_v38 = vld [vmem:[%s13501_s13 + $0x40c] sm:$0xf]  ;;  %1838 = vst [vmem:[#allocation4 + $0x410] sm:$0xf] %v1837_v36 }
 0x2db   : > { %1840 = vst [vmem:[#allocation4 + $0x414] sm:$0xf] %v1839_v37  ;;  %1842 = vst [vmem:[#allocation4 + $0x418] sm:$0xf] %v1841_v38  ;;  %v1847_v40 = vld [vmem:[%s13501_s13 + $0x430] sm:$0xf] }
 0x2dc   : > { %v1849_v41 = vld [vmem:[%s13501_s13 + $0x424] sm:$0xf]  ;;  %1844 = vst [vmem:[#allocation4 + $0x41c] sm:$0xff] %v1843_v39   ;;  %1848 = vst [vmem:[#allocation4 + $0x424] sm:$0xf] %v1847_v40  ;;  %v1859_v46 = vld [vmem:[%s13501_s13 + $0x43c] sm:$0xff]  }
 0x2dd   : > { %1850 = vst [vmem:[#allocation4 + $0x428] sm:$0xf] %v1849_v41  ;;  %v1851_v42 = vld [vmem:[%s13501_s13 + $0x434] sm:$0xf]  ;;  %v1853_v43 = vld [vmem:[%s13501_s13 + $0x428] sm:$0xf] }
 0x2de   : > { %v1855_v44 = vld [vmem:[%s13501_s13 + $0x438] sm:$0xf]  ;;  %1852 = vst [vmem:[#allocation4 + $0x42c] sm:$0xf] %v1851_v42  ;;  %1854 = vst [vmem:[#allocation4 + $0x430] sm:$0xf] %v1853_v43 }
 0x2df   : > { %1856 = vst [vmem:[#allocation4 + $0x434] sm:$0xf] %v1855_v44  ;;  %v1857_v45 = vld [vmem:[%s13501_s13 + $0x42c] sm:$0xf]  ;;  %v1863_v47 = vld [vmem:[%s13501_s13 + $0x450] sm:$0xf] }
 0x2e0   : > { %1858 = vst [vmem:[#allocation4 + $0x438] sm:$0xf] %v1857_v45  ;;  %1860 = vst [vmem:[#allocation4 + $0x43c] sm:$0xff] %v1859_v46   ;;  %v1865_v48 = vld [vmem:[%s13501_s13 + $0x444] sm:$0xf]  ;;  %v1875_v53 = vld [vmem:[%s13501_s13 + $0x45c] sm:$0xff]  }
 0x2e1   : > { %1864 = vst [vmem:[#allocation4 + $0x444] sm:$0xf] %v1863_v47  ;;  %v1867_v49 = vld [vmem:[%s13501_s13 + $0x454] sm:$0xf]  ;;  %v1869_v50 = vld [vmem:[%s13501_s13 + $0x448] sm:$0xf] }
 0x2e2   : > { %1866 = vst [vmem:[#allocation4 + $0x448] sm:$0xf] %v1865_v48  ;;  %1868 = vst [vmem:[#allocation4 + $0x44c] sm:$0xf] %v1867_v49  ;;  %v1871_v51 = vld [vmem:[%s13501_s13 + $0x458] sm:$0xf] }
 0x2e3   : > { %1870 = vst [vmem:[#allocation4 + $0x450] sm:$0xf] %v1869_v50  ;;  %v1873_v52 = vld [vmem:[%s13501_s13 + $0x44c] sm:$0xf]  ;;  %1872 = vst [vmem:[#allocation4 + $0x454] sm:$0xf] %v1871_v51 }
 0x2e4   : > { %1874 = vst [vmem:[#allocation4 + $0x458] sm:$0xf] %v1873_v52  ;;  %1876 = vst [vmem:[#allocation4 + $0x45c] sm:$0xff] %v1875_v53   ;;  %v1879_v54 = vld [vmem:[%s13501_s13 + $0x470] sm:$0xf]  ;;  %v1891_v60 = vld [vmem:[%s13501_s13 + $0x47c] sm:$0xff]  }
 0x2e5   : > { %v1881_v55 = vld [vmem:[%s13501_s13 + $0x464] sm:$0xf]  ;;  %v1883_v56 = vld [vmem:[%s13501_s13 + $0x474] sm:$0xf]  ;;  %1880 = vst [vmem:[#allocation4 + $0x464] sm:$0xf] %v1879_v54 }
 0x2e6   : > { %1882 = vst [vmem:[#allocation4 + $0x468] sm:$0xf] %v1881_v55  ;;  %1884 = vst [vmem:[#allocation4 + $0x46c] sm:$0xf] %v1883_v56  ;;  %v1885_v57 = vld [vmem:[%s13501_s13 + $0x468] sm:$0xf] }
 0x2e7   : > { %v1887_v58 = vld [vmem:[%s13501_s13 + $0x478] sm:$0xf]  ;;  %v1889_v59 = vld [vmem:[%s13501_s13 + $0x46c] sm:$0xf]  ;;  %1886 = vst [vmem:[#allocation4 + $0x470] sm:$0xf] %v1885_v57 }
 0x2e8   : > { %1888 = vst [vmem:[#allocation4 + $0x474] sm:$0xf] %v1887_v58  ;;  %1890 = vst [vmem:[#allocation4 + $0x478] sm:$0xf] %v1889_v59  ;;  %v1895_v61 = vld [vmem:[%s13501_s13 + $0x490] sm:$0xf] }
 0x2e9   : > { %v1897_v62 = vld [vmem:[%s13501_s13 + $0x484] sm:$0xf]  ;;  %1892 = vst [vmem:[#allocation4 + $0x47c] sm:$0xff] %v1891_v60   ;;  %1896 = vst [vmem:[#allocation4 + $0x484] sm:$0xf] %v1895_v61  ;;  %v1907_v3 = vld [vmem:[%s13501_s13 + $0x49c] sm:$0xff]  }
 0x2ea   : > { %1898 = vst [vmem:[#allocation4 + $0x488] sm:$0xf] %v1897_v62  ;;  %v1899_v63 = vld [vmem:[%s13501_s13 + $0x494] sm:$0xf]  ;;  %v1901_v0 = vld [vmem:[%s13501_s13 + $0x488] sm:$0xf] }
 0x2eb   : > { %v1903_v1 = vld [vmem:[%s13501_s13 + $0x498] sm:$0xf]  ;;  %1900 = vst [vmem:[#allocation4 + $0x48c] sm:$0xf] %v1899_v63  ;;  %1902 = vst [vmem:[#allocation4 + $0x490] sm:$0xf] %v1901_v0 }
 0x2ec   : > { %1904 = vst [vmem:[#allocation4 + $0x494] sm:$0xf] %v1903_v1  ;;  %v1905_v2 = vld [vmem:[%s13501_s13 + $0x48c] sm:$0xf]  ;;  %v1911_v4 = vld [vmem:[%s13501_s13 + $0x4b0] sm:$0xf] }
 0x2ed   : > { %1906 = vst [vmem:[#allocation4 + $0x498] sm:$0xf] %v1905_v2  ;;  %1908 = vst [vmem:[#allocation4 + $0x49c] sm:$0xff] %v1907_v3   ;;  %v1913_v5 = vld [vmem:[%s13501_s13 + $0x4a4] sm:$0xf]  ;;  %v1923_v10 = vld [vmem:[%s13501_s13 + $0x4bc] sm:$0xff]  }
 0x2ee   : > { %1912 = vst [vmem:[#allocation4 + $0x4a4] sm:$0xf] %v1911_v4  ;;  %v1915_v6 = vld [vmem:[%s13501_s13 + $0x4b4] sm:$0xf]  ;;  %v1917_v7 = vld [vmem:[%s13501_s13 + $0x4a8] sm:$0xf] }
 0x2ef   : > { %1914 = vst [vmem:[#allocation4 + $0x4a8] sm:$0xf] %v1913_v5  ;;  %1916 = vst [vmem:[#allocation4 + $0x4ac] sm:$0xf] %v1915_v6  ;;  %v1919_v8 = vld [vmem:[%s13501_s13 + $0x4b8] sm:$0xf] }
 0x2f0   : > { %1918 = vst [vmem:[#allocation4 + $0x4b0] sm:$0xf] %v1917_v7  ;;  %v1921_v9 = vld [vmem:[%s13501_s13 + $0x4ac] sm:$0xf]  ;;  %1920 = vst [vmem:[#allocation4 + $0x4b4] sm:$0xf] %v1919_v8 }
 0x2f1   : > { %1922 = vst [vmem:[#allocation4 + $0x4b8] sm:$0xf] %v1921_v9  ;;  %1924 = vst [vmem:[#allocation4 + $0x4bc] sm:$0xff] %v1923_v10   ;;  %v1927_v11 = vld [vmem:[%s13501_s13 + $0x4d0] sm:$0xf]  ;;  %v1939_v17 = vld [vmem:[%s13501_s13 + $0x4dc] sm:$0xff]  }
 0x2f2   : > { %v1929_v12 = vld [vmem:[%s13501_s13 + $0x4c4] sm:$0xf]  ;;  %v1931_v13 = vld [vmem:[%s13501_s13 + $0x4d4] sm:$0xf]  ;;  %1928 = vst [vmem:[#allocation4 + $0x4c4] sm:$0xf] %v1927_v11 }
 0x2f3   : > { %1930 = vst [vmem:[#allocation4 + $0x4c8] sm:$0xf] %v1929_v12  ;;  %1932 = vst [vmem:[#allocation4 + $0x4cc] sm:$0xf] %v1931_v13  ;;  %v1933_v14 = vld [vmem:[%s13501_s13 + $0x4c8] sm:$0xf] }
 0x2f4   : > { %v1935_v15 = vld [vmem:[%s13501_s13 + $0x4d8] sm:$0xf]  ;;  %v1937_v16 = vld [vmem:[%s13501_s13 + $0x4cc] sm:$0xf]  ;;  %1934 = vst [vmem:[#allocation4 + $0x4d0] sm:$0xf] %v1933_v14 }
 0x2f5   : > { %1936 = vst [vmem:[#allocation4 + $0x4d4] sm:$0xf] %v1935_v15  ;;  %1938 = vst [vmem:[#allocation4 + $0x4d8] sm:$0xf] %v1937_v16  ;;  %v1943_v18 = vld [vmem:[%s13501_s13 + $0x4f0] sm:$0xf] }
 0x2f6   : > { %v1945_v19 = vld [vmem:[%s13501_s13 + $0x4e4] sm:$0xf]  ;;  %1940 = vst [vmem:[#allocation4 + $0x4dc] sm:$0xff] %v1939_v17   ;;  %1944 = vst [vmem:[#allocation4 + $0x4e4] sm:$0xf] %v1943_v18  ;;  %v1955_v24 = vld [vmem:[%s13501_s13 + $0x4fc] sm:$0xff]  }
 0x2f7   : > { %1946 = vst [vmem:[#allocation4 + $0x4e8] sm:$0xf] %v1945_v19  ;;  %v1947_v20 = vld [vmem:[%s13501_s13 + $0x4f4] sm:$0xf]  ;;  %v1949_v21 = vld [vmem:[%s13501_s13 + $0x4e8] sm:$0xf] }
 0x2f8   : > { %v1951_v22 = vld [vmem:[%s13501_s13 + $0x4f8] sm:$0xf]  ;;  %1948 = vst [vmem:[#allocation4 + $0x4ec] sm:$0xf] %v1947_v20  ;;  %1950 = vst [vmem:[#allocation4 + $0x4f0] sm:$0xf] %v1949_v21 }
 0x2f9   : > { %1952 = vst [vmem:[#allocation4 + $0x4f4] sm:$0xf] %v1951_v22  ;;  %v1953_v23 = vld [vmem:[%s13501_s13 + $0x4ec] sm:$0xf]  ;;  %v1959_v25 = vld [vmem:[%s13501_s13 + $0x510] sm:$0xf] }
 0x2fa   : > { %1954 = vst [vmem:[#allocation4 + $0x4f8] sm:$0xf] %v1953_v23  ;;  %1956 = vst [vmem:[#allocation4 + $0x4fc] sm:$0xff] %v1955_v24   ;;  %v1961_v26 = vld [vmem:[%s13501_s13 + $0x504] sm:$0xf]  ;;  %v1971_v31 = vld [vmem:[%s13501_s13 + $0x51c] sm:$0xff]  }
 0x2fb   : > { %1960 = vst [vmem:[#allocation4 + $0x504] sm:$0xf] %v1959_v25  ;;  %v1963_v27 = vld [vmem:[%s13501_s13 + $0x514] sm:$0xf]  ;;  %v1965_v28 = vld [vmem:[%s13501_s13 + $0x508] sm:$0xf] }
 0x2fc   : > { %1962 = vst [vmem:[#allocation4 + $0x508] sm:$0xf] %v1961_v26  ;;  %1964 = vst [vmem:[#allocation4 + $0x50c] sm:$0xf] %v1963_v27  ;;  %v1967_v29 = vld [vmem:[%s13501_s13 + $0x518] sm:$0xf] }
 0x2fd   : > { %1966 = vst [vmem:[#allocation4 + $0x510] sm:$0xf] %v1965_v28  ;;  %v1969_v30 = vld [vmem:[%s13501_s13 + $0x50c] sm:$0xf]  ;;  %1968 = vst [vmem:[#allocation4 + $0x514] sm:$0xf] %v1967_v29 }
 0x2fe   : > { %1970 = vst [vmem:[#allocation4 + $0x518] sm:$0xf] %v1969_v30  ;;  %1972 = vst [vmem:[#allocation4 + $0x51c] sm:$0xff] %v1971_v31   ;;  %v1975_v32 = vld [vmem:[%s13501_s13 + $0x530] sm:$0xf]  ;;  %v1987_v38 = vld [vmem:[%s13501_s13 + $0x53c] sm:$0xff]  }
 0x2ff   : > { %v1977_v33 = vld [vmem:[%s13501_s13 + $0x524] sm:$0xf]  ;;  %v1979_v34 = vld [vmem:[%s13501_s13 + $0x534] sm:$0xf]  ;;  %1976 = vst [vmem:[#allocation4 + $0x524] sm:$0xf] %v1975_v32 }
 0x300   : > { %1978 = vst [vmem:[#allocation4 + $0x528] sm:$0xf] %v1977_v33  ;;  %1980 = vst [vmem:[#allocation4 + $0x52c] sm:$0xf] %v1979_v34  ;;  %v1981_v35 = vld [vmem:[%s13501_s13 + $0x528] sm:$0xf] }
 0x301   : > { %v1983_v36 = vld [vmem:[%s13501_s13 + $0x538] sm:$0xf]  ;;  %v1985_v37 = vld [vmem:[%s13501_s13 + $0x52c] sm:$0xf]  ;;  %1982 = vst [vmem:[#allocation4 + $0x530] sm:$0xf] %v1981_v35 }
 0x302   : > { %1984 = vst [vmem:[#allocation4 + $0x534] sm:$0xf] %v1983_v36  ;;  %1986 = vst [vmem:[#allocation4 + $0x538] sm:$0xf] %v1985_v37  ;;  %v1991_v39 = vld [vmem:[%s13501_s13 + $0x550] sm:$0xf] }
 0x303   : > { %v1993_v40 = vld [vmem:[%s13501_s13 + $0x544] sm:$0xf]  ;;  %1988 = vst [vmem:[#allocation4 + $0x53c] sm:$0xff] %v1987_v38   ;;  %1992 = vst [vmem:[#allocation4 + $0x544] sm:$0xf] %v1991_v39  ;;  %v2003_v45 = vld [vmem:[%s13501_s13 + $0x55c] sm:$0xff]  }
 0x304   : > { %1994 = vst [vmem:[#allocation4 + $0x548] sm:$0xf] %v1993_v40  ;;  %v1995_v41 = vld [vmem:[%s13501_s13 + $0x554] sm:$0xf]  ;;  %v1997_v42 = vld [vmem:[%s13501_s13 + $0x548] sm:$0xf] }
 0x305   : > { %v1999_v43 = vld [vmem:[%s13501_s13 + $0x558] sm:$0xf]  ;;  %1996 = vst [vmem:[#allocation4 + $0x54c] sm:$0xf] %v1995_v41  ;;  %1998 = vst [vmem:[#allocation4 + $0x550] sm:$0xf] %v1997_v42 }
 0x306   : > { %2000 = vst [vmem:[#allocation4 + $0x554] sm:$0xf] %v1999_v43  ;;  %v2001_v44 = vld [vmem:[%s13501_s13 + $0x54c] sm:$0xf]  ;;  %v2007_v46 = vld [vmem:[%s13501_s13 + $0x570] sm:$0xf] }
 0x307   : > { %2002 = vst [vmem:[#allocation4 + $0x558] sm:$0xf] %v2001_v44  ;;  %2004 = vst [vmem:[#allocation4 + $0x55c] sm:$0xff] %v2003_v45   ;;  %v2009_v47 = vld [vmem:[%s13501_s13 + $0x564] sm:$0xf]  ;;  %v2019_v52 = vld [vmem:[%s13501_s13 + $0x57c] sm:$0xff]  }
 0x308   : > { %2008 = vst [vmem:[#allocation4 + $0x564] sm:$0xf] %v2007_v46  ;;  %v2011_v48 = vld [vmem:[%s13501_s13 + $0x574] sm:$0xf]  ;;  %v2013_v49 = vld [vmem:[%s13501_s13 + $0x568] sm:$0xf] }
 0x309   : > { %2010 = vst [vmem:[#allocation4 + $0x568] sm:$0xf] %v2009_v47  ;;  %2012 = vst [vmem:[#allocation4 + $0x56c] sm:$0xf] %v2011_v48  ;;  %v2015_v50 = vld [vmem:[%s13501_s13 + $0x578] sm:$0xf] }
 0x30a   : > { %2014 = vst [vmem:[#allocation4 + $0x570] sm:$0xf] %v2013_v49  ;;  %v2017_v51 = vld [vmem:[%s13501_s13 + $0x56c] sm:$0xf]  ;;  %2016 = vst [vmem:[#allocation4 + $0x574] sm:$0xf] %v2015_v50 }
 0x30b   : > { %2018 = vst [vmem:[#allocation4 + $0x578] sm:$0xf] %v2017_v51  ;;  %2020 = vst [vmem:[#allocation4 + $0x57c] sm:$0xff] %v2019_v52   ;;  %v2023_v53 = vld [vmem:[%s13501_s13 + $0x590] sm:$0xf]  ;;  %v2035_v59 = vld [vmem:[%s13501_s13 + $0x59c] sm:$0xff]  }
 0x30c   : > { %v2025_v54 = vld [vmem:[%s13501_s13 + $0x584] sm:$0xf]  ;;  %v2027_v55 = vld [vmem:[%s13501_s13 + $0x594] sm:$0xf]  ;;  %2024 = vst [vmem:[#allocation4 + $0x584] sm:$0xf] %v2023_v53 }
 0x30d   : > { %2026 = vst [vmem:[#allocation4 + $0x588] sm:$0xf] %v2025_v54  ;;  %2028 = vst [vmem:[#allocation4 + $0x58c] sm:$0xf] %v2027_v55  ;;  %v2029_v56 = vld [vmem:[%s13501_s13 + $0x588] sm:$0xf] }
 0x30e   : > { %v2031_v57 = vld [vmem:[%s13501_s13 + $0x598] sm:$0xf]  ;;  %v2033_v58 = vld [vmem:[%s13501_s13 + $0x58c] sm:$0xf]  ;;  %2030 = vst [vmem:[#allocation4 + $0x590] sm:$0xf] %v2029_v56 }
 0x30f   : > { %2032 = vst [vmem:[#allocation4 + $0x594] sm:$0xf] %v2031_v57  ;;  %2034 = vst [vmem:[#allocation4 + $0x598] sm:$0xf] %v2033_v58  ;;  %v2039_v60 = vld [vmem:[%s13501_s13 + $0x5b0] sm:$0xf] }
 0x310   : > { %v2041_v61 = vld [vmem:[%s13501_s13 + $0x5a4] sm:$0xf]  ;;  %2036 = vst [vmem:[#allocation4 + $0x59c] sm:$0xff] %v2035_v59   ;;  %2040 = vst [vmem:[#allocation4 + $0x5a4] sm:$0xf] %v2039_v60  ;;  %v2051_v2 = vld [vmem:[%s13501_s13 + $0x5bc] sm:$0xff]  }
 0x311   : > { %2042 = vst [vmem:[#allocation4 + $0x5a8] sm:$0xf] %v2041_v61  ;;  %v2043_v62 = vld [vmem:[%s13501_s13 + $0x5b4] sm:$0xf]  ;;  %v2045_v63 = vld [vmem:[%s13501_s13 + $0x5a8] sm:$0xf] }
 0x312   : > { %v2047_v0 = vld [vmem:[%s13501_s13 + $0x5b8] sm:$0xf]  ;;  %2044 = vst [vmem:[#allocation4 + $0x5ac] sm:$0xf] %v2043_v62  ;;  %2046 = vst [vmem:[#allocation4 + $0x5b0] sm:$0xf] %v2045_v63 }
 0x313   : > { %2048 = vst [vmem:[#allocation4 + $0x5b4] sm:$0xf] %v2047_v0  ;;  %v2049_v1 = vld [vmem:[%s13501_s13 + $0x5ac] sm:$0xf]  ;;  %v2055_v3 = vld [vmem:[%s13501_s13 + $0x5d0] sm:$0xf] }
 0x314   : > { %2050 = vst [vmem:[#allocation4 + $0x5b8] sm:$0xf] %v2049_v1  ;;  %2052 = vst [vmem:[#allocation4 + $0x5bc] sm:$0xff] %v2051_v2   ;;  %v2057_v4 = vld [vmem:[%s13501_s13 + $0x5c4] sm:$0xf]  ;;  %v2067_v9 = vld [vmem:[%s13501_s13 + $0x5dc] sm:$0xff]  }
 0x315   : > { %2056 = vst [vmem:[#allocation4 + $0x5c4] sm:$0xf] %v2055_v3  ;;  %v2059_v5 = vld [vmem:[%s13501_s13 + $0x5d4] sm:$0xf]  ;;  %v2061_v6 = vld [vmem:[%s13501_s13 + $0x5c8] sm:$0xf] }
 0x316   : > { %2058 = vst [vmem:[#allocation4 + $0x5c8] sm:$0xf] %v2057_v4  ;;  %2060 = vst [vmem:[#allocation4 + $0x5cc] sm:$0xf] %v2059_v5  ;;  %v2063_v7 = vld [vmem:[%s13501_s13 + $0x5d8] sm:$0xf] }
 0x317   : > { %2062 = vst [vmem:[#allocation4 + $0x5d0] sm:$0xf] %v2061_v6  ;;  %v2065_v8 = vld [vmem:[%s13501_s13 + $0x5cc] sm:$0xf]  ;;  %2064 = vst [vmem:[#allocation4 + $0x5d4] sm:$0xf] %v2063_v7 }
 0x318   : > { %2066 = vst [vmem:[#allocation4 + $0x5d8] sm:$0xf] %v2065_v8  ;;  %2068 = vst [vmem:[#allocation4 + $0x5dc] sm:$0xff] %v2067_v9   ;;  %v2071_v10 = vld [vmem:[%s13501_s13 + $0x5f0] sm:$0xf]  ;;  %v2083_v16 = vld [vmem:[%s13501_s13 + $0x5fc] sm:$0xff]  }
 0x319   : > { %v2073_v11 = vld [vmem:[%s13501_s13 + $0x5e4] sm:$0xf]  ;;  %v2075_v12 = vld [vmem:[%s13501_s13 + $0x5f4] sm:$0xf]  ;;  %2072 = vst [vmem:[#allocation4 + $0x5e4] sm:$0xf] %v2071_v10 }
 0x31a   : > { %2074 = vst [vmem:[#allocation4 + $0x5e8] sm:$0xf] %v2073_v11  ;;  %2076 = vst [vmem:[#allocation4 + $0x5ec] sm:$0xf] %v2075_v12  ;;  %v2077_v13 = vld [vmem:[%s13501_s13 + $0x5e8] sm:$0xf] }
 0x31b   : > { %v2079_v14 = vld [vmem:[%s13501_s13 + $0x5f8] sm:$0xf]  ;;  %v2081_v15 = vld [vmem:[%s13501_s13 + $0x5ec] sm:$0xf]  ;;  %2078 = vst [vmem:[#allocation4 + $0x5f0] sm:$0xf] %v2077_v13 }
 0x31c   : > { %2080 = vst [vmem:[#allocation4 + $0x5f4] sm:$0xf] %v2079_v14  ;;  %2082 = vst [vmem:[#allocation4 + $0x5f8] sm:$0xf] %v2081_v15  ;;  %v2087_v17 = vld [vmem:[%s13501_s13 + $0x610] sm:$0xf] }
 0x31d   : > { %v2089_v18 = vld [vmem:[%s13501_s13 + $0x604] sm:$0xf]  ;;  %2084 = vst [vmem:[#allocation4 + $0x5fc] sm:$0xff] %v2083_v16   ;;  %2088 = vst [vmem:[#allocation4 + $0x604] sm:$0xf] %v2087_v17  ;;  %v2099_v23 = vld [vmem:[%s13501_s13 + $0x61c] sm:$0xff]  }
 0x31e   : > { %2090 = vst [vmem:[#allocation4 + $0x608] sm:$0xf] %v2089_v18  ;;  %v2091_v19 = vld [vmem:[%s13501_s13 + $0x614] sm:$0xf]  ;;  %v2093_v20 = vld [vmem:[%s13501_s13 + $0x608] sm:$0xf] }
 0x31f   : > { %v2095_v21 = vld [vmem:[%s13501_s13 + $0x618] sm:$0xf]  ;;  %2092 = vst [vmem:[#allocation4 + $0x60c] sm:$0xf] %v2091_v19  ;;  %2094 = vst [vmem:[#allocation4 + $0x610] sm:$0xf] %v2093_v20 }
 0x320   : > { %2096 = vst [vmem:[#allocation4 + $0x614] sm:$0xf] %v2095_v21  ;;  %v2097_v22 = vld [vmem:[%s13501_s13 + $0x60c] sm:$0xf]  ;;  %v2103_v24 = vld [vmem:[%s13501_s13 + $0x630] sm:$0xf] }
 0x321   : > { %2098 = vst [vmem:[#allocation4 + $0x618] sm:$0xf] %v2097_v22  ;;  %2100 = vst [vmem:[#allocation4 + $0x61c] sm:$0xff] %v2099_v23   ;;  %v2105_v25 = vld [vmem:[%s13501_s13 + $0x624] sm:$0xf]  ;;  %v2115_v30 = vld [vmem:[%s13501_s13 + $0x63c] sm:$0xff]  }
 0x322   : > { %2104 = vst [vmem:[#allocation4 + $0x624] sm:$0xf] %v2103_v24  ;;  %v2107_v26 = vld [vmem:[%s13501_s13 + $0x634] sm:$0xf]  ;;  %v2109_v27 = vld [vmem:[%s13501_s13 + $0x628] sm:$0xf] }
 0x323   : > { %2106 = vst [vmem:[#allocation4 + $0x628] sm:$0xf] %v2105_v25  ;;  %2108 = vst [vmem:[#allocation4 + $0x62c] sm:$0xf] %v2107_v26  ;;  %v2111_v28 = vld [vmem:[%s13501_s13 + $0x638] sm:$0xf] }
 0x324   : > { %2110 = vst [vmem:[#allocation4 + $0x630] sm:$0xf] %v2109_v27  ;;  %v2113_v29 = vld [vmem:[%s13501_s13 + $0x62c] sm:$0xf]  ;;  %2112 = vst [vmem:[#allocation4 + $0x634] sm:$0xf] %v2111_v28 }
 0x325   : > { %2114 = vst [vmem:[#allocation4 + $0x638] sm:$0xf] %v2113_v29  ;;  %2116 = vst [vmem:[#allocation4 + $0x63c] sm:$0xff] %v2115_v30   ;;  %v2119_v31 = vld [vmem:[%s13501_s13 + $0x650] sm:$0xf]  ;;  %v2131_v37 = vld [vmem:[%s13501_s13 + $0x65c] sm:$0xff]  }
 0x326   : > { %v2121_v32 = vld [vmem:[%s13501_s13 + $0x644] sm:$0xf]  ;;  %v2123_v33 = vld [vmem:[%s13501_s13 + $0x654] sm:$0xf]  ;;  %2120 = vst [vmem:[#allocation4 + $0x644] sm:$0xf] %v2119_v31 }
 0x327   : > { %2122 = vst [vmem:[#allocation4 + $0x648] sm:$0xf] %v2121_v32  ;;  %2124 = vst [vmem:[#allocation4 + $0x64c] sm:$0xf] %v2123_v33  ;;  %v2125_v34 = vld [vmem:[%s13501_s13 + $0x648] sm:$0xf] }
 0x328   : > { %v2127_v35 = vld [vmem:[%s13501_s13 + $0x658] sm:$0xf]  ;;  %v2129_v36 = vld [vmem:[%s13501_s13 + $0x64c] sm:$0xf]  ;;  %2126 = vst [vmem:[#allocation4 + $0x650] sm:$0xf] %v2125_v34 }
 0x329   : > { %2128 = vst [vmem:[#allocation4 + $0x654] sm:$0xf] %v2127_v35  ;;  %2130 = vst [vmem:[#allocation4 + $0x658] sm:$0xf] %v2129_v36  ;;  %v2135_v38 = vld [vmem:[%s13501_s13 + $0x670] sm:$0xf] }
 0x32a   : > { %v2137_v39 = vld [vmem:[%s13501_s13 + $0x664] sm:$0xf]  ;;  %2132 = vst [vmem:[#allocation4 + $0x65c] sm:$0xff] %v2131_v37   ;;  %2136 = vst [vmem:[#allocation4 + $0x664] sm:$0xf] %v2135_v38  ;;  %v2147_v44 = vld [vmem:[%s13501_s13 + $0x67c] sm:$0xff]  }
 0x32b   : > { %2138 = vst [vmem:[#allocation4 + $0x668] sm:$0xf] %v2137_v39  ;;  %v2139_v40 = vld [vmem:[%s13501_s13 + $0x674] sm:$0xf]  ;;  %v2141_v41 = vld [vmem:[%s13501_s13 + $0x668] sm:$0xf] }
 0x32c   : > { %v2143_v42 = vld [vmem:[%s13501_s13 + $0x678] sm:$0xf]  ;;  %2140 = vst [vmem:[#allocation4 + $0x66c] sm:$0xf] %v2139_v40  ;;  %2142 = vst [vmem:[#allocation4 + $0x670] sm:$0xf] %v2141_v41 }
 0x32d   : > { %2144 = vst [vmem:[#allocation4 + $0x674] sm:$0xf] %v2143_v42  ;;  %v2145_v43 = vld [vmem:[%s13501_s13 + $0x66c] sm:$0xf]  ;;  %v2151_v45 = vld [vmem:[%s13501_s13 + $0x690] sm:$0xf] }
 0x32e   : > { %2146 = vst [vmem:[#allocation4 + $0x678] sm:$0xf] %v2145_v43  ;;  %2148 = vst [vmem:[#allocation4 + $0x67c] sm:$0xff] %v2147_v44   ;;  %v2153_v46 = vld [vmem:[%s13501_s13 + $0x684] sm:$0xf]  ;;  %v2163_v51 = vld [vmem:[%s13501_s13 + $0x69c] sm:$0xff]  }
 0x32f   : > { %2152 = vst [vmem:[#allocation4 + $0x684] sm:$0xf] %v2151_v45  ;;  %v2155_v47 = vld [vmem:[%s13501_s13 + $0x694] sm:$0xf]  ;;  %v2157_v48 = vld [vmem:[%s13501_s13 + $0x688] sm:$0xf] }
 0x330   : > { %2154 = vst [vmem:[#allocation4 + $0x688] sm:$0xf] %v2153_v46  ;;  %2156 = vst [vmem:[#allocation4 + $0x68c] sm:$0xf] %v2155_v47  ;;  %v2159_v49 = vld [vmem:[%s13501_s13 + $0x698] sm:$0xf] }
 0x331   : > { %2158 = vst [vmem:[#allocation4 + $0x690] sm:$0xf] %v2157_v48  ;;  %v2161_v50 = vld [vmem:[%s13501_s13 + $0x68c] sm:$0xf]  ;;  %2160 = vst [vmem:[#allocation4 + $0x694] sm:$0xf] %v2159_v49 }
 0x332   : > { %2162 = vst [vmem:[#allocation4 + $0x698] sm:$0xf] %v2161_v50  ;;  %2164 = vst [vmem:[#allocation4 + $0x69c] sm:$0xff] %v2163_v51   ;;  %v2167_v52 = vld [vmem:[%s13501_s13 + $0x6b0] sm:$0xf]  ;;  %v2179_v58 = vld [vmem:[%s13501_s13 + $0x6bc] sm:$0xff]  }
 0x333   : > { %v2169_v53 = vld [vmem:[%s13501_s13 + $0x6a4] sm:$0xf]  ;;  %v2171_v54 = vld [vmem:[%s13501_s13 + $0x6b4] sm:$0xf]  ;;  %2168 = vst [vmem:[#allocation4 + $0x6a4] sm:$0xf] %v2167_v52 }
 0x334   : > { %2170 = vst [vmem:[#allocation4 + $0x6a8] sm:$0xf] %v2169_v53  ;;  %2172 = vst [vmem:[#allocation4 + $0x6ac] sm:$0xf] %v2171_v54  ;;  %v2173_v55 = vld [vmem:[%s13501_s13 + $0x6a8] sm:$0xf] }
 0x335   : > { %v2175_v56 = vld [vmem:[%s13501_s13 + $0x6b8] sm:$0xf]  ;;  %v2177_v57 = vld [vmem:[%s13501_s13 + $0x6ac] sm:$0xf]  ;;  %2174 = vst [vmem:[#allocation4 + $0x6b0] sm:$0xf] %v2173_v55 }
 0x336   : > { %2176 = vst [vmem:[#allocation4 + $0x6b4] sm:$0xf] %v2175_v56  ;;  %2178 = vst [vmem:[#allocation4 + $0x6b8] sm:$0xf] %v2177_v57  ;;  %v2183_v59 = vld [vmem:[%s13501_s13 + $0x6d0] sm:$0xf] }
 0x337   : > { %v2185_v60 = vld [vmem:[%s13501_s13 + $0x6c4] sm:$0xf]  ;;  %2180 = vst [vmem:[#allocation4 + $0x6bc] sm:$0xff] %v2179_v58   ;;  %2184 = vst [vmem:[#allocation4 + $0x6c4] sm:$0xf] %v2183_v59  ;;  %v2195_v1 = vld [vmem:[%s13501_s13 + $0x6dc] sm:$0xff]  }
 0x338   : > { %2186 = vst [vmem:[#allocation4 + $0x6c8] sm:$0xf] %v2185_v60  ;;  %v2187_v61 = vld [vmem:[%s13501_s13 + $0x6d4] sm:$0xf]  ;;  %v2189_v62 = vld [vmem:[%s13501_s13 + $0x6c8] sm:$0xf] }
 0x339   : > { %v2191_v63 = vld [vmem:[%s13501_s13 + $0x6d8] sm:$0xf]  ;;  %2188 = vst [vmem:[#allocation4 + $0x6cc] sm:$0xf] %v2187_v61  ;;  %2190 = vst [vmem:[#allocation4 + $0x6d0] sm:$0xf] %v2189_v62 }
 0x33a   : > { %2192 = vst [vmem:[#allocation4 + $0x6d4] sm:$0xf] %v2191_v63  ;;  %v2193_v0 = vld [vmem:[%s13501_s13 + $0x6cc] sm:$0xf]  ;;  %v2199_v2 = vld [vmem:[%s13501_s13 + $0x6f0] sm:$0xf] }
 0x33b   : > { %2194 = vst [vmem:[#allocation4 + $0x6d8] sm:$0xf] %v2193_v0  ;;  %2196 = vst [vmem:[#allocation4 + $0x6dc] sm:$0xff] %v2195_v1   ;;  %v2201_v3 = vld [vmem:[%s13501_s13 + $0x6e4] sm:$0xf]  ;;  %v2211_v8 = vld [vmem:[%s13501_s13 + $0x6fc] sm:$0xff]  }
 0x33c   : > { %2200 = vst [vmem:[#allocation4 + $0x6e4] sm:$0xf] %v2199_v2  ;;  %v2203_v4 = vld [vmem:[%s13501_s13 + $0x6f4] sm:$0xf]  ;;  %v2205_v5 = vld [vmem:[%s13501_s13 + $0x6e8] sm:$0xf] }
 0x33d   : > { %2202 = vst [vmem:[#allocation4 + $0x6e8] sm:$0xf] %v2201_v3  ;;  %2204 = vst [vmem:[#allocation4 + $0x6ec] sm:$0xf] %v2203_v4  ;;  %v2207_v6 = vld [vmem:[%s13501_s13 + $0x6f8] sm:$0xf] }
 0x33e   : > { %2206 = vst [vmem:[#allocation4 + $0x6f0] sm:$0xf] %v2205_v5  ;;  %v2209_v7 = vld [vmem:[%s13501_s13 + $0x6ec] sm:$0xf]  ;;  %2208 = vst [vmem:[#allocation4 + $0x6f4] sm:$0xf] %v2207_v6 }
 0x33f   : > { %2210 = vst [vmem:[#allocation4 + $0x6f8] sm:$0xf] %v2209_v7  ;;  %2212 = vst [vmem:[#allocation4 + $0x6fc] sm:$0xff] %v2211_v8   ;;  %v2215_v9 = vld [vmem:[%s13501_s13 + $0x710] sm:$0xf]  ;;  %v2227_v15 = vld [vmem:[%s13501_s13 + $0x71c] sm:$0xff]  }
 0x340   : > { %v2217_v10 = vld [vmem:[%s13501_s13 + $0x704] sm:$0xf]  ;;  %v2219_v11 = vld [vmem:[%s13501_s13 + $0x714] sm:$0xf]  ;;  %2216 = vst [vmem:[#allocation4 + $0x704] sm:$0xf] %v2215_v9 }
 0x341   : > { %2218 = vst [vmem:[#allocation4 + $0x708] sm:$0xf] %v2217_v10  ;;  %2220 = vst [vmem:[#allocation4 + $0x70c] sm:$0xf] %v2219_v11  ;;  %v2221_v12 = vld [vmem:[%s13501_s13 + $0x708] sm:$0xf] }
 0x342   : > { %v2223_v13 = vld [vmem:[%s13501_s13 + $0x718] sm:$0xf]  ;;  %v2225_v14 = vld [vmem:[%s13501_s13 + $0x70c] sm:$0xf]  ;;  %2222 = vst [vmem:[#allocation4 + $0x710] sm:$0xf] %v2221_v12 }
 0x343   : > { %2224 = vst [vmem:[#allocation4 + $0x714] sm:$0xf] %v2223_v13  ;;  %2226 = vst [vmem:[#allocation4 + $0x718] sm:$0xf] %v2225_v14  ;;  %v2231_v16 = vld [vmem:[%s13501_s13 + $0x730] sm:$0xf] }
 0x344   : > { %v2233_v17 = vld [vmem:[%s13501_s13 + $0x724] sm:$0xf]  ;;  %2228 = vst [vmem:[#allocation4 + $0x71c] sm:$0xff] %v2227_v15   ;;  %2232 = vst [vmem:[#allocation4 + $0x724] sm:$0xf] %v2231_v16  ;;  %v2243_v22 = vld [vmem:[%s13501_s13 + $0x73c] sm:$0xff]  }
 0x345   : > { %2234 = vst [vmem:[#allocation4 + $0x728] sm:$0xf] %v2233_v17  ;;  %v2235_v18 = vld [vmem:[%s13501_s13 + $0x734] sm:$0xf]  ;;  %v2237_v19 = vld [vmem:[%s13501_s13 + $0x728] sm:$0xf] }
 0x346   : > { %v2239_v20 = vld [vmem:[%s13501_s13 + $0x738] sm:$0xf]  ;;  %2236 = vst [vmem:[#allocation4 + $0x72c] sm:$0xf] %v2235_v18  ;;  %2238 = vst [vmem:[#allocation4 + $0x730] sm:$0xf] %v2237_v19 }
 0x347   : > { %2240 = vst [vmem:[#allocation4 + $0x734] sm:$0xf] %v2239_v20  ;;  %v2241_v21 = vld [vmem:[%s13501_s13 + $0x72c] sm:$0xf]  ;;  %v2247_v23 = vld [vmem:[%s13501_s13 + $0x750] sm:$0xf] }
 0x348   : > { %2242 = vst [vmem:[#allocation4 + $0x738] sm:$0xf] %v2241_v21  ;;  %2244 = vst [vmem:[#allocation4 + $0x73c] sm:$0xff] %v2243_v22   ;;  %v2249_v24 = vld [vmem:[%s13501_s13 + $0x744] sm:$0xf]  ;;  %v2259_v29 = vld [vmem:[%s13501_s13 + $0x75c] sm:$0xff]  }
 0x349   : > { %2248 = vst [vmem:[#allocation4 + $0x744] sm:$0xf] %v2247_v23  ;;  %v2251_v25 = vld [vmem:[%s13501_s13 + $0x754] sm:$0xf]  ;;  %v2253_v26 = vld [vmem:[%s13501_s13 + $0x748] sm:$0xf] }
 0x34a   : > { %2250 = vst [vmem:[#allocation4 + $0x748] sm:$0xf] %v2249_v24  ;;  %2252 = vst [vmem:[#allocation4 + $0x74c] sm:$0xf] %v2251_v25  ;;  %v2255_v27 = vld [vmem:[%s13501_s13 + $0x758] sm:$0xf] }
 0x34b   : > { %2254 = vst [vmem:[#allocation4 + $0x750] sm:$0xf] %v2253_v26  ;;  %v2257_v28 = vld [vmem:[%s13501_s13 + $0x74c] sm:$0xf]  ;;  %2256 = vst [vmem:[#allocation4 + $0x754] sm:$0xf] %v2255_v27 }
 0x34c   : > { %2258 = vst [vmem:[#allocation4 + $0x758] sm:$0xf] %v2257_v28  ;;  %2260 = vst [vmem:[#allocation4 + $0x75c] sm:$0xff] %v2259_v29   ;;  %v2263_v30 = vld [vmem:[%s13501_s13 + $0x770] sm:$0xf]  ;;  %v2275_v36 = vld [vmem:[%s13501_s13 + $0x77c] sm:$0xff]  }
 0x34d   : > { %v2265_v31 = vld [vmem:[%s13501_s13 + $0x764] sm:$0xf]  ;;  %v2267_v32 = vld [vmem:[%s13501_s13 + $0x774] sm:$0xf]  ;;  %2264 = vst [vmem:[#allocation4 + $0x764] sm:$0xf] %v2263_v30 }
 0x34e   : > { %2266 = vst [vmem:[#allocation4 + $0x768] sm:$0xf] %v2265_v31  ;;  %2268 = vst [vmem:[#allocation4 + $0x76c] sm:$0xf] %v2267_v32  ;;  %v2269_v33 = vld [vmem:[%s13501_s13 + $0x768] sm:$0xf] }
 0x34f   : > { %v2271_v34 = vld [vmem:[%s13501_s13 + $0x778] sm:$0xf]  ;;  %v2273_v35 = vld [vmem:[%s13501_s13 + $0x76c] sm:$0xf]  ;;  %2270 = vst [vmem:[#allocation4 + $0x770] sm:$0xf] %v2269_v33 }
 0x350   : > { %2272 = vst [vmem:[#allocation4 + $0x774] sm:$0xf] %v2271_v34  ;;  %2274 = vst [vmem:[#allocation4 + $0x778] sm:$0xf] %v2273_v35  ;;  %v2279_v37 = vld [vmem:[%s13501_s13 + $0x790] sm:$0xf] }
 0x351   : > { %v2281_v38 = vld [vmem:[%s13501_s13 + $0x784] sm:$0xf]  ;;  %2276 = vst [vmem:[#allocation4 + $0x77c] sm:$0xff] %v2275_v36   ;;  %2280 = vst [vmem:[#allocation4 + $0x784] sm:$0xf] %v2279_v37  ;;  %v2291_v43 = vld [vmem:[%s13501_s13 + $0x79c] sm:$0xff]  }
 0x352   : > { %2282 = vst [vmem:[#allocation4 + $0x788] sm:$0xf] %v2281_v38  ;;  %v2283_v39 = vld [vmem:[%s13501_s13 + $0x794] sm:$0xf]  ;;  %v2285_v40 = vld [vmem:[%s13501_s13 + $0x788] sm:$0xf] }
 0x353   : > { %v2287_v41 = vld [vmem:[%s13501_s13 + $0x798] sm:$0xf]  ;;  %2284 = vst [vmem:[#allocation4 + $0x78c] sm:$0xf] %v2283_v39  ;;  %2286 = vst [vmem:[#allocation4 + $0x790] sm:$0xf] %v2285_v40 }
 0x354   : > { %2288 = vst [vmem:[#allocation4 + $0x794] sm:$0xf] %v2287_v41  ;;  %v2289_v42 = vld [vmem:[%s13501_s13 + $0x78c] sm:$0xf]  ;;  %v2295_v44 = vld [vmem:[%s13501_s13 + $0x7b0] sm:$0xf] }
 0x355   : > { %2290 = vst [vmem:[#allocation4 + $0x798] sm:$0xf] %v2289_v42  ;;  %2292 = vst [vmem:[#allocation4 + $0x79c] sm:$0xff] %v2291_v43   ;;  %v2297_v45 = vld [vmem:[%s13501_s13 + $0x7a4] sm:$0xf]  ;;  %v2307_v50 = vld [vmem:[%s13501_s13 + $0x7bc] sm:$0xff]  }
 0x356   : > { %2296 = vst [vmem:[#allocation4 + $0x7a4] sm:$0xf] %v2295_v44  ;;  %v2299_v46 = vld [vmem:[%s13501_s13 + $0x7b4] sm:$0xf]  ;;  %v2301_v47 = vld [vmem:[%s13501_s13 + $0x7a8] sm:$0xf] }
 0x357   : > { %2298 = vst [vmem:[#allocation4 + $0x7a8] sm:$0xf] %v2297_v45  ;;  %2300 = vst [vmem:[#allocation4 + $0x7ac] sm:$0xf] %v2299_v46  ;;  %v2303_v48 = vld [vmem:[%s13501_s13 + $0x7b8] sm:$0xf] }
 0x358   : > { %2302 = vst [vmem:[#allocation4 + $0x7b0] sm:$0xf] %v2301_v47  ;;  %v2305_v49 = vld [vmem:[%s13501_s13 + $0x7ac] sm:$0xf]  ;;  %2304 = vst [vmem:[#allocation4 + $0x7b4] sm:$0xf] %v2303_v48 }
 0x359   : > { %2306 = vst [vmem:[#allocation4 + $0x7b8] sm:$0xf] %v2305_v49  ;;  %2308 = vst [vmem:[#allocation4 + $0x7bc] sm:$0xff] %v2307_v50   ;;  %v2311_v51 = vld [vmem:[%s13501_s13 + $0x7d0] sm:$0xf]  ;;  %v2323_v57 = vld [vmem:[%s13501_s13 + $0x7dc] sm:$0xff]  }
 0x35a   : > { %v2313_v52 = vld [vmem:[%s13501_s13 + $0x7c4] sm:$0xf]  ;;  %v2315_v53 = vld [vmem:[%s13501_s13 + $0x7d4] sm:$0xf]  ;;  %2312 = vst [vmem:[#allocation4 + $0x7c4] sm:$0xf] %v2311_v51 }
 0x35b   : > { %2314 = vst [vmem:[#allocation4 + $0x7c8] sm:$0xf] %v2313_v52  ;;  %2316 = vst [vmem:[#allocation4 + $0x7cc] sm:$0xf] %v2315_v53  ;;  %v2317_v54 = vld [vmem:[%s13501_s13 + $0x7c8] sm:$0xf] }
 0x35c   : > { %v2319_v55 = vld [vmem:[%s13501_s13 + $0x7d8] sm:$0xf]  ;;  %v2321_v56 = vld [vmem:[%s13501_s13 + $0x7cc] sm:$0xf]  ;;  %2318 = vst [vmem:[#allocation4 + $0x7d0] sm:$0xf] %v2317_v54 }
 0x35d   : > { %2320 = vst [vmem:[#allocation4 + $0x7d4] sm:$0xf] %v2319_v55  ;;  %2322 = vst [vmem:[#allocation4 + $0x7d8] sm:$0xf] %v2321_v56  ;;  %v2327_v58 = vld [vmem:[%s13501_s13 + $0x7f0] sm:$0xf] }
 0x35e   : > { %v2329_v59 = vld [vmem:[%s13501_s13 + $0x7e4] sm:$0xf]  ;;  %2324 = vst [vmem:[#allocation4 + $0x7dc] sm:$0xff] %v2323_v57   ;;  %2328 = vst [vmem:[#allocation4 + $0x7e4] sm:$0xf] %v2327_v58  ;;  %v9891_v5 = vld [vmem:[%s13503_s26 + $0x48] sm:$0xff]  }
 0x35f   : > { %2330 = vst [vmem:[#allocation4 + $0x7e8] sm:$0xf] %v2329_v59  ;;  %v2331_v60 = vld [vmem:[%s13501_s13 + $0x7f4] sm:$0xf]  ;;  %v2333_v61 = vld [vmem:[%s13501_s13 + $0x7e8] sm:$0xf] }
 0x360   : > { %v2335_v62 = vld [vmem:[%s13501_s13 + $0x7f8] sm:$0xf]  ;;  %2332 = vst [vmem:[#allocation4 + $0x7ec] sm:$0xf] %v2331_v60  ;;  %2334 = vst [vmem:[#allocation4 + $0x7f0] sm:$0xf] %v2333_v61 }
 0x361   : > { %2336 = vst [vmem:[#allocation4 + $0x7f4] sm:$0xf] %v2335_v62  ;;  %v2337_v63 = vld [vmem:[%s13501_s13 + $0x7ec] sm:$0xf]  ;;  %v2339_v0 = vld [vmem:[%s13501_s13 + $0x7fc] sm:$0xf] }
 0x362   : > { %2338 = vst [vmem:[#allocation4 + $0x7f8] sm:$0xf] %v2337_v63  ;;  %2340 = vst [vmem:[#allocation4 + $0x7fc] sm:$0xf] %v2339_v0  ;;  %v9887_v1 = vld [vmem:[%s13502_s7 + $0x40] sm:$0xff]   ;;  %v9892_v6 = vld [vmem:[%s13503_s26 + $0x8] sm:$0xff]  }
 0x363   : > { %v9888_v2 = vld [vmem:[%s13503_s26] sm:$0xff]   ;;  %9397 = vmatprep.subr.bf16.mxu0 %v9887_v1  ;;  %v9893_v7 = vld [vmem:[%s13503_s26 + $0xc8] sm:$0xff]   ;;  %v9895_v9 = vld [vmem:[%s13503_s26 + $0x50] sm:$0xff]  }
 0x364   : > { %v9889_v3 = vld [vmem:[%s13503_s26 + $0xc0] sm:$0xff]   ;;  %9398 = vmatpush3.bf16.msra.mxu0 %v9888_v2  ;;  %v9894_v8 = vld [vmem:[%s13503_s26 + $0x88] sm:$0xff]   ;;  %v9896_v10 = vld [vmem:[%s13503_s26 + $0x10] sm:$0xff]  }
 0x365   : > { %v9890_v4 = vld [vmem:[%s13503_s26 + $0x80] sm:$0xff]   ;;  %9419 = vmatprep.subr.bf16.mxu1 %v9889_v3  ;;  %9399 = vmatprep.subr.bf16.mxu0 %v9891_v5  ;;  %v9897_v11 = vld [vmem:[%s13503_s26 + $0xd0] sm:$0xff]   ;;  %v9899_v13 = vld [vmem:[%s13503_s26 + $0x58] sm:$0xff]  }
 0x366   : > { %9420 = vmatpush3.bf16.msra.mxu1 %v9890_v4  ;;  %v9898_v12 = vld [vmem:[%s13503_s26 + $0x90] sm:$0xff]   ;;  %v9900_v14 = vld [vmem:[%s13503_s26 + $0x18] sm:$0xff]   ;;  %v9903_v17 = vld [vmem:[%s13503_s26 + $0x60] sm:$0xff]  }
 0x367   : > { %9421 = vmatprep.subr.bf16.mxu1 %v9893_v7  ;;  %v9901_v15 = vld [vmem:[%s13503_s26 + $0xd8] sm:$0xff]   ;;  %v9904_v18 = vld [vmem:[%s13503_s26 + $0x20] sm:$0xff]   ;;  %v9907_v21 = vld [vmem:[%s13503_s26 + $0x68] sm:$0xff]  }
 0x368   : > { %9400 = vmatpush3.bf16.msra.mxu0 %v9892_v6  ;;  %v9902_v16 = vld [vmem:[%s13503_s26 + $0x98] sm:$0xff]   ;;  %v9905_v19 = vld [vmem:[%s13503_s26 + $0xe0] sm:$0xff]   ;;  %v9908_v22 = vld [vmem:[%s13503_s26 + $0x28] sm:$0xff]  }
 0x369   : > { %9401 = vmatprep.subr.bf16.mxu0 %v9895_v9  ;;  %v9906_v20 = vld [vmem:[%s13503_s26 + $0xa0] sm:$0xff]   ;;  %v9909_v23 = vld [vmem:[%s13503_s26 + $0xe8] sm:$0xff]   ;;  %v9911_v25 = vld [vmem:[%s13503_s26 + $0x70] sm:$0xff]  }
 0x36a   : > { %9422 = vmatpush3.bf16.msra.mxu1 %v9894_v8  ;;  %v9910_v24 = vld [vmem:[%s13503_s26 + $0xa8] sm:$0xff]   ;;  %v9912_v26 = vld [vmem:[%s13503_s26 + $0x30] sm:$0xff]   ;;  %v9915_v29 = vld [vmem:[%s13503_s26 + $0x78] sm:$0xff]  }
 0x36b   : > { %9423 = vmatprep.subr.bf16.mxu1 %v9897_v11  ;;  %v9913_v27 = vld [vmem:[%s13503_s26 + $0xf0] sm:$0xff]   ;;  %v9916_v30 = vld [vmem:[%s13503_s26 + $0x38] sm:$0xff]   ;;  %v9922_v35 = vld [vmem:[%s13503_s26 + $0x140] sm:$0xff]  }
 0x36c   : > { %9402 = vmatpush3.bf16.msra.mxu0 %v9896_v10  ;;  %v9914_v28 = vld [vmem:[%s13503_s26 + $0xb0] sm:$0xff]   ;;  %v9917_v31 = vld [vmem:[%s13503_s26 + $0xf8] sm:$0xff]   ;;  %v9923_v36 = vld [vmem:[%s13504_s5 + $0x8] ss:$24 sps:$4 sm:$0xff]  }
 0x36d   : > { %9403 = vmatprep.subr.bf16.mxu0 %v9899_v13  ;;  %v9918_v32 = vld [vmem:[%s13504_s5] ss:$24 sps:$4 sm:$0xff]   ;;  %v9920_v33 = vld [vmem:[%s13504_s5 + $0x4] ss:$24 sps:$4 sm:$0xff]   ;;  %v9927_v39 = vld [vmem:[%s13503_s26 + $0x148] sm:$0xff]  }
 0x36e   : > { %9424 = vmatpush3.bf16.msra.mxu1 %v9898_v12  ;;  %v9921_v34 = vld [vmem:[%s13503_s26 + $0xb8] sm:$0xff]   ;;  %5943 = vmatprep.mubr.bf16.mxu0 %v9920_v33  ;;  %v9925_v37 = vld [vmem:[%s13504_s5 + $0xc] ss:$24 sps:$4 sm:$0xff]   ;;  %v9929_v41 = vld [vmem:[%s13503_s26 + $0x150] sm:$0xff]  }
 0x36f   : > { %9425 = vmatprep.subr.bf16.mxu1 %v9901_v15  ;;  %v9926_v38 = vld [vmem:[%s13503_s26 + $0x100] sm:$0xff]   ;;  %5984 = vmatprep.mubr.bf16.mxu1 %v9925_v37  ;;  %v9928_v40 = vld [vmem:[%s13503_s26 + $0x108] sm:$0xff]   ;;  %v9930_v42 = vld [vmem:[%s13503_s26 + $0x110] sm:$0xff]  }
 0x370   : > { %9404 = vmatpush3.bf16.msra.mxu0 %v9900_v14  ;;  %v9931_v43 = vld [vmem:[%s13503_s26 + $0x158] sm:$0xff]   ;;  %v9933_v45 = vld [vmem:[%s13503_s26 + $0x160] sm:$0xff]   ;;  %v9935_v47 = vld [vmem:[%s13503_s26 + $0x168] sm:$0xff]  }
 0x371   : > { %9405 = vmatprep.subr.bf16.mxu0 %v9903_v17  ;;  %v9932_v44 = vld [vmem:[%s13503_s26 + $0x118] sm:$0xff]   ;;  %v9934_v46 = vld [vmem:[%s13503_s26 + $0x120] sm:$0xff]   ;;  %v9943_v48 = vld [vmem:[%s13504_s5 + $0x14] ss:$24 sps:$4 sm:$0xff]  }
 0x372   : > { %9426 = vmatpush3.bf16.msra.mxu1 %v9902_v16 }
 0x373   : > { %9427 = vmatprep.subr.bf16.mxu1 %v9905_v19 }
 0x374   : > { %9406 = vmatpush3.bf16.msra.mxu0 %v9904_v18 }
 0x375   : > { %9407 = vmatprep.subr.bf16.mxu0 %v9907_v21 }
 0x376   : > { %9428 = vmatpush3.bf16.msra.mxu1 %v9906_v20 }
 0x377   : > { %9429 = vmatprep.subr.bf16.mxu1 %v9909_v23 }
 0x378   : > { %9408 = vmatpush3.bf16.msra.mxu0 %v9908_v22 }
 0x379   : > { %9409 = vmatprep.subr.bf16.mxu0 %v9911_v25 }
 0x37a   : > { %9430 = vmatpush3.bf16.msra.mxu1 %v9910_v24 }
 0x37b   : > { %9431 = vmatprep.subr.bf16.mxu1 %v9913_v27 }
 0x37c   : > { %9410 = vmatpush3.bf16.msra.mxu0 %v9912_v26 }
 0x37d   : > { %9411 = vmatprep.subr.bf16.mxu0 %v9915_v29 }
 0x37e   : > { %9432 = vmatpush3.bf16.msra.mxu1 %v9914_v28 }
 0x37f   : > { %9433 = vmatprep.subr.bf16.mxu1 %v9917_v31 }
 0x380   : > { %9412 = vmatpush3.bf16.msra.mxu0 %v9916_v30 }
 0x381   : > { %9441 = vmatprep.subr.bf16.mxu0 %v9922_v35 }
 0x382   : > { %9434 = vmatpush3.bf16.msra.mxu1 %v9921_v34 }
 0x383   : > { %5944 = vmatmul.mubr.bf16.vlgmr.msra.gmra.mrb[0].mxu0 %v9918_v32 }
 0x384   : > { %9442 = vmatpush3.bf16.msra.mxu0 %v9926_v38 }
 0x385   : > { %5985 = vmatmul.mubr.bf16.vlgmr.msra.gmra.mrb[0].mxu1 %v9923_v36  ;;  %9443 = vmatprep.subr.bf16.mxu0 %v9927_v39 }
 0x388   : > { %9444 = vmatpush3.bf16.msra.mxu0 %v9928_v40 }
 0x389   : > { %9445 = vmatprep.subr.bf16.mxu0 %v9929_v41 }
 0x38c   : > { %9446 = vmatpush3.bf16.msra.mxu0 %v9930_v42 }
 0x38d   : > { %9447 = vmatprep.subr.bf16.mxu0 %v9931_v43 }
 0x390   : > { %9448 = vmatpush3.bf16.msra.mxu0 %v9932_v44 }
 0x391   : > { %9449 = vmatprep.subr.bf16.mxu0 %v9933_v45 }
 0x392   : > { %5476 = vsyncadd [#allocation6 + $0x1], 32768  ;;  %6025 = vmatprep.mubr.bf16.mxu0 %v9943_v48  ;;  %v9936_v49 = vld [vmem:[%s13503_s26 + $0x128] sm:$0xff]   ;;  %v9937_v50 = vld [vmem:[%s13503_s26 + $0x170] sm:$0xff]   ;;  %s10710_s28 = smov [#allocation5]   ;;  %s13505_s24 = sld [smem:[#allocation80_spill]] }
 0x393   : > { %v9938_v51 = vld [vmem:[%s13503_s26 + $0x130] sm:$0xff]   ;;  %v9939_v52 = vld [vmem:[%s13503_s26 + $0x178] sm:$0xff]   ;;  %s5485_s27 = sshll.u32 %s10710_s28, 4  ;;  %s5486_s27 = int_to_ptr.vmem [resolvable:$true] %s5485_s27 }
 0x394   : > { %9450 = vmatpush3.bf16.msra.mxu0 %v9934_v46  ;;  %v9940_v53 = vld [vmem:[%s13503_s26 + $0x138] sm:$0xff]   ;;  %v9941_v54 = vld [vmem:[%s13504_s5 + $0x10] ss:$24 sps:$4 sm:$0xff]  }
 0x395   : > { %9451 = vmatprep.subr.bf16.mxu0 %v9935_v47 }
 0x398   : > { %9452 = vmatpush3.bf16.msra.mxu0 %v9936_v49  ;;  %s10583_s2 = scalar_lea.hbm %s13505_s24, 4096 }
 0x399   : > { %9453 = vmatprep.subr.bf16.mxu0 %v9937_v50  ;;  %p10584_p1 = scmp.ne.s32.totalorder %s13505_s24, %s10583_s2  ;;  %p10587_p12 = scmp.lt.u32.totalorder %s10583_s2, %s13505_s24 }
 0x39b   : > { %p10589_p10 = pnand %p10587_p12, %p10584_p1 }
 0x39c   : > { %9454 = vmatpush3.bf16.msra.mxu0 %v9938_v51 }
 0x39d   : > { %9455 = vmatprep.subr.bf16.mxu0 %v9939_v52 }
 0x3a0   : > { %9456 = vmatpush3.bf16.msra.mxu0 %v9940_v53 }
 0x3a3   : > { %6026 = vmatmul.mubr.bf16.vlgmr.msra.gmra.mrb[4].mxu0 %v9941_v54 }
 0x3a4   : > { %10592 = shalt.err (!%p10589_p10)  }
 0x3a5   : > { %s10593_s14 = scalar_lea.vmem %s5486_s27, 4096  ;;  %p10598_p2 = scmp.lt.s32.totalorder %s5486_s27, %s5486_s27 }
 0x3a6   : > { %p10594_p7 = scmp.ne.s32.totalorder %s5486_s27, %s10593_s14  ;;  %p10599_p6 = scmp.lt.s32.totalorder %s10593_s14, %s10593_s14 }
 0x3a8   : > { %p10600_p4 = por %p10599_p6, %p10598_p2 }
 0x3aa   : > { %p10601_p3 = pnand %p10600_p4, %p10594_p7 }
 0x3ac   : > { %10604 = shalt.err (!%p10601_p3)  }
 0x3ad   : > { %5488 = dma.hbm_to_vmem [thread:$0]  %s13505_s24, 4096, %s5486_s27, [#allocation6 + $0x2]  ;;  %vm6034_vm0 = vcmask 523264  }
 0x3ae   : > { %s13506_s8 = sld [smem:[#allocation61_spill]] }
 0x3b4   : > { %v5591_v56 = vld [vmem:[%s13506_s8] sm:$0xff]  ;;  %v5592_v61 = vld [vmem:[%s13506_s8 + $0x8] sm:$0xff] }
 0x456   : > { %v9413_v55 = vpop.f32.mrb[0].mxu0 }
 0x457   : > { %v9414_v57 = vpop.f32.mrb[1].mxu0 }
 0x458   : > { %v9415_v58 = vadd.f32 %v9414_v57, %v9413_v55  ;;  %v9416_v59 = vpop.f32.mrb[2].mxu0  ;;  %v9435_v60 = vpop.f32.mrb[0].mxu1 }
 0x459   : > { %v9417_v62 = vpop.f32.mrb[3].mxu0  ;;  %v9436_v1 = vpop.f32.mrb[1].mxu1 }
 0x45a   : > { %v5946_v63 = vadd.f32 %v9415_v58, %v5591_v56  ;;  %v9418_v0 = vadd.f32 %v9417_v62, %v9416_v59  ;;  %v9437_v2 = vadd.f32 %v9436_v1, %v9435_v60  ;;  %v9438_v3 = vpop.f32.mrb[2].mxu1 }
 0x45b   : > { %v9439_v5 = vpop.f32.mrb[3].mxu1 }
 0x45c   : > { %v5949_v4 = vadd.f32 %v9418_v0, %v5592_v61  ;;  %v5987_v6 = vadd.f32 %v9437_v2, %v5946_v63  ;;  %v9440_v7 = vadd.f32 %v9439_v5, %v9438_v3 }
 0x45e   : > { %v5990_v8 = vadd.f32 %v9440_v7, %v5949_v4 }
 0x476   : > { %v9457_v9 = vpop.f32.mrb[4].mxu0 }
 0x477   : > { %v9458_v10 = vpop.f32.mrb[5].mxu0 }
 0x478   : > { %v9459_v11 = vadd.f32 %v9458_v10, %v9457_v9  ;;  %v9460_v12 = vpop.f32.mrb[6].mxu0 }
 0x479   : > { %v9461_v13 = vpop.f32.mrb[7].mxu0 }
 0x47a   : > { %v6028_v14 = vadd.f32 %v9459_v11, %v5987_v6  ;;  %v9462_v15 = vadd.f32 %v9461_v13, %v9460_v12 }
 0x47c   : > { %6035 = vst.msk [vmem:[#allocation2] sm:$0xff] %vm6034_vm0, %v6028_v14  ;;  %v6031_v16 = vadd.f32 %v9462_v15, %v5990_v8 }
 0x47e   : > { %6036 = vst.msk [vmem:[#allocation2 + $0x8] sm:$0xff] %vm6034_vm0, %v6031_v16 }
 0x47f PF: > { %s13507_s27 = sld [smem:[#allocation54_spill]] }
 0x485   : > { %p9316_p9 = scmp.ge.s32.totalorder %s13507_s27, 2 }
 0x486   : > { %v6042_v17 = vld [vmem:[#allocation2] sm:$0xff] (!%p9316_p9)  ;;  %vm6108_vm1 = vcmask (!%p9316_p9), 523264   ;;  %v6043_v18 = vld [vmem:[#allocation2 + $0x8] sm:$0xff] (!%p9316_p9)  ;;  %v10711_v39 = vmov (!%p9316_p9), 0   ;;  %s13508_s23 = scalar_lea.vmem (!%p9316_p9), [#allocation9], %s11406_s4  ;;  %v6154_v57 = vlaneseq (!%p9316_p9)  ;;  %v10712_v3 = vmov (!%p9316_p9), 0.0  }
 0x487   : > { %6040 = sbr.rel (%p9316_p9) target bundleno = 3827 (0xef3), region = 240  ;;  %v6109_v19 = vsel (!%p9316_p9), %vm6108_vm1, %v6042_v17, 0.0  ;;  %v6112_v20 = vsel (!%p9316_p9), %vm6108_vm1, %v6043_v18, 0.0  ;;  %v9989_v31 = vld [vmem:[%s11415_s3 + $0x4] ss:$8 sps:$4 sm:$0xff] (!%p9316_p9)   ;;  %6239 = vmatprep.mubr.bf16.mxu1 (!%p9316_p9), %v10711_v39  ;;  %9578 = vmatprep.subr.bf16.mxu0 (!%p9316_p9), %v10712_v3  ;;  %s10714_s11 = smov (!%p9316_p9), 112  }
 0x488   : > { %6110 = vadd.xlane.f32.xlu0 (!%p9316_p9), %v6109_v19  ;;  %v9991_v32 = vld [vmem:[%s11415_s3] ss:$8 sps:$4 sm:$0xff] (!%p9316_p9)   ;;  %6207 = vmatprep.subr.bf16.mxu1 (!%p9316_p9), %v9989_v31  ;;  %v9992_v33 = vld [vmem:[%s11415_s3 + $0x14] ss:$8 sps:$4 sm:$0xff] (!%p9316_p9)   ;;  %v9994_v34 = vld [vmem:[%s11415_s3 + $0x10] ss:$8 sps:$4 sm:$0xff] (!%p9316_p9)  }
 0x489   : > { %6208 = vmatpush1.bf16.msra.mxu1 (!%p9316_p9), %v9991_v32  ;;  %v9995_v35 = vld [vmem:[%s11415_s3 + $0x24] ss:$8 sps:$4 sm:$0xff] (!%p9316_p9)   ;;  %v9997_v36 = vld [vmem:[%s11415_s3 + $0x20] ss:$8 sps:$4 sm:$0xff] (!%p9316_p9)   ;;  %v9998_v37 = vld [vmem:[%s11415_s3 + $0x34] ss:$8 sps:$4 sm:$0xff] (!%p9316_p9)  }
 0x48a   : > { %6209 = vmatprep.subr.bf16.mxu1 (!%p9316_p9), %v9992_v33  ;;  %v10000_v38 = vld [vmem:[%s11415_s3 + $0x30] ss:$8 sps:$4 sm:$0xff] (!%p9316_p9)   ;;  %v9317_v48 = vld [vmem:[%s13508_s23] ss:$0 sm:$0xff] (!%p9316_p9)  ;;  %s13509_s3 = scalar_lea.vmem (!%p9316_p9), [#allocation11], %s11406_s4  ;;  %v13020_v58 = vshrl.u32 (!%p9316_p9), %v6154_v57, 7 }
 0x48b   : > { %v9318_v52 = vld [vmem:[%s13509_s3] ss:$0 sm:$0xff] (!%p9316_p9)  ;;  %vm10715_vm2 = vmmov (!%p9316_p9), 0   ;;  %s10716_s16 = smov (!%p9316_p9), 80   ;;  %s10717_s7 = smov (!%p9316_p9), 64   ;;  %vm6309_vm3 = vcmask (!%p9316_p9), 130048  }
 0x48c   : > { %6113 = vadd.xlane.f32.xlu0 (!%p9316_p9), %v6112_v20  ;;  %v6156_v59 = vsub.s32 (!%p9316_p9), 0, %v13020_v58  ;;  %v6054_v60 = vld [vmem:[%s11462_s18] sm:$0x3] (!%p9316_p9)  ;;  %v6160_v61 = vsub.s32 (!%p9316_p9), 1, %v13020_v58  ;;  %s10713_s18 = smov (!%p9316_p9), 96   ;;  %9580 = vmatprep.mubr.msk.bf16.mxu0 (!%p9316_p9), %vm10715_vm2, %v10712_v3  ;;  %vm6821_vm4 = vcmask (!%p9316_p9), 1043456  }
 0x48d   : > { %6210 = vmatpush1.bf16.msra.mxu1 (!%p9316_p9), %v9994_v34  ;;  %vm6721_vm5 = vcmask (!%p9316_p9), 64512   ;;  %s10718_s14 = smov (!%p9316_p9), 16   ;;  %s10719_s21 = smov (!%p9316_p9), 32   ;;  %vm7213_vm6 = vcmask (!%p9316_p9), 261120   ;;  %vm7216_vm7 = vcmask (!%p9316_p9), 392192  }
 0x48e   : > { %6211 = vmatprep.subr.bf16.mxu1 %v9995_v35  ;;  %v6157_v62 = vrot.slane %v6054_v60, %v6156_v59  ;;  %v6161_v0 = vrot.slane %v6054_v60, %v6160_v61  ;;  %s13510_s0 = scalar_lea.vmem [#allocation15], %s11406_s4  ;;  %s13511_s12 = scalar_lea.vmem [#allocation17], %s11406_s4 }
 0x491   : > { %6212 = vmatpush1.bf16.msra.mxu1 %v9997_v36 }
 0x492   : > { %6213 = vmatprep.subr.bf16.mxu1 %v9998_v37 }
 0x495   : > { %6214 = vmatpush1.bf16.msra.mxu1 %v10000_v38 }
 0x496   : > { %9566 = vmatprep.subr.bf16.mxu1 %v10712_v3 }
 0x515   : > { %v6111_v21 = vpop.xlane.xlu0 %6110 }
 0x516   : > { %v6116_v22 = vmul.f32 0.015625, %v6111_v21 }
 0x518   : > { %v6118_v23 = vsub.f32 %v6042_v17, %v6116_v22 }
 0x519   : > { %v6114_v24 = vpop.xlane.xlu0 %6113 }
 0x51a   : > { %v6117_v25 = vmul.f32 0.015625, %v6114_v24  ;;  %v6120_v26 = vmul.f32 %v6118_v23, %v6118_v23 }
 0x51c   : > { %v6119_v27 = vsub.f32 %v6043_v18, %v6117_v25  ;;  %v6122_v28 = vsel %vm6108_vm1, %v6120_v26, 0.0 }
 0x51d   : > { %6123 = vadd.xlane.f32.xlu1 %v6122_v28 }
 0x51e   : > { %v6121_v29 = vmul.f32 %v6119_v27, %v6119_v27 }
 0x520   : > { %v6125_v30 = vsel %vm6108_vm1, %v6121_v29, 0.0 }
 0x521   : > { %6126 = vadd.xlane.f32.xlu1 %v6125_v30 }
 0x5aa   : > { %v6124_v40 = vpop.xlane.xlu1 %6123 }
 0x5ab   : > { %v6128_v41 = vmul.f32 0.015625, %v6124_v40 }
 0x5ad   : > { %v6130_v42 = vadd.f32 1e-06, %v6128_v41 }
 0x5ae   : > { %v6127_v43 = vpop.xlane.xlu1 %6126 }
 0x5af   : > { %10033 = vrsqrt.f32 %v6130_v42  ;;  %v6129_v44 = vmul.f32 0.015625, %v6127_v43 }
 0x5b1   : > { %v6131_v45 = vadd.f32 1e-06, %v6129_v44 }
 0x5b3   : > { %10035 = vrsqrt.f32 %v6131_v45 }
 0x5b9   : > { %v10034_v46 = vpop.eup %10033 }
 0x5ba   : > { %v6134_v47 = vmul.f32 %v10034_v46, %v6118_v23 }
 0x5bc   : > { %v6142_v51 = vmul.f32 %v9317_v48, %v6134_v47 }
 0x5bd   : > { %v10036_v49 = vpop.eup %10035 }
 0x5be   : > { %v6135_v50 = vmul.f32 %v10036_v49, %v6119_v27  ;;  %v6150_v54 = vadd.f32 %v9318_v52, %v6142_v51 }
 0x5c0   : > { %v6143_v53 = vmul.f32 %v9317_v48, %v6135_v50  ;;  %v9336_v50 = vld [vmem:[#allocation7] ss:$0 sm:$0xff] }
 0x5c2   : > { %v6151_v55 = vadd.f32 %v9318_v52, %v6143_v53 }
 0x5c4   : > { %v6152_v56 = vpack.c.bf16 %v6151_v55, %v6150_v54 }
 0x5c6   : > { %9327 = vmatmul.mubr.msk.bf16.vlgmr.msra.gmra.mrb[0].mxu1 %vm6108_vm1, %v6152_v56 }
 0x5c7   : > { %9568 = vmatprep.mubr.msk.bf16.mxu1 %vm10715_vm2, %v10712_v3 }
 0x699   : > { %v6241_v63 = vpop.f32.mrb[0].mxu1 }
 0x69a   : > { %v6243_v1 = vpop.f32.mrb[1].mxu1  ;;  %v6242_v4 = vadd.f32 %v6241_v63, %v6157_v62 }
 0x69b   : > { %v6245_v2 = vpop.f32.mrb[2].mxu1  ;;  %v13031_v7 = vadd.f32 %v6243_v1, %v6161_v0 }
 0x69c   : > { %v6246_v5 = vadd.f32 %v6245_v2, %v6157_v62  ;;  %v6247_v6 = vpop.f32.mrb[3].mxu1  ;;  %v6270_v12 = vpack.c.bf16 %v6242_v4, %v6242_v4 }
 0x69d   : > { %v13033_v8 = vadd.f32 %v6247_v6, %v6161_v0  ;;  %v6298_v45 = vpack.c.bf16 %v13031_v7, %v13031_v7 }
 0x69e   : > { %v9949_v9 = vpack.i.bf16 %v6246_v5, %v6242_v4  ;;  %v6271_v11 = vpack.c.bf16 %v6246_v5, %v6246_v5 }
 0x69f   : > { %v13037_v10 = vpack.i.bf16 %v13033_v8, %v13031_v7  ;;  %v6299_v46 = vpack.c.bf16 %v13033_v8, %v13033_v8  ;;  %v6823_v47 = vsel %vm6821_vm4, %v6298_v45, 0 }
 0x6a0   : > { %9950 = vrot.lane.b32.xlu1 %v9949_v9, %s10713_s18  ;;  %9945 = vrot.lane.b32.xlu0 %v9949_v9, %s10714_s11 }
 0x6a1   : > { %v6869_v48 = vsel %vm6821_vm4, %v6299_v46, 0 }
 0x6a4   : > { %9955 = vrot.lane.b32.xlu1 %v9949_v9, %s10716_s16  ;;  %6357 = vrot.lane.b32.xlu0 %v6271_v11, %s10717_s7 }
 0x6a8   : > { %6307 = vrot.lane.b32.xlu1 %v6270_v12, %s10717_s7 }
 0x712   : > { %v9951_v13 = vpop.permute.xlu1 %9950  ;;  %v9946_v14 = vpop.permute.xlu0 %9945 }
 0x713   : > { %v9948_v15 = vunpack.i.h.bf16 %v9946_v14  ;;  %v9947_v16 = vunpack.i.l.bf16 %v9946_v14  ;;  %v9953_v17 = vunpack.i.h.bf16 %v9951_v13  ;;  %v9952_v18 = vunpack.i.l.bf16 %v9951_v13 }
 0x715   : > { %v6273_v19 = vpack.c.bf16 %v9948_v15, %v9948_v15  ;;  %v6272_v20 = vpack.c.bf16 %v9947_v16, %v9947_v16  ;;  %v6275_v22 = vpack.c.bf16 %v9953_v17, %v9953_v17  ;;  %v6274_v23 = vpack.c.bf16 %v9952_v18, %v9952_v18 }
 0x716   : > { %v9956_v21 = vpop.permute.xlu1 %9955  ;;  %v6358_v30 = vpop.permute.xlu0 %6357 }
 0x717   : > { %6455 = vrot.lane.b32.xlu0 %v6273_v19, %s10717_s7  ;;  %6406 = vrot.lane.b32.xlu1 %v6272_v20, %s10717_s7  ;;  %v9958_v24 = vunpack.i.h.bf16 %v9956_v21  ;;  %v9957_v25 = vunpack.i.l.bf16 %v9956_v21  ;;  %v6363_v31 = vsel %vm6309_vm3, %v6358_v30, 0 }
 0x719   : > { %v6277_v28 = vpack.c.bf16 %v9958_v24, %v9958_v24  ;;  %v6276_v29 = vpack.c.bf16 %v9957_v25, %v9957_v25 }
 0x71a   : > { %v6308_v26 = vpop.permute.xlu1 %6307 }
 0x71b   : > { %v6314_v27 = vsel %vm6309_vm3, %v6308_v26, 0  ;;  %6553 = vrot.lane.b32.xlu0 %v6275_v22, %s10717_s7  ;;  %6504 = vrot.lane.b32.xlu1 %v6274_v23, %s10717_s7 }
 0x71c   : > { %9567 = vmatpush3.bf16.xpose.msra.mxu1 %v6314_v27 }
 0x71d   : > { %9572 = vmatprep.subr.bf16.mxu1 %v10712_v3 }
 0x71f   : > { %6651 = vrot.lane.b32.xlu0 %v6277_v28, %s10717_s7  ;;  %6602 = vrot.lane.b32.xlu1 %v6276_v29, %s10717_s7 }
 0x723   : > { %9569 = vmatmul.mubr.msk.bf16.vlgmr.msra.gmra.mrb[4].mxu1 %vm6309_vm3, %v6270_v12 }
 0x724   : > { %9573 = vmatpush3.bf16.xpose.msra.mxu1 %v6363_v31  ;;  %9574 = vmatprep.mubr.msk.bf16.mxu1 %vm10715_vm2, %v10712_v3 }
 0x725   : > { %9584 = vmatprep.subr.bf16.mxu1 %v10712_v3 }
 0x72b   : > { %9575 = vmatmul.mubr.msk.bf16.vlgmr.msra.gmra.mrb[8].mxu1 %vm6309_vm3, %v6271_v11 }
 0x72c   : > { %9586 = vmatprep.mubr.msk.bf16.mxu1 %vm10715_vm2, %v10712_v3 }
 0x789   : > { %v6456_v32 = vpop.permute.xlu0 %6455  ;;  %v6407_v33 = vpop.permute.xlu1 %6406 }
 0x78a   : > { %v6461_v34 = vsel %vm6309_vm3, %v6456_v32, 0  ;;  %v6412_v35 = vsel %vm6309_vm3, %v6407_v33, 0 }
 0x78b   : > { %9579 = vmatpush3.bf16.xpose.msra.mxu0 %v6412_v35  ;;  %9585 = vmatpush3.bf16.xpose.msra.mxu1 %v6461_v34 }
 0x78c   : > { %9590 = vmatprep.subr.bf16.mxu0 %v10712_v3  ;;  %9596 = vmatprep.subr.bf16.mxu1 %v10712_v3 }
 0x78d   : > { %v6554_v36 = vpop.permute.xlu0 %6553  ;;  %v6505_v37 = vpop.permute.xlu1 %6504 }
 0x78e   : > { %v6559_v38 = vsel %vm6309_vm3, %v6554_v36, 0  ;;  %v6510_v40 = vsel %vm6309_vm3, %v6505_v37, 0 }
 0x791   : > { %v6652_v41 = vpop.permute.xlu0 %6651  ;;  %v6603_v42 = vpop.permute.xlu1 %6602 }
 0x792   : > { %9581 = vmatmul.mubr.msk.bf16.vlgmr.msra.gmra.mrb[0].mxu0 %vm6309_vm3, %v6272_v20  ;;  %9587 = vmatmul.mubr.msk.bf16.vlgmr.msra.gmra.mrb[12].mxu1 %vm6309_vm3, %v6273_v19  ;;  %v6657_v43 = vsel %vm6309_vm3, %v6652_v41, 0  ;;  %v6608_v44 = vsel %vm6309_vm3, %v6603_v42, 0 }
 0x793   : > { %9591 = vmatpush3.bf16.xpose.msra.mxu0 %v6510_v40  ;;  %9597 = vmatpush3.bf16.xpose.msra.mxu1 %v6559_v38 }
 0x794   : > { %9592 = vmatprep.mubr.msk.bf16.mxu0 %vm10715_vm2, %v10712_v3  ;;  %9598 = vmatprep.mubr.msk.bf16.mxu1 %vm10715_vm2, %v10712_v3 }
 0x795   : > { %9602 = vmatprep.subr.bf16.mxu0 %v10712_v3  ;;  %9608 = vmatprep.subr.bf16.mxu1 %v10712_v3 }
 0x79a   : > { %9593 = vmatmul.mubr.msk.bf16.vlgmr.msra.gmra.mrb[4].mxu0 %vm6309_vm3, %v6274_v23  ;;  %9599 = vmatmul.mubr.msk.bf16.vlgmr.msra.gmra.mrb[16].mxu1 %vm6309_vm3, %v6275_v22 }
 0x79b   : > { %9603 = vmatpush3.bf16.xpose.msra.mxu0 %v6608_v44  ;;  %9609 = vmatpush3.bf16.xpose.msra.mxu1 %v6657_v43 }
 0x79c   : > { %9604 = vmatprep.mubr.msk.bf16.mxu0 %vm10715_vm2, %v10712_v3  ;;  %9610 = vmatprep.mubr.msk.bf16.mxu1 %vm10715_vm2, %v10712_v3 }
 0x79d   : > { %9614 = vmatprep.subr.bf16.mxu0 %v10712_v3  ;;  %9620 = vmatprep.subr.bf16.mxu1 %v10712_v3 }
 0x7a2   : > { %9605 = vmatmul.mubr.msk.bf16.vlgmr.msra.gmra.mrb[8].mxu0 %vm6309_vm3, %v6276_v29  ;;  %9611 = vmatmul.mubr.msk.bf16.vlgmr.msra.gmra.mrb[20].mxu1 %vm6309_vm3, %v6277_v28 }
 0x7a3   : > { %9615 = vmatpush3.bf16.msra.mxu0 %v6823_v47  ;;  %9621 = vmatpush3.bf16.msra.mxu1 %v6869_v48 }
 0x7a4   : > { %9622 = vmatprep.mubr.msk.bf16.mxu1 %vm10715_vm2, %v10712_v3  ;;  %9632 = vmatprep.subr.bf16.mxu1 %v10712_v3 }
 0x7a5   : > { %9616 = vmatprep.mubr.msk.bf16.mxu0 %vm10715_vm2, %v10712_v3  ;;  %9626 = vmatprep.subr.bf16.mxu0 %v10712_v3 }
 0x7f6   : > { %v6350_v49 = vpop.f32.mrb[4].mxu1 }
 0x7f7   : > { %v6699_v51 = vmul.f32 0.25, %v6350_v49  ;;  %v9570_v52 = vpop.f32.mrb[5].mxu1 }
 0x7f8   : > { %v6353_v53 = vpop.f32.mrb[6].mxu1 }
 0x7f9   : > { %v9571_v54 = vpop.f32.mrb[7].mxu1  ;;  %v13094_v55 = vadd.f32 %v9336_v50, %v6699_v51 }
 0x7fb   : > { %v6722_v56 = vsel %vm6721_vm5, %v13094_v55, -inf }
 0x7fc   : > { %6723 = vmax.xlane.f32.xlu1 %v6722_v56 }
 0x7fe   : > { %v6399_v57 = vpop.f32.mrb[8].mxu1 }
 0x7ff   : > { %v6700_v60 = vmul.f32 0.25, %v6399_v57  ;;  %v9576_v62 = vpop.f32.mrb[9].mxu1 }
 0x800   : > { %v6402_v63 = vpop.f32.mrb[10].mxu1 }
 0x801   : > { %v9577_v0 = vpop.f32.mrb[11].mxu1  ;;  %v6714_v1 = vadd.f32 %v9336_v50, %v6700_v60 }
 0x803   : > { %v6725_v2 = vsel %vm6721_vm5, %v6714_v1, -inf }
 0x804   : > { %6726 = vmax.xlane.f32.xlu0 %v6725_v2 }
 0x865   : > { %v6448_v4 = vpop.f32.mrb[0].mxu0  ;;  %v6497_v5 = vpop.f32.mrb[12].mxu1 }
 0x866   : > { %v6701_v6 = vmul.f32 0.25, %v6448_v4  ;;  %v6702_v7 = vmul.f32 0.25, %v6497_v5  ;;  %v9582_v8 = vpop.f32.mrb[1].mxu0  ;;  %v9588_v9 = vpop.f32.mrb[13].mxu1 }
 0x867   : > { %v6451_v11 = vpop.f32.mrb[2].mxu0  ;;  %v6500_v12 = vpop.f32.mrb[14].mxu1 }
 0x868   : > { %v9583_v13 = vpop.f32.mrb[3].mxu0  ;;  %v9589_v14 = vpop.f32.mrb[15].mxu1  ;;  %v6715_v15 = vadd.f32 %v9336_v50, %v6701_v6  ;;  %v6716_v17 = vadd.f32 %v9336_v50, %v6702_v7 }
 0x86a   : > { %v6728_v16 = vsel %vm6721_vm5, %v6715_v15, -inf  ;;  %v6731_v24 = vsel %vm6721_vm5, %v6716_v17, -inf }
 0x86b   : > { %6729 = vmax.xlane.f32.xlu0 %v6728_v16 }
 0x86d   : > { %v6546_v18 = vpop.f32.mrb[4].mxu0  ;;  %v6595_v19 = vpop.f32.mrb[16].mxu1 }
 0x86e   : > { %v6703_v20 = vmul.f32 0.25, %v6546_v18  ;;  %v6704_v21 = vmul.f32 0.25, %v6595_v19  ;;  %v9594_v22 = vpop.f32.mrb[5].mxu0  ;;  %v9600_v23 = vpop.f32.mrb[17].mxu1 }
 0x86f   : > { %v6549_v25 = vpop.f32.mrb[6].mxu0  ;;  %v6598_v26 = vpop.f32.mrb[18].mxu1  ;;  %6732 = vmax.xlane.f32.xlu0 %v6731_v24 }
 0x870   : > { %v9595_v27 = vpop.f32.mrb[7].mxu0  ;;  %v9601_v28 = vpop.f32.mrb[19].mxu1  ;;  %v6718_v29 = vadd.f32 %v9336_v50, %v6704_v21  ;;  %v6717_v30 = vadd.f32 %v9336_v50, %v6703_v20 }
 0x872   : > { %v6737_v31 = vsel %vm6721_vm5, %v6718_v29, -inf  ;;  %v6734_v32 = vsel %vm6721_vm5, %v6717_v30, -inf }
 0x873   : > { %6738 = vmax.xlane.f32.xlu0 %v6737_v31  ;;  %6735 = vmax.xlane.f32.xlu1 %v6734_v32 }
 0x875   : > { %v6644_v33 = vpop.f32.mrb[8].mxu0  ;;  %v6693_v34 = vpop.f32.mrb[20].mxu1 }
 0x876   : > { %v6705_v35 = vmul.f32 0.25, %v6644_v33  ;;  %v6706_v36 = vmul.f32 0.25, %v6693_v34  ;;  %v9606_v37 = vpop.f32.mrb[9].mxu0  ;;  %v9612_v38 = vpop.f32.mrb[21].mxu1 }
 0x877   : > { %v6647_v40 = vpop.f32.mrb[10].mxu0  ;;  %v6696_v41 = vpop.f32.mrb[22].mxu1 }
 0x878   : > { %v9607_v42 = vpop.f32.mrb[11].mxu0  ;;  %v9613_v43 = vpop.f32.mrb[23].mxu1  ;;  %v6720_v44 = vadd.f32 %v9336_v50, %v6706_v36  ;;  %v6719_v45 = vadd.f32 %v9336_v50, %v6705_v35 }
 0x87a   : > { %v6743_v46 = vsel %vm6721_vm5, %v6720_v44, -inf  ;;  %v6740_v47 = vsel %vm6721_vm5, %v6719_v45, -inf }
 0x87b   : > { %6744 = vmax.xlane.f32.xlu0 %v6743_v46  ;;  %6741 = vmax.xlane.f32.xlu1 %v6740_v47 }
 0x889   : > { %v6724_v52 = vpop.xlane.xlu1 %6723 }
 0x88a   : > { %v6746_v53 = vsub.f32 %v13094_v55, %v6724_v52 }
 0x88c   : > { %9960 = vrot.lane.b32.xlu1 %v13037_v10, %s10714_s11  ;;  %v6754_v54 = vmul.f32 1.442695, %v6746_v53 }
 0x891   : > { %v6727_v48 = vpop.xlane.xlu0 %6726 }
 0x892   : > { %v6747_v49 = vsub.f32 %v6714_v1, %v6727_v48 }
 0x894   : > { %v6756_v51 = vmul.f32 1.442695, %v6747_v49 }
 0x896   : > { %10037 = vpow2.f32 %v6756_v51 }
 0x897   : > { %10039 = vpow2.f32 %v6754_v54 }
 0x8a0   : > { %v10038_v56 = vpop.eup %10037 }
 0x8a1   : > { %v6773_v50 = vsel %vm6721_vm5, %v10038_v56, 0.0  ;;  %v13109_v57 = vpop.eup %10039 }
 0x8a2   : > { %6774 = vadd.xlane.f32.xlu0 %v6773_v50  ;;  %v6770_v60 = vsel %vm6721_vm5, %v13109_v57, 0.0 }
 0x8b0   : > { %6771 = vadd.xlane.f32.xlu1 %v6770_v60 }
 0x8f8   : > { %v6730_v62 = vpop.xlane.xlu0 %6729 }
 0x8f9   : > { %v6748_v63 = vsub.f32 %v6715_v15, %v6730_v62 }
 0x8fb   : > { %v6758_v0 = vmul.f32 1.442695, %v6748_v63 }
 0x8fc   : > { %v6733_v1 = vpop.xlane.xlu0 %6732 }
 0x8fd   : > { %10041 = vpow2.f32 %v6758_v0  ;;  %v6749_v2 = vsub.f32 %v6716_v17, %v6733_v1 }
 0x8ff   : > { %v6760_v4 = vmul.f32 1.442695, %v6749_v2 }
 0x900   : > { %v6739_v55 = vpop.xlane.xlu0 %6738  ;;  %v6736_v5 = vpop.xlane.xlu1 %6735 }
 0x901   : > { %10043 = vpow2.f32 %v6760_v4  ;;  %v6751_v6 = vsub.f32 %v6718_v29, %v6739_v55  ;;  %v6750_v7 = vsub.f32 %v6717_v30, %v6736_v5 }
 0x903   : > { %v6764_v8 = vmul.f32 1.442695, %v6751_v6  ;;  %v6762_v9 = vmul.f32 1.442695, %v6750_v7 }
 0x905   : > { %10045 = vpow2.f32 %v6764_v8 }
 0x906   : > { %10047 = vpow2.f32 %v6762_v9 }
 0x907   : > { %v10042_v11 = vpop.eup %10041 }
 0x908   : > { %v6745_v12 = vpop.xlane.xlu0 %6744  ;;  %v6742_v13 = vpop.xlane.xlu1 %6741  ;;  %v6776_v14 = vsel %vm6721_vm5, %v10042_v11, 0.0 }
 0x909   : > { %v6753_v15 = vsub.f32 %v6720_v44, %v6745_v12  ;;  %v6752_v16 = vsub.f32 %v6719_v45, %v6742_v13  ;;  %6777 = vadd.xlane.f32.xlu1 %v6776_v14 }
 0x90b   : > { %v10044_v18 = vpop.eup %10043  ;;  %v6768_v17 = vmul.f32 1.442695, %v6753_v15  ;;  %v6766_v19 = vmul.f32 1.442695, %v6752_v16 }
 0x90c   : > { %v6779_v20 = vsel %vm6721_vm5, %v10044_v18, 0.0  ;;  %v9961_v30 = vpop.permute.xlu1 %9960 }
 0x90d   : > { %10049 = vpow2.f32 %v6768_v17  ;;  %6780 = vadd.xlane.f32.xlu0 %v6779_v20  ;;  %v9963_v31 = vunpack.i.h.bf16 %v9961_v30 }
 0x90e   : > { %10051 = vpow2.f32 %v6766_v19 }
 0x90f   : > { %v13115_v21 = vpop.eup %10045  ;;  %v6301_v33 = vpack.c.bf16 %v9963_v31, %v9963_v31  ;;  %v10001_v31 = vld [vmem:[%s11422_s10] sm:$0xff]  }
 0x910   : > { %v13117_v22 = vpop.eup %10047  ;;  %v6785_v23 = vsel %vm6721_vm5, %v13115_v21, 0.0 }
 0x911   : > { %6786 = vadd.xlane.f32.xlu0 %v6785_v23  ;;  %v6782_v24 = vsel %vm6721_vm5, %v13117_v22, 0.0  ;;  %v6961_v37 = vsel %vm6821_vm4, %v6301_v33, 0 }
 0x912   : > { %6783 = vadd.xlane.f32.xlu1 %v6782_v24 }
 0x917   : > { %v13123_v25 = vpop.eup %10049 }
 0x918   : > { %v13125_v26 = vpop.eup %10051  ;;  %v6791_v27 = vsel %vm6721_vm5, %v13123_v25, 0.0 }
 0x919   : > { %6792 = vadd.xlane.f32.xlu0 %v6791_v27  ;;  %v6788_v28 = vsel %vm6721_vm5, %v13125_v26, 0.0 }
 0x91a   : > { %6789 = vadd.xlane.f32.xlu1 %v6788_v28 }
 0x92b   : > { %9970 = vrot.lane.b32.xlu1 %v13037_v10, %s10716_s16 }
 0x92f   : > { %9965 = vrot.lane.b32.xlu0 %v13037_v10, %s10713_s18  ;;  %v6775_v29 = vpop.xlane.xlu0 %6774  ;;  %v9962_v10 = vunpack.i.l.bf16 %v9961_v30 }
 0x930   : > { %10053 = vrcp.f32 %v6775_v29 }
 0x931   : > { %v6300_v40 = vpack.c.bf16 %v9962_v10, %v9962_v10 }
 0x933   : > { %v6915_v43 = vsel %vm6821_vm4, %v6300_v40, 0  ;;  %v10003_v40 = vld [vmem:[%s11422_s10 + $0x10] sm:$0xff]  }
 0x93a   : > { %v10054_v32 = vpop.eup %10053 }
 0x93b   : > { %v6803_v34 = vmul.f32 %v10054_v32, %v10038_v56 }
 0x93d   : > { %v6772_v35 = vpop.xlane.xlu1 %6771  ;;  %v6811_v36 = vpack.c.bf16 %v6803_v34, %v6803_v34 }
 0x93e   : > { %10055 = vrcp.f32 %v6772_v35 }
 0x93f   : > { %9623 = vmatmul.mubr.msk.bf16.vlgmr.msra.gmra.mrb[24].mxu1 %vm6721_vm5, %v6811_v36  ;;  %v10002_v36 = vld [vmem:[%s11422_s10 + $0x8] sm:$0xff]  }
 0x940   : > { %9633 = vmatpush3.bf16.msra.mxu1 %v6961_v37  ;;  %9634 = vmatprep.mubr.msk.bf16.mxu1 %vm10715_vm2, %v10712_v3 }
 0x941   : > { %9644 = vmatprep.subr.bf16.mxu1 %v10712_v3 }
 0x948   : > { %v10056_v38 = vpop.eup %10055 }
 0x949   : > { %v6802_v41 = vmul.f32 %v10056_v38, %v13109_v57 }
 0x94b   : > { %v6810_v42 = vpack.c.bf16 %v6802_v41, %v6802_v41 }
 0x94d   : > { %9617 = vmatmul.mubr.msk.bf16.vlgmr.msra.gmra.mrb[12].mxu0 %vm6721_vm5, %v6810_v42  ;;  %v10004_v42 = vld [vmem:[%s11422_s10 + $0x18] sm:$0xff]   ;;  %s10720_s10 = smov 48  }
 0x94e   : > { %9627 = vmatpush3.bf16.msra.mxu0 %v6915_v43  ;;  %9628 = vmatprep.mubr.msk.bf16.mxu0 %vm10715_vm2, %v10712_v3 }
 0x94f   : > { %9638 = vmatprep.subr.bf16.mxu0 %v10712_v3 }
 0x996   : > { %v6778_v44 = vpop.xlane.xlu1 %6777 }
 0x997   : > { %10057 = vrcp.f32 %v6778_v44 }
 0x99a   : > { %v6781_v45 = vpop.xlane.xlu0 %6780 }
 0x99b   : > { %10059 = vrcp.f32 %v6781_v45 }
 0x99e   : > { %v6787_v46 = vpop.xlane.xlu0 %6786 }
 0x99f   : > { %10061 = vrcp.f32 %v6787_v46  ;;  %v6784_v47 = vpop.xlane.xlu1 %6783 }
 0x9a0   : > { %10063 = vrcp.f32 %v6784_v47 }
 0x9a1   : > { %v10058_v48 = vpop.eup %10057 }
 0x9a2   : > { %v6804_v49 = vmul.f32 %v10058_v48, %v10042_v11 }
 0x9a4   : > { %v6812_v51 = vpack.c.bf16 %v6804_v49, %v6804_v49 }
 0x9a5   : > { %v10060_v52 = vpop.eup %10059 }
 0x9a6   : > { %v6805_v53 = vmul.f32 %v10060_v52, %v10044_v18  ;;  %v6793_v54 = vpop.xlane.xlu0 %6792  ;;  %9629 = vmatmul.mubr.msk.bf16.vlgmr.msra.gmra.mrb[16].mxu0 %vm6721_vm5, %v6812_v51 }
 0x9a7   : > { %10065 = vrcp.f32 %v6793_v54  ;;  %v6790_v56 = vpop.xlane.xlu1 %6789  ;;  %9640 = vmatprep.mubr.msk.bf16.mxu0 %vm10715_vm2, %v10712_v3 }
 0x9a8   : > { %10067 = vrcp.f32 %v6790_v56  ;;  %v6813_v50 = vpack.c.bf16 %v6805_v53, %v6805_v53 }
 0x9a9   : > { %v10062_v57 = vpop.eup %10061 }
 0x9aa   : > { %v10064_v60 = vpop.eup %10063  ;;  %v9966_v62 = vpop.permute.xlu0 %9965  ;;  %9635 = vmatmul.mubr.msk.bf16.vlgmr.msra.gmra.mrb[28].mxu1 %vm6721_vm5, %v6813_v50  ;;  %v6807_v55 = vmul.f32 %v10062_v57, %v13115_v21 }
 0x9ab   : > { %v9968_v63 = vunpack.i.h.bf16 %v9966_v62  ;;  %v9967_v0 = vunpack.i.l.bf16 %v9966_v62  ;;  %v9971_v1 = vpop.permute.xlu1 %9970  ;;  %9646 = vmatprep.mubr.msk.bf16.mxu1 %vm10715_vm2, %v10712_v3  ;;  %v6806_v5 = vmul.f32 %v10064_v60, %v13117_v22 }
 0x9ac   : > { %v9973_v2 = vunpack.i.h.bf16 %v9971_v1  ;;  %v9972_v4 = vunpack.i.l.bf16 %v9971_v1  ;;  %v6815_v15 = vpack.c.bf16 %v6807_v55, %v6807_v55 }
 0x9ad   : > { %v6303_v6 = vpack.c.bf16 %v9968_v63, %v9968_v63  ;;  %v6302_v7 = vpack.c.bf16 %v9967_v0, %v9967_v0  ;;  %v6814_v14 = vpack.c.bf16 %v6806_v5, %v6806_v5 }
 0x9ae   : > { %v6305_v8 = vpack.c.bf16 %v9973_v2, %v9973_v2  ;;  %v6304_v9 = vpack.c.bf16 %v9972_v4, %v9972_v4 }
 0x9af   : > { %v7007_v11 = vsel %vm6821_vm4, %v6302_v7, 0  ;;  %v7053_v12 = vsel %vm6821_vm4, %v6303_v6, 0 }
 0x9b0   : > { %9639 = vmatpush3.bf16.msra.mxu0 %v7007_v11  ;;  %9645 = vmatpush3.bf16.msra.mxu1 %v7053_v12  ;;  %v7099_v18 = vsel %vm6821_vm4, %v6304_v9, 0  ;;  %v7145_v17 = vsel %vm6821_vm4, %v6305_v8, 0 }
 0x9b1   : > { %v10066_v13 = vpop.eup %10065  ;;  %9650 = vmatprep.subr.bf16.mxu0 %v10712_v3  ;;  %9656 = vmatprep.subr.bf16.mxu1 %v10712_v3 }
 0x9b2   : > { %v10068_v16 = vpop.eup %10067  ;;  %v6809_v19 = vmul.f32 %v10066_v13, %v13123_v25 }
 0x9b3   : > { %9641 = vmatmul.mubr.msk.bf16.vlgmr.msra.gmra.mrb[20].mxu0 %vm6721_vm5, %v6814_v14  ;;  %9647 = vmatmul.mubr.msk.bf16.vlgmr.msra.gmra.mrb[32].mxu1 %vm6721_vm5, %v6815_v15  ;;  %v6808_v20 = vmul.f32 %v10068_v16, %v13125_v26 }
 0x9b4   : > { %9651 = vmatpush3.bf16.msra.mxu0 %v7099_v18  ;;  %9657 = vmatpush3.bf16.msra.mxu1 %v7145_v17  ;;  %v6817_v22 = vpack.c.bf16 %v6809_v19, %v6809_v19  ;;  %v9345_v18 = vld [vmem:[%s13510_s0] ss:$0 sm:$0xff] }
 0x9b5   : > { %9652 = vmatprep.mubr.msk.bf16.mxu0 %vm10715_vm2, %v10712_v3  ;;  %9658 = vmatprep.mubr.msk.bf16.mxu1 %vm10715_vm2, %v10712_v3  ;;  %v6816_v21 = vpack.c.bf16 %v6808_v20, %v6808_v20 }
 0x9b6   : > { %9662 = vmatprep.subr.bf16.mxu0 %v10712_v3 }
 0x9bb   : > { %9653 = vmatmul.mubr.msk.bf16.vlgmr.msra.gmra.mrb[24].mxu0 %vm6721_vm5, %v6816_v21  ;;  %9659 = vmatmul.mubr.msk.bf16.vlgmr.msra.gmra.mrb[36].mxu1 %vm6721_vm5, %v6817_v22  ;;  %v10081_v22 = vld [vmem:[#allocation2] sm:$0xff] }
 0x9bc   : > { %9670 = vmatprep.mubr.msk.bf16.mxu0 %vm10715_vm2, %v10712_v3  ;;  %7425 = vmatprep.mubr.bf16.mxu1 %v10711_v39 }
 0x9bd   : > { %9663 = vmatpush3.bf16.msra.mxu0 %v10001_v31 }
 0x9be   : > { %9664 = vmatprep.subr.bf16.mxu0 %v10712_v3 }
 0x9c1   : > { %9665 = vmatpush3.bf16.msra.mxu0 %v10002_v36 }
 0x9c2   : > { %9666 = vmatprep.subr.bf16.mxu0 %v10712_v3 }
 0x9c5   : > { %9667 = vmatpush3.bf16.msra.mxu0 %v10003_v40  ;;  %v10005_v40 = vld [vmem:[%s11436_s1] ss:$8 sps:$4 sm:$0xff]  }
 0x9c6   : > { %9668 = vmatprep.subr.bf16.mxu0 %v10712_v3 }
 0x9c9   : > { %9669 = vmatpush3.bf16.msra.mxu0 %v10004_v42  ;;  %v10008_v42 = vld [vmem:[%s11436_s1 + $0x10] ss:$8 sps:$4 sm:$0xff]  }
 0xa12   : > { %v6905_v23 = vpop.f32.mrb[24].mxu1 }
 0xa13   : > { %v9624_v24 = vpop.f32.mrb[25].mxu1 }
 0xa14   : > { %v6908_v25 = vpop.f32.mrb[26].mxu1 }
 0xa15   : > { %v9625_v26 = vpop.f32.mrb[27].mxu1 }
 0xa16   : > { %v10082_v26 = vld [vmem:[#allocation2 + $0x8] sm:$0xff] }
 0xa20   : > { %v6859_v27 = vpop.f32.mrb[12].mxu0 }
 0xa21   : > { %v9618_v28 = vpop.f32.mrb[13].mxu0 }
 0xa22   : > { %v6862_v29 = vpop.f32.mrb[14].mxu0 }
 0xa23   : > { %v9619_v30 = vpop.f32.mrb[15].mxu0 }
 0xa79   : > { %v6951_v32 = vpop.f32.mrb[16].mxu0 }
 0xa7a   : > { %v9630_v33 = vpop.f32.mrb[17].mxu0 }
 0xa7b   : > { %v6954_v34 = vpop.f32.mrb[18].mxu0 }
 0xa7c   : > { %v9631_v35 = vpop.f32.mrb[19].mxu0 }
 0xa7d   : > { %v6997_v39 = vpop.f32.mrb[28].mxu1 }
 0xa7e   : > { %v9974_v37 = vpack.i.bf16 %v6997_v39, %v6951_v32  ;;  %v9636_v10 = vpop.f32.mrb[29].mxu1 }
 0xa7f   : > { %v7000_v38 = vpop.f32.mrb[30].mxu1 }
 0xa80   : > { %v9637_v41 = vpop.f32.mrb[31].mxu1  ;;  %9975 = vrot.lane.b32.xlu1 %v9974_v37, %s10718_s14  ;;  %v10007_v38 = vld [vmem:[%s11436_s1 + $0x4] ss:$8 sps:$4 sm:$0xff]  }
 0xa81   : > { %7393 = vmatprep.subr.bf16.mxu1 %v10007_v38  ;;  %v10010_v41 = vld [vmem:[%s11436_s1 + $0x14] ss:$8 sps:$4 sm:$0xff]  }
 0xa82   : > { %7394 = vmatpush1.bf16.msra.mxu1 %v10005_v40 }
 0xa83   : > { %7395 = vmatprep.subr.bf16.mxu1 %v10010_v41 }
 0xa86   : > { %v7043_v43 = vpop.f32.mrb[20].mxu0  ;;  %v7089_v44 = vpop.f32.mrb[32].mxu1  ;;  %7396 = vmatpush1.bf16.msra.mxu1 %v10008_v42 }
 0xa87   : > { %v9979_v45 = vpack.i.bf16 %v7089_v44, %v7043_v43  ;;  %v9642_v46 = vpop.f32.mrb[21].mxu0  ;;  %v9648_v47 = vpop.f32.mrb[33].mxu1  ;;  %v10013_v43 = vld [vmem:[%s11436_s1 + $0x24] ss:$8 sps:$4 sm:$0xff]   ;;  %v10011_v44 = vld [vmem:[%s11436_s1 + $0x20] ss:$8 sps:$4 sm:$0xff]  }
 0xa88   : > { %v7046_v48 = vpop.f32.mrb[22].mxu0  ;;  %v7092_v49 = vpop.f32.mrb[34].mxu1  ;;  %7397 = vmatprep.subr.bf16.mxu1 %v10013_v43  ;;  %v10016_v46 = vld [vmem:[%s11436_s1 + $0x34] ss:$8 sps:$4 sm:$0xff]  }
 0xa89   : > { %v9649_v51 = vpop.f32.mrb[35].mxu1  ;;  %9980 = vrot.lane.b32.xlu1 %v9979_v45, %s10719_s21  ;;  %v9643_v52 = vpop.f32.mrb[23].mxu0  ;;  %v10014_v45 = vld [vmem:[%s11436_s1 + $0x30] ss:$8 sps:$4 sm:$0xff]   ;;  %s13512_s1 = scalar_lea.vmem [#allocation18], %s11406_s4 }
 0xa8a   : > { %7398 = vmatpush1.bf16.msra.mxu1 %v10011_v44 }
 0xa8b   : > { %7399 = vmatprep.subr.bf16.mxu1 %v10016_v46 }
 0xa8e   : > { %v7135_v53 = vpop.f32.mrb[24].mxu0  ;;  %v7181_v54 = vpop.f32.mrb[36].mxu1  ;;  %7400 = vmatpush1.bf16.msra.mxu1 %v10014_v45 }
 0xa8f   : > { %v9984_v56 = vpack.i.bf16 %v7181_v54, %v7135_v53  ;;  %v9654_v50 = vpop.f32.mrb[25].mxu0  ;;  %v9660_v57 = vpop.f32.mrb[37].mxu1 }
 0xa90   : > { %v7138_v60 = vpop.f32.mrb[26].mxu0  ;;  %v7184_v3 = vpop.f32.mrb[38].mxu1  ;;  %v9351_v50 = vld [vmem:[%s13511_s12] ss:$0 sm:$0xff] }
 0xa91   : > { %v9661_v62 = vpop.f32.mrb[39].mxu1  ;;  %9985 = vrot.lane.b32.xlu0 %v9984_v56, %s10720_s10  ;;  %v9655_v63 = vpop.f32.mrb[27].mxu0 }
 0xa92   : > { %v9352_v62 = vld [vmem:[%s13512_s1] ss:$0 sm:$0xff] }
 0xaf2   : > { %v9976_v0 = vpop.permute.xlu1 %9975 }
 0xaf3   : > { %v9978_v2 = vunpack.i.h.bf16 %v9976_v0  ;;  %v9977_v4 = vunpack.i.l.bf16 %v9976_v0 }
 0xaf5   : > { %v7212_v7 = vsel %vm6309_vm3, %v6905_v23, %v9978_v2  ;;  %v7211_v8 = vsel %vm6309_vm3, %v6859_v27, %v9977_v4  ;;  %v10017_v4 = vld [vmem:[%s11467_s30 + $0x40] sm:$0xff]  }
 0xaf6   : > { %9500 = vmatprep.subr.bf16.mxu0 %v10017_v4 }
 0xafb   : > { %v9981_v1 = vpop.permute.xlu1 %9980 }
 0xafc   : > { %v9983_v55 = vunpack.i.h.bf16 %v9981_v1  ;;  %v9982_v5 = vunpack.i.l.bf16 %v9981_v1 }
 0xafe   : > { %v7215_v12 = vsel %vm7213_vm6, %v7212_v7, %v9983_v55  ;;  %v7214_v13 = vsel %vm7213_vm6, %v7211_v8, %v9982_v5  ;;  %v10018_v55 = vld [vmem:[%s11467_s30] sm:$0xff]   ;;  %v10019_v5 = vld [vmem:[%s11467_s30 + $0x48] sm:$0xff]   ;;  %v10021_v7 = vld [vmem:[%s11467_s30 + $0x50] sm:$0xff]  }
 0xaff   : > { %v10022_v8 = vld [vmem:[%s11467_s30 + $0x10] sm:$0xff]  }
 0xb03   : > { %v9986_v6 = vpop.permute.xlu0 %9985 }
 0xb04   : > { %v9988_v9 = vunpack.i.h.bf16 %v9986_v6  ;;  %v9987_v11 = vunpack.i.l.bf16 %v9986_v6  ;;  %v10020_v6 = vld [vmem:[%s11467_s30 + $0x8] sm:$0xff]  }
 0xb06   : > { %v7218_v14 = vsel %vm7216_vm7, %v7215_v12, %v9988_v9  ;;  %v7217_v15 = vsel %vm7216_vm7, %v7214_v13, %v9987_v11  ;;  %v10023_v9 = vld [vmem:[%s11467_s30 + $0x58] sm:$0xff]   ;;  %v10025_v12 = vld [vmem:[%s11467_s30 + $0x60] sm:$0xff]  }
 0xb07   : > { %v7219_v16 = vpack.c.bf16 %v7218_v14, %v7217_v15  ;;  %v10024_v11 = vld [vmem:[%s11467_s30 + $0x18] sm:$0xff]   ;;  %v10026_v13 = vld [vmem:[%s11467_s30 + $0x20] sm:$0xff]   ;;  %v10027_v14 = vld [vmem:[%s11467_s30 + $0x68] sm:$0xff]  }
 0xb08   : > { %v10028_v15 = vld [vmem:[%s11467_s30 + $0x28] sm:$0xff]  }
 0xb09   : > { %9671 = vmatmul.mubr.msk.bf16.vlgmr.msra.gmra.mrb[28].mxu0 %vm6108_vm1, %v7219_v16  ;;  %v10029_v16 = vld [vmem:[%s11467_s30 + $0x70] sm:$0xff]  }
 0xb0a   : > { %9501 = vmatpush3.bf16.msra.mxu0 %v10018_v55 }
 0xb0b   : > { %9502 = vmatprep.subr.bf16.mxu0 %v10019_v5 }
 0xb0e   : > { %9503 = vmatpush3.bf16.msra.mxu0 %v10020_v6 }
 0xb0f   : > { %9504 = vmatprep.subr.bf16.mxu0 %v10021_v7 }
 0xb12   : > { %9505 = vmatpush3.bf16.msra.mxu0 %v10022_v8 }
 0xb13   : > { %9506 = vmatprep.subr.bf16.mxu0 %v10023_v9 }
 0xb16   : > { %9507 = vmatpush3.bf16.msra.mxu0 %v10024_v11 }
 0xb17   : > { %9508 = vmatprep.subr.bf16.mxu0 %v10025_v12 }
 0xb1a   : > { %9509 = vmatpush3.bf16.msra.mxu0 %v10026_v13 }
 0xb1b   : > { %9510 = vmatprep.subr.bf16.mxu0 %v10027_v14 }
 0xb1e   : > { %9511 = vmatpush3.bf16.msra.mxu0 %v10028_v15 }
 0xb1f   : > { %9512 = vmatprep.subr.bf16.mxu0 %v10029_v16 }
 0xbdc   : > { %v7287_v17 = vpop.f32.mrb[28].mxu0 }
 0xbdd   : > { %v7288_v19 = vadd.f32 %v9345_v18, %v7287_v17  ;;  %v9672_v20 = vpop.f32.mrb[29].mxu0  ;;  %v10031_v17 = vld [vmem:[%s11467_s30 + $0x78] sm:$0xff]  }
 0xbde   : > { %v7290_v21 = vpop.f32.mrb[30].mxu0  ;;  %v6074_v20 = vld [vmem:[%s11438_s9] sm:$0x3] }
 0xbdf   : > { %v13186_v24 = vadd.f32 %v10081_v22, %v7288_v19  ;;  %v7291_v23 = vadd.f32 %v9345_v18, %v7290_v21  ;;  %v9673_v25 = vpop.f32.mrb[31].mxu0  ;;  %v10030_v18 = vld [vmem:[%s11467_s30 + $0x30] sm:$0xff]   ;;  %v10032_v19 = vld [vmem:[%s11467_s30 + $0x38] sm:$0xff]   ;;  %v7343_v21 = vrot.slane %v6074_v20, %v6156_v59  ;;  %v7347_v22 = vrot.slane %v6074_v20, %v6160_v61  ;;  %s13513_s30 = scalar_lea.vmem [#allocation23], %s11406_s4 }
 0xbe0   : > { %9513 = vmatpush3.bf16.msra.mxu0 %v10030_v18  ;;  %v9362_v7 = vld [vmem:[%s13513_s30] ss:$0 sm:$0xff] }
 0xbe1   : > { %v13188_v27 = vadd.f32 %v10082_v26, %v7291_v23  ;;  %v7296_v28 = vsel %vm6108_vm1, %v13186_v24, 0.0  ;;  %9514 = vmatprep.subr.bf16.mxu0 %v10031_v17 }
 0xbe2   : > { %7297 = vadd.xlane.f32.xlu1 %v7296_v28 }
 0xbe3   : > { %v7299_v29 = vsel %vm6108_vm1, %v13188_v27, 0.0 }
 0xbe4   : > { %7300 = vadd.xlane.f32.xlu0 %v7299_v29  ;;  %9515 = vmatpush3.bf16.msra.mxu0 %v10032_v19 }
 0xc6f   : > { %v7298_v30 = vpop.xlane.xlu1 %7297 }
 0xc70   : > { %v7302_v31 = vmul.f32 0.015625, %v7298_v30 }
 0xc71   : > { %v7301_v32 = vpop.xlane.xlu0 %7300 }
 0xc72   : > { %v7304_v33 = vsub.f32 %v13186_v24, %v7302_v31  ;;  %v7303_v34 = vmul.f32 0.015625, %v7301_v32 }
 0xc74   : > { %v7305_v35 = vsub.f32 %v13188_v27, %v7303_v34  ;;  %v7306_v39 = vmul.f32 %v7304_v33, %v7304_v33 }
 0xc76   : > { %v7308_v36 = vsel %vm6108_vm1, %v7306_v39, 0.0  ;;  %v7307_v37 = vmul.f32 %v7305_v35, %v7305_v35 }
 0xc77   : > { %7309 = vadd.xlane.f32.xlu0 %v7308_v36 }
 0xc78   : > { %v7311_v10 = vsel %vm6108_vm1, %v7307_v37, 0.0 }
 0xc7b   : > { %7312 = vadd.xlane.f32.xlu0 %v7311_v10 }
 0xd04   : > { %v7310_v47 = vpop.xlane.xlu0 %7309 }
 0xd05   : > { %v7314_v48 = vmul.f32 0.015625, %v7310_v47 }
 0xd07   : > { %v7316_v49 = vadd.f32 1e-06, %v7314_v48 }
 0xd08   : > { %v7313_v51 = vpop.xlane.xlu0 %7312 }
 0xd09   : > { %10069 = vrsqrt.f32 %v7316_v49  ;;  %v7315_v52 = vmul.f32 0.015625, %v7313_v51 }
 0xd0b   : > { %v7317_v53 = vadd.f32 1e-06, %v7315_v52 }
 0xd0d   : > { %10071 = vrsqrt.f32 %v7317_v53 }
 0xd13   : > { %v10070_v54 = vpop.eup %10069 }
 0xd14   : > { %v7320_v56 = vmul.f32 %v10070_v54, %v7304_v33 }
 0xd16   : > { %v7328_v60 = vmul.f32 %v9351_v50, %v7320_v56 }
 0xd17   : > { %v10072_v57 = vpop.eup %10071 }
 0xd18   : > { %v7321_v3 = vmul.f32 %v10072_v57, %v7305_v35  ;;  %v7336_v0 = vadd.f32 %v9352_v62, %v7328_v60 }
 0xd1a   : > { %v7329_v63 = vmul.f32 %v9351_v50, %v7321_v3 }
 0xd1c   : > { %v7337_v1 = vadd.f32 %v9352_v62, %v7329_v63 }
 0xd1e   : > { %v7338_v2 = vpack.c.bf16 %v7337_v1, %v7336_v0 }
 0xd20   : > { %9361 = vmatmul.mubr.msk.bf16.vlgmr.msra.gmra.mrb[40].mxu1 %vm6108_vm1, %v7338_v2 }
 0xdf3   : > { %v7427_v23 = vpop.f32.mrb[40].mxu1 }
 0xdf4   : > { %v7428_v25 = vadd.f32 %v7427_v23, %v7343_v21  ;;  %v7429_v26 = vpop.f32.mrb[41].mxu1 }
 0xdf5   : > { %v7430_v28 = vadd.f32 %v7429_v26, %v7347_v22  ;;  %v7431_v29 = vpop.f32.mrb[42].mxu1 }
 0xdf6   : > { %v7440_v30 = vmul.f32 0.044715, %v7428_v25  ;;  %v7432_v31 = vadd.f32 %v7431_v29, %v7343_v21  ;;  %v7433_v32 = vpop.f32.mrb[43].mxu1  ;;  %v7436_v50 = vmul.f32 0.5, %v7428_v25 }
 0xdf7   : > { %v7441_v33 = vmul.f32 0.044715, %v7430_v28  ;;  %v7434_v34 = vadd.f32 %v7433_v32, %v7347_v22  ;;  %v7437_v3 = vmul.f32 0.5, %v7430_v28 }
 0xdf8   : > { %v7444_v35 = vmul.f32 %v7440_v30, %v7428_v25  ;;  %v7442_v39 = vmul.f32 0.044715, %v7432_v31  ;;  %v7438_v57 = vmul.f32 0.5, %v7432_v31 }
 0xdf9   : > { %v7445_v36 = vmul.f32 %v7441_v33, %v7430_v28  ;;  %v7443_v37 = vmul.f32 0.044715, %v7434_v34  ;;  %v7439_v62 = vmul.f32 0.5, %v7434_v34 }
 0xdfa   : > { %v7448_v10 = vmul.f32 %v7444_v35, %v7428_v25  ;;  %v7446_v38 = vmul.f32 %v7442_v39, %v7432_v31 }
 0xdfb   : > { %v7449_v59 = vmul.f32 %v7445_v36, %v7430_v28  ;;  %v7447_v40 = vmul.f32 %v7443_v37, %v7434_v34 }
 0xdfc   : > { %v7452_v58 = vadd.f32 %v7448_v10, %v7428_v25  ;;  %v7450_v61 = vmul.f32 %v7446_v38, %v7432_v31 }
 0xdfd   : > { %v7451_v41 = vmul.f32 %v7447_v40, %v7434_v34  ;;  %v7453_v42 = vadd.f32 %v7449_v59, %v7430_v28 }
 0xdfe   : > { %v7456_v43 = vmul.f32 0.7978846, %v7452_v58  ;;  %v7454_v44 = vadd.f32 %v7450_v61, %v7432_v31 }
 0xdff   : > { %v7455_v45 = vadd.f32 %v7451_v41, %v7434_v34  ;;  %v7457_v46 = vmul.f32 0.7978846, %v7453_v42 }
 0xe00   : > { %10073 = vtanh.f32 %v7456_v43  ;;  %v7458_v47 = vmul.f32 0.7978846, %v7454_v44 }
 0xe01   : > { %v7459_v48 = vmul.f32 0.7978846, %v7455_v45  ;;  %10075 = vtanh.f32 %v7457_v46 }
 0xe02   : > { %10077 = vtanh.f32 %v7458_v47 }
 0xe03   : > { %10079 = vtanh.f32 %v7459_v48 }
 0xe0a   : > { %v10074_v49 = vpop.eup %10073 }
 0xe0b   : > { %v10076_v51 = vpop.eup %10075  ;;  %v7464_v52 = vadd.f32 1.0, %v10074_v49 }
 0xe0c   : > { %v10078_v53 = vpop.eup %10077  ;;  %v7465_v54 = vadd.f32 1.0, %v10076_v51 }
 0xe0d   : > { %v10080_v56 = vpop.eup %10079  ;;  %v7466_v60 = vadd.f32 1.0, %v10078_v53  ;;  %v7468_v0 = vmul.f32 %v7464_v52, %v7436_v50 }
 0xe0e   : > { %v7467_v63 = vadd.f32 1.0, %v10080_v56  ;;  %v7469_v2 = vmul.f32 %v7465_v54, %v7437_v3 }
 0xe0f   : > { %v7470_v1 = vmul.f32 %v7466_v60, %v7438_v57 }
 0xe10   : > { %v7471_v4 = vmul.f32 %v7467_v63, %v7439_v62 }
 0xe11   : > { %v7472_v55 = vpack.c.bf16 %v7470_v1, %v7468_v0 }
 0xe12   : > { %v7473_v5 = vpack.c.bf16 %v7471_v4, %v7469_v2 }
 0xe14   : > { %7608 = vmatprep.mubr.bf16.mxu0 %v7473_v5 }
 0xe15   : > { %7609 = vmatmul.mubr.bf16.vlgmr.msra.gmra.mrb[32].mxu0 %v7472_v55 }
 0xee8   : > { %v9516_v6 = vpop.f32.mrb[32].mxu0 }
 0xee9   : > { %v9517_v8 = vpop.f32.mrb[33].mxu0 }
 0xeea   : > { %v9518_v9 = vadd.f32 %v9517_v8, %v9516_v6  ;;  %v9519_v11 = vpop.f32.mrb[34].mxu0 }
 0xeeb   : > { %v9520_v12 = vpop.f32.mrb[35].mxu0 }
 0xeec   : > { %v7611_v13 = vadd.f32 %v9518_v9, %v9362_v7  ;;  %v9521_v14 = vadd.f32 %v9520_v12, %v9519_v11 }
 0xeee   : > { %v7617_v15 = vadd.f32 %v7611_v13, %v13186_v24  ;;  %v7614_v16 = vadd.f32 %v9521_v14, %v9362_v7 }
 0xef0   : > { %7619 = vst.msk [vmem:[#allocation2] sm:$0xff] %vm6108_vm1, %v7617_v15  ;;  %v7618_v18 = vadd.f32 %v7614_v16, %v13188_v27 }
 0xef2   : > { %7620 = vst.msk [vmem:[#allocation2 + $0x8] sm:$0xff] %vm6108_vm1, %v7618_v18 }
 0xef3 PF: > { %s13514_s9 = sld [smem:[#allocation54_spill]] }
 0xef9   : > { %p9379_p8 = scmp.ne.s32.totalorder %s13514_s9, 2 }
 0xefb   : > { %7624 = sbr.rel (%p9379_p8) target bundleno = 5029 (0x13a5), region = 244 }
 0xf02   : > { %10657 = dma.done.wait [#allocation6], 4096 }
 0xf03   : > { %10658 = vsyncadd [#allocation6], 4294963200 }
 0xf04   : > { %10659 = dma.done.wait [#allocation6 + $0x1], 32768 }
 0xf05   : > { %10660 = vsyncadd [#allocation6 + $0x1], 4294934528 }
 0xf06   : > { %10661 = dma.done.wait [#allocation6 + $0x2], 4096 }
 0xf07   : > { %10662 = vsyncadd [#allocation6 + $0x2], 4294963200  ;;  %vm7643_vm8 = vcmask 523264   ;;  %v7639_v17 = vld [vmem:[#allocation2] sm:$0xff]  ;;  %v7640_v24 = vld [vmem:[#allocation2 + $0x8] sm:$0xff]  ;;  %v10721_v44 = vmov 0  }
 0xf08   : > { %v7644_v19 = vsel %vm7643_vm8, %v7639_v17, 0.0  ;;  %v7647_v27 = vsel %vm7643_vm8, %v7640_v24, 0.0  ;;  %v7689_v32 = vld [vmem:[#allocation3 + $0x8] sm:$0xff]  ;;  %v7691_v33 = vld [vmem:[#allocation3 + $0x18] sm:$0xff]  ;;  %v7688_v34 = vld [vmem:[#allocation3] sm:$0xff]  ;;  %7797 = vmatprep.mubr.bf16.mxu0 %v10721_v44  ;;  %7840 = vmatprep.mubr.bf16.mxu1 %v10721_v44  ;;  %s13515_s6 = sld [smem:[#allocation75_spill]] }
 0xf09   : > { %7645 = vadd.xlane.f32.xlu0 %v7644_v19  ;;  %7765 = vmatprep.subr.bf16.mxu0 %v7689_v32  ;;  %v7690_v35 = vld [vmem:[#allocation3 + $0x10] sm:$0xff]  ;;  %v7697_v39 = vld [vmem:[#allocation3 + $0x48] sm:$0xff]  ;;  %v7699_v36 = vld [vmem:[#allocation3 + $0x58] sm:$0xff]  ;;  %s13516_s23 = sld [smem:[#allocation81_spill]] }
 0xf0a   : > { %7808 = vmatprep.subr.bf16.mxu1 %v7691_v33  ;;  %7766 = vmatpush1.bf16.msra.mxu0 %v7688_v34  ;;  %v7696_v37 = vld [vmem:[#allocation3 + $0x40] sm:$0xff]  ;;  %v7698_v10 = vld [vmem:[#allocation3 + $0x50] sm:$0xff]  ;;  %v7705_v38 = vld [vmem:[#allocation3 + $0x88] sm:$0xff] }
 0xf0b   : > { %7809 = vmatpush1.bf16.msra.mxu1 %v7690_v35  ;;  %7767 = vmatprep.subr.bf16.mxu0 %v7697_v39  ;;  %v7707_v59 = vld [vmem:[#allocation3 + $0x98] sm:$0xff]  ;;  %v7704_v40 = vld [vmem:[#allocation3 + $0x80] sm:$0xff]  ;;  %v7706_v58 = vld [vmem:[#allocation3 + $0x90] sm:$0xff] }
 0xf0c   : > { %7810 = vmatprep.subr.bf16.mxu1 %v7699_v36  ;;  %v7713_v61 = vld [vmem:[#allocation3 + $0xc8] sm:$0xff]  ;;  %v7715_v41 = vld [vmem:[#allocation3 + $0xd8] sm:$0xff]  ;;  %v7712_v42 = vld [vmem:[#allocation3 + $0xc0] sm:$0xff] }
 0xf0d   : > { %7648 = vadd.xlane.f32.xlu0 %v7647_v27  ;;  %v7714_v43 = vld [vmem:[#allocation3 + $0xd0] sm:$0xff]  ;;  %v7693_v45 = vld [vmem:[#allocation3 + $0x28] sm:$0xff]  ;;  %v7695_v46 = vld [vmem:[#allocation3 + $0x38] sm:$0xff] }
 0xf0e   : > { %7768 = vmatpush1.bf16.msra.mxu0 %v7696_v37  ;;  %v9380_v50 = vld [vmem:[#allocation24] ss:$0 sm:$0xff]  ;;  %v9381_v62 = vld [vmem:[#allocation26] ss:$0 sm:$0xff]  ;;  %v7692_v4 = vld [vmem:[#allocation3 + $0x20] sm:$0xff] }
 0xf0f   : > { %7811 = vmatpush1.bf16.msra.mxu1 %v7698_v10  ;;  %7769 = vmatprep.subr.bf16.mxu0 %v7705_v38  ;;  %v7694_v55 = vld [vmem:[#allocation3 + $0x30] sm:$0xff]  ;;  %v7701_v5 = vld [vmem:[#allocation3 + $0x68] sm:$0xff]  ;;  %v7703_v6 = vld [vmem:[#allocation3 + $0x78] sm:$0xff] }
 0xf10   : > { %7812 = vmatprep.subr.bf16.mxu1 %v7707_v59  ;;  %v7700_v7 = vld [vmem:[#allocation3 + $0x60] sm:$0xff]  ;;  %v7702_v8 = vld [vmem:[#allocation3 + $0x70] sm:$0xff]  ;;  %v7709_v9 = vld [vmem:[#allocation3 + $0xa8] sm:$0xff] }
 0xf11   : > { %v7711_v11 = vld [vmem:[#allocation3 + $0xb8] sm:$0xff]  ;;  %v7708_v12 = vld [vmem:[#allocation3 + $0xa0] sm:$0xff]  ;;  %v7710_v13 = vld [vmem:[#allocation3 + $0xb0] sm:$0xff] }
 0xf12   : > { %7770 = vmatpush1.bf16.msra.mxu0 %v7704_v40  ;;  %v7717_v14 = vld [vmem:[#allocation3 + $0xe8] sm:$0xff]  ;;  %v7719_v15 = vld [vmem:[#allocation3 + $0xf8] sm:$0xff]  ;;  %v7716_v16 = vld [vmem:[#allocation3 + $0xe0] sm:$0xff] }
 0xf13   : > { %7813 = vmatpush1.bf16.msra.mxu1 %v7706_v58  ;;  %7771 = vmatprep.subr.bf16.mxu0 %v7713_v61  ;;  %v7718_v18 = vld [vmem:[#allocation3 + $0xf0] sm:$0xff]  ;;  %v8077_v19 = vld [vmem:[#allocation4] sm:$0xff]  ;;  %v8094_v34 = vld [vmem:[#allocation4 + $0x88] sm:$0xff] }
 0xf14   : > { %7814 = vmatprep.subr.bf16.mxu1 %v7715_v41  ;;  %v8079_v27 = vld [vmem:[#allocation4 + $0x10] sm:$0xff]  ;;  %v8089_v32 = vld [vmem:[#allocation4 + $0x60] sm:$0xff]  ;;  %v8096_v35 = vld [vmem:[#allocation4 + $0x98] sm:$0xff] }
 0xf15   : > { %v8091_v33 = vld [vmem:[#allocation4 + $0x70] sm:$0xff]  ;;  %v8093_v39 = vld [vmem:[#allocation4 + $0x80] sm:$0xff]  ;;  %v8098_v37 = vld [vmem:[#allocation4 + $0xa8] sm:$0xff] }
 0xf16   : > { %7772 = vmatpush1.bf16.msra.mxu0 %v7712_v42  ;;  %v8095_v36 = vld [vmem:[#allocation4 + $0x90] sm:$0xff]  ;;  %v8100_v10 = vld [vmem:[#allocation4 + $0xb8] sm:$0xff]  ;;  %v8097_v38 = vld [vmem:[#allocation4 + $0xa0] sm:$0xff] }
 0xf17   : > { %7815 = vmatpush1.bf16.msra.mxu1 %v7714_v43  ;;  %7851 = vmatprep.subr.bf16.mxu0 %v7693_v45  ;;  %v8099_v59 = vld [vmem:[#allocation4 + $0xb0] sm:$0xff]  ;;  %v8102_v40 = vld [vmem:[#allocation4 + $0xc8] sm:$0xff]  ;;  %v8104_v58 = vld [vmem:[#allocation4 + $0xd8] sm:$0xff] }
 0xf18   : > { %7894 = vmatprep.subr.bf16.mxu1 %v7695_v46  ;;  %v8101_v61 = vld [vmem:[#allocation4 + $0xc0] sm:$0xff]  ;;  %v8103_v41 = vld [vmem:[#allocation4 + $0xd0] sm:$0xff]  ;;  %v8106_v42 = vld [vmem:[#allocation4 + $0xe8] sm:$0xff] }
 0xf19   : > { %v8108_v43 = vld [vmem:[#allocation4 + $0xf8] sm:$0xff]  ;;  %v8107_v45 = vld [vmem:[#allocation4 + $0xf0] sm:$0xff]  ;;  %v8110_v46 = vld [vmem:[#allocation4 + $0x108] sm:$0xff] }
 0xf96   : > { %v7646_v20 = vpop.xlane.xlu0 %7645 }
 0xf97   : > { %v7651_v21 = vmul.f32 0.015625, %v7646_v20  ;;  %v8082_v20 = vld [vmem:[#allocation4 + $0x28] sm:$0xff] }
 0xf99   : > { %v7653_v22 = vsub.f32 %v7639_v17, %v7651_v21  ;;  %v8078_v17 = vld [vmem:[#allocation4 + $0x8] sm:$0xff]  ;;  %v8084_v21 = vld [vmem:[#allocation4 + $0x38] sm:$0xff] }
 0xf9a   : > { %v7649_v23 = vpop.xlane.xlu0 %7648 }
 0xf9b   : > { %v7652_v25 = vmul.f32 0.015625, %v7649_v23  ;;  %v7655_v26 = vmul.f32 %v7653_v22, %v7653_v22  ;;  %v8083_v23 = vld [vmem:[#allocation4 + $0x30] sm:$0xff] }
 0xf9d   : > { %v7654_v28 = vsub.f32 %v7640_v24, %v7652_v25  ;;  %v7657_v29 = vsel %vm7643_vm8, %v7655_v26, 0.0  ;;  %v8080_v24 = vld [vmem:[#allocation4 + $0x18] sm:$0xff]  ;;  %v8086_v25 = vld [vmem:[#allocation4 + $0x48] sm:$0xff] }
 0xf9e   : > { %7658 = vadd.xlane.f32.xlu1 %v7657_v29  ;;  %v8088_v26 = vld [vmem:[#allocation4 + $0x58] sm:$0xff]  ;;  %v8087_v29 = vld [vmem:[#allocation4 + $0x50] sm:$0xff] }
 0xf9f   : > { %v7656_v30 = vmul.f32 %v7654_v28, %v7654_v28 }
 0xfa1   : > { %v7660_v31 = vsel %vm7643_vm8, %v7656_v30, 0.0  ;;  %v8090_v30 = vld [vmem:[#allocation4 + $0x68] sm:$0xff] }
 0xfa2   : > { %7661 = vadd.xlane.f32.xlu1 %v7660_v31  ;;  %v8092_v31 = vld [vmem:[#allocation4 + $0x78] sm:$0xff] }
0x102b   : > { %v7659_v47 = vpop.xlane.xlu1 %7658 }
0x102c   : > { %v7663_v48 = vmul.f32 0.015625, %v7659_v47  ;;  %v8112_v47 = vld [vmem:[#allocation4 + $0x118] sm:$0xff] }
0x102e   : > { %v7665_v49 = vadd.f32 1e-06, %v7663_v48  ;;  %v8109_v48 = vld [vmem:[#allocation4 + $0x100] sm:$0xff] }
0x102f   : > { %v7662_v51 = vpop.xlane.xlu1 %7661 }
0x1030   : > { %10083 = vrsqrt.f32 %v7665_v49  ;;  %v7664_v52 = vmul.f32 0.015625, %v7662_v51  ;;  %v8111_v49 = vld [vmem:[#allocation4 + $0x110] sm:$0xff]  ;;  %v8114_v51 = vld [vmem:[#allocation4 + $0x128] sm:$0xff] }
0x1032   : > { %v7666_v53 = vadd.f32 1e-06, %v7664_v52  ;;  %v8116_v52 = vld [vmem:[#allocation4 + $0x138] sm:$0xff] }
0x1034   : > { %10085 = vrsqrt.f32 %v7666_v53  ;;  %v8113_v53 = vld [vmem:[#allocation4 + $0x120] sm:$0xff] }
0x103a   : > { %v10084_v54 = vpop.eup %10083 }
0x103b   : > { %v7669_v56 = vmul.f32 %v10084_v54, %v7653_v22  ;;  %v8081_v22 = vld [vmem:[#allocation4 + $0x20] sm:$0xff]  ;;  %v8115_v54 = vld [vmem:[#allocation4 + $0x130] sm:$0xff] }
0x103d   : > { %v7677_v3 = vmul.f32 %v9380_v50, %v7669_v56  ;;  %v8118_v56 = vld [vmem:[#allocation4 + $0x148] sm:$0xff] }
0x103e   : > { %v10086_v57 = vpop.eup %10085 }
0x103f   : > { %v7670_v60 = vmul.f32 %v10086_v57, %v7654_v28  ;;  %v7685_v0 = vadd.f32 %v9381_v62, %v7677_v3  ;;  %v8085_v28 = vld [vmem:[#allocation4 + $0x40] sm:$0xff]  ;;  %v8122_v3 = vld [vmem:[#allocation4 + $0x168] sm:$0xff] }
0x1040   : > { %v8117_v57 = vld [vmem:[#allocation4 + $0x140] sm:$0xff] }
0x1041   : > { %v7678_v63 = vmul.f32 %v9380_v50, %v7670_v60  ;;  %v8120_v50 = vld [vmem:[#allocation4 + $0x158] sm:$0xff]  ;;  %v8119_v60 = vld [vmem:[#allocation4 + $0x150] sm:$0xff] }
0x1043   : > { %v7686_v1 = vadd.f32 %v9381_v62, %v7678_v63  ;;  %v8124_v62 = vld [vmem:[#allocation4 + $0x178] sm:$0xff]  ;;  %v8121_v63 = vld [vmem:[#allocation4 + $0x160] sm:$0xff] }
0x1045   : > { %v7687_v2 = vpack.c.bf16 %v7686_v1, %v7685_v0  ;;  %v8123_v0 = vld [vmem:[#allocation4 + $0x170] sm:$0xff]  ;;  %v8126_v1 = vld [vmem:[#allocation4 + $0x188] sm:$0xff] }
0x1047   : > { %9382 = vmatmul.mubr.msk.bf16.vlgmr.msra.gmra.mrb[0].mxu0 %vm7643_vm8, %v7687_v2  ;;  %9383 = vmatmul.mubr.msk.bf16.vlgmr.msra.gmra.mrb[0].mxu1 %vm7643_vm8, %v7687_v2 }
0x1048   : > { %7852 = vmatpush1.bf16.msra.mxu0 %v7692_v4  ;;  %7895 = vmatpush1.bf16.msra.mxu1 %v7694_v55  ;;  %v8125_v4 = vld [vmem:[#allocation4 + $0x180] sm:$0xff]  ;;  %v8127_v55 = vld [vmem:[#allocation4 + $0x190] sm:$0xff] }
0x1049   : > { %7853 = vmatprep.subr.bf16.mxu0 %v7701_v5  ;;  %7896 = vmatprep.subr.bf16.mxu1 %v7703_v6  ;;  %v8130_v5 = vld [vmem:[#allocation4 + $0x1a8] sm:$0xff]  ;;  %v8132_v6 = vld [vmem:[#allocation4 + $0x1b8] sm:$0xff] }
0x104a   : > { %7883 = vmatprep.mubr.bf16.mxu0 %v10721_v44  ;;  %7926 = vmatprep.mubr.bf16.mxu1 %v10721_v44  ;;  %v8105_v44 = vld [vmem:[#allocation4 + $0xe0] sm:$0xff] }
0x104c   : > { %7854 = vmatpush1.bf16.msra.mxu0 %v7700_v7  ;;  %7897 = vmatpush1.bf16.msra.mxu1 %v7702_v8  ;;  %v8129_v7 = vld [vmem:[#allocation4 + $0x1a0] sm:$0xff]  ;;  %v8131_v8 = vld [vmem:[#allocation4 + $0x1b0] sm:$0xff] }
0x104d   : > { %7855 = vmatprep.subr.bf16.mxu0 %v7709_v9  ;;  %7898 = vmatprep.subr.bf16.mxu1 %v7711_v11  ;;  %v8134_v9 = vld [vmem:[#allocation4 + $0x1c8] sm:$0xff]  ;;  %v8136_v11 = vld [vmem:[#allocation4 + $0x1d8] sm:$0xff] }
0x1050   : > { %7856 = vmatpush1.bf16.msra.mxu0 %v7708_v12  ;;  %7899 = vmatpush1.bf16.msra.mxu1 %v7710_v13  ;;  %v8133_v12 = vld [vmem:[#allocation4 + $0x1c0] sm:$0xff]  ;;  %v8135_v13 = vld [vmem:[#allocation4 + $0x1d0] sm:$0xff] }
0x1051   : > { %7857 = vmatprep.subr.bf16.mxu0 %v7717_v14  ;;  %7900 = vmatprep.subr.bf16.mxu1 %v7719_v15  ;;  %v8138_v14 = vld [vmem:[#allocation4 + $0x1e8] sm:$0xff]  ;;  %v8140_v15 = vld [vmem:[#allocation4 + $0x1f8] sm:$0xff] }
0x1054   : > { %7858 = vmatpush1.bf16.msra.mxu0 %v7716_v16  ;;  %7901 = vmatpush1.bf16.msra.mxu1 %v7718_v18  ;;  %v8137_v16 = vld [vmem:[#allocation4 + $0x1e0] sm:$0xff]  ;;  %v8139_v18 = vld [vmem:[#allocation4 + $0x1f0] sm:$0xff] }
0x1055   : > { %8355 = vmatprep.subr.bf16.mxu0 %v8078_v17  ;;  %8527 = vmatprep.subr.bf16.mxu1 %v8080_v24  ;;  %v8142_v17 = vld [vmem:[#allocation4 + $0x208] sm:$0xff]  ;;  %v8144_v24 = vld [vmem:[#allocation4 + $0x218] sm:$0xff] }
0x1057   : > { %9384 = vmatmul.mubr.msk.bf16.vlgmr.msra.gmra.mrb[4].mxu0 %vm7643_vm8, %v7687_v2  ;;  %9385 = vmatmul.mubr.msk.bf16.vlgmr.msra.gmra.mrb[4].mxu1 %vm7643_vm8, %v7687_v2  ;;  %v8128_v2 = vld [vmem:[#allocation4 + $0x198] sm:$0xff] }
0x1058   : > { %8356 = vmatpush1.bf16.msra.mxu0 %v8077_v19  ;;  %8528 = vmatpush1.bf16.msra.mxu1 %v8079_v27  ;;  %v7722_v19 = vlaneseq }
0x1059   : > { %8357 = vmatprep.subr.bf16.mxu0 %v8082_v20  ;;  %8529 = vmatprep.subr.bf16.mxu1 %v8084_v21 }
0x105a   : > { %v7723_v27 = vshrl.u32 %v7722_v19, 7 }
0x105c   : > { %8358 = vmatpush1.bf16.msra.mxu0 %v8081_v22  ;;  %8530 = vmatpush1.bf16.msra.mxu1 %v8083_v23  ;;  %v13247_v20 = vsub.s32 0, %v7723_v27  ;;  %v13249_v21 = vsub.s32 2, %v7723_v27  ;;  %v13254_v22 = vld [vmem:[%s13515_s6] sm:$0xff]  ;;  %v13256_v23 = vsub.s32 1, %v7723_v27 }
0x105d   : > { %8359 = vmatprep.subr.bf16.mxu0 %v8086_v25  ;;  %8531 = vmatprep.subr.bf16.mxu1 %v8088_v26  ;;  %v13258_v25 = vsub.s32 3, %v7723_v27 }
0x105e   : > { %v7725_v26 = vrot.slane %v13254_v22, %v13247_v20 }
0x1060   : > { %8360 = vmatpush1.bf16.msra.mxu0 %v8085_v28  ;;  %8532 = vmatpush1.bf16.msra.mxu1 %v8087_v29  ;;  %v13262_v28 = vld [vmem:[#allocation27] sm:$0xff]  ;;  %v7733_v29 = vrot.slane %v13254_v22, %v13249_v21 }
0x1061   : > { %8361 = vmatprep.subr.bf16.mxu0 %v8090_v30  ;;  %8533 = vmatprep.subr.bf16.mxu1 %v8092_v31  ;;  %v13266_v30 = vld [vmem:[#allocation29] sm:$0xff]  ;;  %v7729_v31 = vrot.slane %v13254_v22, %v13256_v23 }
0x1064   : > { %8362 = vmatpush1.bf16.msra.mxu0 %v8089_v32  ;;  %8534 = vmatpush1.bf16.msra.mxu1 %v8091_v33  ;;  %v7737_v32 = vrot.slane %v13254_v22, %v13258_v25 }
0x1065   : > { %8363 = vmatprep.subr.bf16.mxu0 %v8094_v34  ;;  %8535 = vmatprep.subr.bf16.mxu1 %v8096_v35  ;;  %v7958_v34 = vrot.slane %v13262_v28, %v13247_v20 }
0x1068   : > { %8364 = vmatpush1.bf16.msra.mxu0 %v8093_v39  ;;  %8536 = vmatpush1.bf16.msra.mxu1 %v8095_v36  ;;  %v7966_v39 = vrot.slane %v13262_v28, %v13249_v21  ;;  %v7962_v36 = vrot.slane %v13262_v28, %v13256_v23 }
0x1069   : > { %8365 = vmatprep.subr.bf16.mxu0 %v8098_v37  ;;  %8537 = vmatprep.subr.bf16.mxu1 %v8100_v10  ;;  %v7970_v37 = vrot.slane %v13262_v28, %v13258_v25 }
0x106c   : > { %8366 = vmatpush1.bf16.msra.mxu0 %v8097_v38  ;;  %8538 = vmatpush1.bf16.msra.mxu1 %v8099_v59  ;;  %v8016_v38 = vrot.slane %v13266_v30, %v13247_v20 }
0x106d   : > { %8367 = vmatprep.subr.bf16.mxu0 %v8102_v40  ;;  %8539 = vmatprep.subr.bf16.mxu1 %v8104_v58  ;;  %v8024_v40 = vrot.slane %v13266_v30, %v13249_v21 }
0x1070   : > { %8368 = vmatpush1.bf16.msra.mxu0 %v8101_v61  ;;  %8540 = vmatpush1.bf16.msra.mxu1 %v8103_v41 }
0x1071   : > { %8369 = vmatprep.subr.bf16.mxu0 %v8106_v42  ;;  %8541 = vmatprep.subr.bf16.mxu1 %v8108_v43  ;;  %v8020_v42 = vrot.slane %v13266_v30, %v13256_v23 }
0x1074   : > { %8370 = vmatpush1.bf16.msra.mxu0 %v8105_v44  ;;  %8542 = vmatpush1.bf16.msra.mxu1 %v8107_v45  ;;  %v8028_v44 = vrot.slane %v13266_v30, %v13258_v25 }
0x1075   : > { %8371 = vmatprep.subr.bf16.mxu0 %v8110_v46  ;;  %8543 = vmatprep.subr.bf16.mxu1 %v8112_v47 }
0x1078   : > { %8372 = vmatpush1.bf16.msra.mxu0 %v8109_v48  ;;  %8544 = vmatpush1.bf16.msra.mxu1 %v8111_v49 }
0x1079   : > { %8373 = vmatprep.subr.bf16.mxu0 %v8114_v51  ;;  %8545 = vmatprep.subr.bf16.mxu1 %v8116_v52 }
0x107c   : > { %8374 = vmatpush1.bf16.msra.mxu0 %v8113_v53  ;;  %8546 = vmatpush1.bf16.msra.mxu1 %v8115_v54 }
0x107d   : > { %8375 = vmatprep.subr.bf16.mxu0 %v8118_v56  ;;  %8547 = vmatprep.subr.bf16.mxu1 %v8120_v50 }
0x1080   : > { %8376 = vmatpush1.bf16.msra.mxu0 %v8117_v57  ;;  %8548 = vmatpush1.bf16.msra.mxu1 %v8119_v60 }
0x1081   : > { %8377 = vmatprep.subr.bf16.mxu0 %v8122_v3  ;;  %8549 = vmatprep.subr.bf16.mxu1 %v8124_v62 }
0x1084   : > { %8378 = vmatpush1.bf16.msra.mxu0 %v8121_v63  ;;  %8550 = vmatpush1.bf16.msra.mxu1 %v8123_v0 }
0x1085   : > { %8379 = vmatprep.subr.bf16.mxu0 %v8126_v1  ;;  %8551 = vmatprep.subr.bf16.mxu1 %v8128_v2 }
0x1088   : > { %8380 = vmatpush1.bf16.msra.mxu0 %v8125_v4  ;;  %8552 = vmatpush1.bf16.msra.mxu1 %v8127_v55 }
0x1089   : > { %8381 = vmatprep.subr.bf16.mxu0 %v8130_v5  ;;  %8553 = vmatprep.subr.bf16.mxu1 %v8132_v6 }
0x108c   : > { %8382 = vmatpush1.bf16.msra.mxu0 %v8129_v7  ;;  %8554 = vmatpush1.bf16.msra.mxu1 %v8131_v8  ;;  %v7740_v7 = vsub.s32 4, %v7723_v27 }
0x108d   : > { %8383 = vmatprep.subr.bf16.mxu0 %v8134_v9  ;;  %8555 = vmatprep.subr.bf16.mxu1 %v8136_v11  ;;  %v7748_v11 = vsub.s32 6, %v7723_v27 }
0x1090   : > { %8384 = vmatpush1.bf16.msra.mxu0 %v8133_v12  ;;  %8556 = vmatpush1.bf16.msra.mxu1 %v8135_v13  ;;  %v7744_v12 = vsub.s32 5, %v7723_v27 }
0x1091   : > { %8385 = vmatprep.subr.bf16.mxu0 %v8138_v14  ;;  %8557 = vmatprep.subr.bf16.mxu1 %v8140_v15 }
0x1094   : > { %8386 = vmatpush1.bf16.msra.mxu0 %v8137_v16  ;;  %8558 = vmatpush1.bf16.msra.mxu1 %v8139_v18  ;;  %v7752_v16 = vsub.s32 7, %v7723_v27 }
0x1095   : > { %8398 = vmatprep.subr.bf16.mxu0 %v8142_v17  ;;  %8570 = vmatprep.subr.bf16.mxu1 %v8144_v24 }
0x1096   : > { %v7753_v27 = vrot.slane %v13254_v22, %v7752_v16 }
0x111a   : > { %v7799_v33 = vpop.f32.mrb[0].mxu0  ;;  %v7842_v35 = vpop.f32.mrb[0].mxu1 }
0x111b   : > { %v7800_v10 = vadd.f32 %v7799_v33, %v7725_v26  ;;  %v7843_v59 = vadd.f32 %v7842_v35, %v7733_v29  ;;  %v7801_v58 = vpop.f32.mrb[1].mxu0  ;;  %v7844_v61 = vpop.f32.mrb[1].mxu1  ;;  %v7741_v33 = vrot.slane %v13254_v22, %v7740_v7  ;;  %v8141_v35 = vld [vmem:[#allocation4 + $0x200] sm:$0xff] }
0x111c   : > { %v7802_v41 = vadd.f32 %v7801_v58, %v7729_v31  ;;  %v7845_v43 = vadd.f32 %v7844_v61, %v7737_v32  ;;  %v7803_v45 = vpop.f32.mrb[2].mxu0  ;;  %v7846_v46 = vpop.f32.mrb[2].mxu1  ;;  %v8032_v61 = vrot.slane %v13266_v30, %v7740_v7 }
0x111d   : > { %v7937_v47 = vmax.f32 %v7800_v10, 0.0  ;;  %v7939_v48 = vmax.f32 %v7843_v59, 0.0  ;;  %v7804_v49 = vadd.f32 %v7803_v45, %v7725_v26  ;;  %v7847_v51 = vadd.f32 %v7846_v46, %v7733_v29  ;;  %v7805_v52 = vpop.f32.mrb[3].mxu0  ;;  %v7848_v53 = vpop.f32.mrb[3].mxu1  ;;  %v8146_v59 = vld [vmem:[#allocation4 + $0x228] sm:$0xff] }
0x111e   : > { %v7938_v54 = vmax.f32 %v7802_v41, 0.0  ;;  %v7940_v56 = vmax.f32 %v7845_v43, 0.0  ;;  %v7806_v50 = vadd.f32 %v7805_v52, %v7729_v31  ;;  %v7849_v57 = vadd.f32 %v7848_v53, %v7737_v32 }
0x111f   : > { %v7995_v60 = vmul.f32 %v7958_v34, %v7937_v47  ;;  %v7997_v3 = vmul.f32 %v7966_v39, %v7939_v48  ;;  %v7945_v62 = vmax.f32 %v7804_v49, 0.0  ;;  %v7947_v63 = vmax.f32 %v7847_v51, 0.0  ;;  %v8145_v48 = vld [vmem:[#allocation4 + $0x220] sm:$0xff]  ;;  %v8147_v49 = vld [vmem:[#allocation4 + $0x230] sm:$0xff] }
0x1120   : > { %v7996_v0 = vmul.f32 %v7962_v36, %v7938_v54  ;;  %v7998_v1 = vmul.f32 %v7970_v37, %v7940_v56  ;;  %v7946_v2 = vmax.f32 %v7806_v50, 0.0  ;;  %v7948_v4 = vmax.f32 %v7849_v57, 0.0  ;;  %v8150_v50 = vld [vmem:[#allocation4 + $0x248] sm:$0xff] }
0x1121   : > { %v8055_v55 = vadd.f32 %v8024_v40, %v7997_v3  ;;  %v8003_v5 = vmul.f32 %v7958_v34, %v7945_v62  ;;  %v8005_v6 = vmul.f32 %v7966_v39, %v7947_v63  ;;  %v8053_v13 = vadd.f32 %v8016_v38, %v7995_v60  ;;  %v8143_v39 = vld [vmem:[#allocation4 + $0x210] sm:$0xff] }
0x1122   : > { %v8004_v8 = vmul.f32 %v7962_v36, %v7946_v2  ;;  %v8006_v9 = vmul.f32 %v7970_v37, %v7948_v4  ;;  %v8054_v18 = vadd.f32 %v8020_v42, %v7996_v0  ;;  %v8056_v17 = vadd.f32 %v8028_v44, %v7998_v1 }
0x1123   : > { %v8061_v14 = vadd.f32 %v8016_v38, %v8003_v5  ;;  %v8063_v15 = vadd.f32 %v8024_v40, %v8005_v6  ;;  %v7749_v34 = vrot.slane %v13254_v22, %v7748_v11  ;;  %v7745_v36 = vrot.slane %v13254_v22, %v7744_v12  ;;  %v8148_v40 = vld [vmem:[#allocation4 + $0x238] sm:$0xff] }
0x1124   : > { %v8062_v24 = vadd.f32 %v8020_v42, %v8004_v8  ;;  %v8064_v19 = vadd.f32 %v8028_v44, %v8006_v9  ;;  %v7974_v37 = vrot.slane %v13262_v28, %v7740_v7  ;;  %v7982_v10 = vrot.slane %v13262_v28, %v7748_v11  ;;  %v8149_v8 = vld [vmem:[#allocation4 + $0x240] sm:$0xff] }
0x1125   : > { %v8069_v26 = vpack.c.bf16 %v8061_v14, %v8053_v13  ;;  %v13288_v29 = vpack.c.bf16 %v8063_v15, %v8055_v55  ;;  %v7978_v38 = vrot.slane %v13262_v28, %v7744_v12  ;;  %v8040_v42 = vrot.slane %v13266_v30, %v7748_v11  ;;  %v8151_v14 = vld [vmem:[#allocation4 + $0x250] sm:$0xff]  ;;  %v8154_v15 = vld [vmem:[#allocation4 + $0x268] sm:$0xff] }
0x1126   : > { %v8070_v31 = vpack.c.bf16 %v8062_v24, %v8054_v18  ;;  %v8072_v32 = vpack.c.bf16 %v8064_v19, %v8056_v17  ;;  %v7986_v22 = vrot.slane %v13262_v28, %v7752_v16  ;;  %v8036_v46 = vrot.slane %v13266_v30, %v7744_v12  ;;  %v8152_v28 = vld [vmem:[#allocation4 + $0x258] sm:$0xff] }
0x1127   : > { %v8044_v53 = vrot.slane %v13266_v30, %v7752_v16  ;;  %v8156_v19 = vld [vmem:[#allocation4 + $0x278] sm:$0xff] }
0x1128   : > { %8387 = vmatprep.mubr.bf16.mxu0 %v8070_v31  ;;  %8559 = vmatprep.mubr.bf16.mxu1 %v8070_v31 }
0x1129   : > { %8388 = vmatmul.mubr.bf16.vlgmr.msra.gmra.mrb[8].mxu0 %v8069_v26  ;;  %8560 = vmatmul.mubr.bf16.vlgmr.msra.gmra.mrb[8].mxu1 %v8069_v26 }
0x112a   : > { %v7885_v58 = vpop.f32.mrb[4].mxu0  ;;  %v7928_v41 = vpop.f32.mrb[4].mxu1  ;;  %8399 = vmatpush1.bf16.msra.mxu0 %v8141_v35  ;;  %8571 = vmatpush1.bf16.msra.mxu1 %v8143_v39  ;;  %v8153_v39 = vld [vmem:[#allocation4 + $0x260] sm:$0xff] }
0x112b   : > { %v7886_v43 = vadd.f32 %v7885_v58, %v7741_v33  ;;  %v7929_v44 = vadd.f32 %v7928_v41, %v7749_v34  ;;  %v7887_v45 = vpop.f32.mrb[5].mxu0  ;;  %v7930_v47 = vpop.f32.mrb[5].mxu1  ;;  %8430 = vmatprep.mubr.bf16.mxu0 %v8072_v32  ;;  %8602 = vmatprep.mubr.bf16.mxu1 %v8072_v32 }
0x112c   : > { %v7888_v51 = vadd.f32 %v7887_v45, %v7745_v36  ;;  %v7931_v52 = vadd.f32 %v7930_v47, %v7753_v27  ;;  %v7889_v54 = vpop.f32.mrb[6].mxu0  ;;  %v7932_v56 = vpop.f32.mrb[6].mxu1  ;;  %8400 = vmatprep.subr.bf16.mxu0 %v8146_v59  ;;  %8572 = vmatprep.subr.bf16.mxu1 %v8148_v40  ;;  %v8155_v59 = vld [vmem:[#allocation4 + $0x270] sm:$0xff]  ;;  %v8158_v40 = vld [vmem:[#allocation4 + $0x288] sm:$0xff]  ;;  %v8168_v47 = vld [vmem:[#allocation4 + $0x2d8] sm:$0xff] }
0x112d   : > { %v7941_v57 = vmax.f32 %v7886_v43, 0.0  ;;  %v7943_v60 = vmax.f32 %v7929_v44, 0.0  ;;  %v7890_v3 = vadd.f32 %v7889_v54, %v7741_v33  ;;  %v7933_v62 = vadd.f32 %v7932_v56, %v7749_v34  ;;  %v7891_v63 = vpop.f32.mrb[7].mxu0  ;;  %v7934_v0 = vpop.f32.mrb[7].mxu1  ;;  %v8164_v43 = vld [vmem:[#allocation4 + $0x2b8] sm:$0xff]  ;;  %v8161_v44 = vld [vmem:[#allocation4 + $0x2a0] sm:$0xff] }
0x112e   : > { %v7942_v1 = vmax.f32 %v7888_v51, 0.0  ;;  %v7944_v2 = vmax.f32 %v7931_v52, 0.0  ;;  %v7892_v4 = vadd.f32 %v7891_v63, %v7745_v36  ;;  %v7935_v55 = vadd.f32 %v7934_v0, %v7753_v27  ;;  %8401 = vmatpush1.bf16.msra.mxu0 %v8145_v48  ;;  %8573 = vmatpush1.bf16.msra.mxu1 %v8147_v49  ;;  %v8163_v45 = vld [vmem:[#allocation4 + $0x2b0] sm:$0xff]  ;;  %v8165_v48 = vld [vmem:[#allocation4 + $0x2c0] sm:$0xff]  ;;  %v8170_v51 = vld [vmem:[#allocation4 + $0x2e8] sm:$0xff] }
0x112f   : > { %v7999_v5 = vmul.f32 %v7974_v37, %v7941_v57  ;;  %v8001_v30 = vmul.f32 %v7982_v10, %v7943_v60  ;;  %v7949_v6 = vmax.f32 %v7890_v3, 0.0  ;;  %v7951_v7 = vmax.f32 %v7933_v62, 0.0  ;;  %8402 = vmatprep.subr.bf16.mxu0 %v8150_v50  ;;  %8574 = vmatprep.subr.bf16.mxu1 %v8152_v28  ;;  %v8167_v49 = vld [vmem:[#allocation4 + $0x2d0] sm:$0xff]  ;;  %v8172_v52 = vld [vmem:[#allocation4 + $0x2f8] sm:$0xff]  ;;  %v8174_v56 = vld [vmem:[#allocation4 + $0x308] sm:$0xff] }
0x1130   : > { %v8000_v9 = vmul.f32 %v7978_v38, %v7942_v1  ;;  %v8002_v11 = vmul.f32 %v7986_v22, %v7944_v2  ;;  %v7950_v12 = vmax.f32 %v7892_v4, 0.0  ;;  %v7952_v13 = vmax.f32 %v7935_v55, 0.0  ;;  %v8171_v54 = vld [vmem:[#allocation4 + $0x2f0] sm:$0xff]  ;;  %v8176_v50 = vld [vmem:[#allocation4 + $0x318] sm:$0xff]  ;;  %v8173_v28 = vld [vmem:[#allocation4 + $0x300] sm:$0xff] }
0x1131   : > { %v8057_v16 = vadd.f32 %v8032_v61, %v7999_v5  ;;  %v8059_v18 = vadd.f32 %v8040_v42, %v8001_v30  ;;  %v8007_v17 = vmul.f32 %v7974_v37, %v7949_v6  ;;  %v8009_v24 = vmul.f32 %v7982_v10, %v7951_v7  ;;  %v8160_v10 = vld [vmem:[#allocation4 + $0x298] sm:$0xff]  ;;  %v8175_v57 = vld [vmem:[#allocation4 + $0x310] sm:$0xff]  ;;  %v8178_v60 = vld [vmem:[#allocation4 + $0x328] sm:$0xff] }
0x1132   : > { %v8058_v26 = vadd.f32 %v8036_v46, %v8000_v9  ;;  %v8060_v31 = vadd.f32 %v8044_v53, %v8002_v11  ;;  %v8008_v32 = vmul.f32 %v7978_v38, %v7950_v12  ;;  %v8010_v33 = vmul.f32 %v7986_v22, %v7952_v13  ;;  %8403 = vmatpush1.bf16.msra.mxu0 %v8149_v8  ;;  %v8162_v22 = vld [vmem:[#allocation4 + $0x2a8] sm:$0xff]  ;;  %v8180_v3 = vld [vmem:[#allocation4 + $0x338] sm:$0xff]  ;;  %v8177_v62 = vld [vmem:[#allocation4 + $0x320] sm:$0xff] }
0x1133   : > { %v8065_v34 = vadd.f32 %v8032_v61, %v8007_v17  ;;  %v8067_v35 = vadd.f32 %v8040_v42, %v8009_v24  ;;  %8575 = vmatpush1.bf16.msra.mxu1 %v8151_v14  ;;  %8404 = vmatprep.subr.bf16.mxu0 %v8154_v15  ;;  %v8157_v61 = vld [vmem:[#allocation4 + $0x280] sm:$0xff]  ;;  %v8159_v42 = vld [vmem:[#allocation4 + $0x290] sm:$0xff]  ;;  %v8182_v0 = vld [vmem:[#allocation4 + $0x348] sm:$0xff] }
0x1134   : > { %v8066_v36 = vadd.f32 %v8036_v46, %v8008_v32  ;;  %v8068_v27 = vadd.f32 %v8044_v53, %v8010_v33  ;;  %8576 = vmatprep.subr.bf16.mxu1 %v8156_v19  ;;  %v8166_v46 = vld [vmem:[#allocation4 + $0x2c8] sm:$0xff]  ;;  %v8169_v53 = vld [vmem:[#allocation4 + $0x2e0] sm:$0xff]  ;;  %v8179_v63 = vld [vmem:[#allocation4 + $0x330] sm:$0xff] }
0x1135   : > { %v13302_v58 = vpack.c.bf16 %v8065_v34, %v8057_v16  ;;  %v13304_v37 = vpack.c.bf16 %v8067_v35, %v8059_v18  ;;  %v8184_v1 = vld [vmem:[#allocation4 + $0x358] sm:$0xff]  ;;  %v8181_v2 = vld [vmem:[#allocation4 + $0x340] sm:$0xff]  ;;  %v8183_v4 = vld [vmem:[#allocation4 + $0x350] sm:$0xff] }
0x1136   : > { %8405 = vmatpush1.bf16.msra.mxu0 %v8153_v39  ;;  %v13306_v41 = vpack.c.bf16 %v8066_v36, %v8058_v26  ;;  %v13308_v38 = vpack.c.bf16 %v8068_v27, %v8060_v31  ;;  %v8186_v55 = vld [vmem:[#allocation4 + $0x368] sm:$0xff]  ;;  %v8188_v5 = vld [vmem:[#allocation4 + $0x378] sm:$0xff]  ;;  %v8185_v30 = vld [vmem:[#allocation4 + $0x360] sm:$0xff] }
0x1137   : > { %8577 = vmatpush1.bf16.msra.mxu1 %v8155_v59  ;;  %8406 = vmatprep.subr.bf16.mxu0 %v8158_v40  ;;  %v8187_v6 = vld [vmem:[#allocation4 + $0x370] sm:$0xff]  ;;  %v8190_v7 = vld [vmem:[#allocation4 + $0x388] sm:$0xff]  ;;  %v8192_v8 = vld [vmem:[#allocation4 + $0x398] sm:$0xff] }
0x1138   : > { %8578 = vmatprep.subr.bf16.mxu1 %v8160_v10  ;;  %v8189_v9 = vld [vmem:[#allocation4 + $0x380] sm:$0xff]  ;;  %v8191_v11 = vld [vmem:[#allocation4 + $0x390] sm:$0xff]  ;;  %v8194_v12 = vld [vmem:[#allocation4 + $0x3a8] sm:$0xff] }
0x1139   : > { %v8196_v13 = vld [vmem:[#allocation4 + $0x3b8] sm:$0xff]  ;;  %v8193_v14 = vld [vmem:[#allocation4 + $0x3a0] sm:$0xff]  ;;  %v8195_v15 = vld [vmem:[#allocation4 + $0x3b0] sm:$0xff] }
0x113a   : > { %8407 = vmatpush1.bf16.msra.mxu0 %v8157_v61  ;;  %v8198_v16 = vld [vmem:[#allocation4 + $0x3c8] sm:$0xff]  ;;  %v8200_v18 = vld [vmem:[#allocation4 + $0x3d8] sm:$0xff]  ;;  %v8197_v17 = vld [vmem:[#allocation4 + $0x3c0] sm:$0xff] }
0x113b   : > { %8579 = vmatpush1.bf16.msra.mxu1 %v8159_v42  ;;  %8408 = vmatprep.subr.bf16.mxu0 %v8162_v22  ;;  %v8199_v24 = vld [vmem:[#allocation4 + $0x3d0] sm:$0xff]  ;;  %v8202_v19 = vld [vmem:[#allocation4 + $0x3e8] sm:$0xff]  ;;  %v8204_v26 = vld [vmem:[#allocation4 + $0x3f8] sm:$0xff] }
0x113c   : > { %8580 = vmatprep.subr.bf16.mxu1 %v8164_v43  ;;  %v8201_v31 = vld [vmem:[#allocation4 + $0x3e0] sm:$0xff]  ;;  %v8203_v32 = vld [vmem:[#allocation4 + $0x3f0] sm:$0xff]  ;;  %v8206_v33 = vld [vmem:[#allocation4 + $0x408] sm:$0xff] }
0x113d   : > { %v8208_v34 = vld [vmem:[#allocation4 + $0x418] sm:$0xff]  ;;  %v8205_v35 = vld [vmem:[#allocation4 + $0x400] sm:$0xff]  ;;  %v8207_v39 = vld [vmem:[#allocation4 + $0x410] sm:$0xff] }
0x113e   : > { %8409 = vmatpush1.bf16.msra.mxu0 %v8161_v44  ;;  %v8210_v36 = vld [vmem:[#allocation4 + $0x428] sm:$0xff]  ;;  %v8212_v27 = vld [vmem:[#allocation4 + $0x438] sm:$0xff]  ;;  %v8209_v59 = vld [vmem:[#allocation4 + $0x420] sm:$0xff] }
0x113f   : > { %8581 = vmatpush1.bf16.msra.mxu1 %v8163_v45  ;;  %8410 = vmatprep.subr.bf16.mxu0 %v8166_v46  ;;  %v8211_v40 = vld [vmem:[#allocation4 + $0x430] sm:$0xff]  ;;  %v8214_v10 = vld [vmem:[#allocation4 + $0x448] sm:$0xff]  ;;  %v8216_v61 = vld [vmem:[#allocation4 + $0x458] sm:$0xff] }
0x1140   : > { %8582 = vmatprep.subr.bf16.mxu1 %v8168_v47  ;;  %v8213_v42 = vld [vmem:[#allocation4 + $0x440] sm:$0xff]  ;;  %v8215_v22 = vld [vmem:[#allocation4 + $0x450] sm:$0xff]  ;;  %v8220_v43 = vld [vmem:[#allocation4 + $0x478] sm:$0xff] }
0x1141   : > { %v8217_v44 = vld [vmem:[#allocation4 + $0x460] sm:$0xff]  ;;  %v8219_v45 = vld [vmem:[#allocation4 + $0x470] sm:$0xff]  ;;  %v8224_v46 = vld [vmem:[#allocation4 + $0x498] sm:$0xff] }
0x1142   : > { %8411 = vmatpush1.bf16.msra.mxu0 %v8165_v48  ;;  %v8221_v47 = vld [vmem:[#allocation4 + $0x480] sm:$0xff]  ;;  %v8223_v48 = vld [vmem:[#allocation4 + $0x490] sm:$0xff] }
0x1143   : > { %8583 = vmatpush1.bf16.msra.mxu1 %v8167_v49  ;;  %8412 = vmatprep.subr.bf16.mxu0 %v8170_v51  ;;  %v8226_v49 = vld [vmem:[#allocation4 + $0x4a8] sm:$0xff]  ;;  %v8228_v51 = vld [vmem:[#allocation4 + $0x4b8] sm:$0xff] }
0x1144   : > { %8584 = vmatprep.subr.bf16.mxu1 %v8172_v52  ;;  %v8225_v52 = vld [vmem:[#allocation4 + $0x4a0] sm:$0xff] }
0x1146   : > { %8413 = vmatpush1.bf16.msra.mxu0 %v8169_v53  ;;  %v8227_v53 = vld [vmem:[#allocation4 + $0x4b0] sm:$0xff] }
0x1147   : > { %8585 = vmatpush1.bf16.msra.mxu1 %v8171_v54  ;;  %8414 = vmatprep.subr.bf16.mxu0 %v8174_v56  ;;  %v8230_v54 = vld [vmem:[#allocation4 + $0x4c8] sm:$0xff]  ;;  %v8232_v56 = vld [vmem:[#allocation4 + $0x4d8] sm:$0xff] }
0x1148   : > { %8586 = vmatprep.subr.bf16.mxu1 %v8176_v50  ;;  %v8229_v50 = vld [vmem:[#allocation4 + $0x4c0] sm:$0xff] }
0x114a   : > { %8415 = vmatpush1.bf16.msra.mxu0 %v8173_v28  ;;  %v8231_v28 = vld [vmem:[#allocation4 + $0x4d0] sm:$0xff] }
0x114b   : > { %8587 = vmatpush1.bf16.msra.mxu1 %v8175_v57  ;;  %8416 = vmatprep.subr.bf16.mxu0 %v8178_v60  ;;  %v8234_v57 = vld [vmem:[#allocation4 + $0x4e8] sm:$0xff]  ;;  %v8236_v60 = vld [vmem:[#allocation4 + $0x4f8] sm:$0xff] }
0x114c   : > { %8588 = vmatprep.subr.bf16.mxu1 %v8180_v3  ;;  %v8233_v3 = vld [vmem:[#allocation4 + $0x4e0] sm:$0xff] }
0x114e   : > { %8417 = vmatpush1.bf16.msra.mxu0 %v8177_v62  ;;  %v8235_v62 = vld [vmem:[#allocation4 + $0x4f0] sm:$0xff] }
0x114f   : > { %8589 = vmatpush1.bf16.msra.mxu1 %v8179_v63  ;;  %8418 = vmatprep.subr.bf16.mxu0 %v8182_v0  ;;  %v8238_v63 = vld [vmem:[#allocation4 + $0x508] sm:$0xff]  ;;  %v8240_v0 = vld [vmem:[#allocation4 + $0x518] sm:$0xff] }
0x1150   : > { %8590 = vmatprep.subr.bf16.mxu1 %v8184_v1  ;;  %v8237_v1 = vld [vmem:[#allocation4 + $0x500] sm:$0xff] }
0x1152   : > { %8419 = vmatpush1.bf16.msra.mxu0 %v8181_v2  ;;  %v8239_v2 = vld [vmem:[#allocation4 + $0x510] sm:$0xff] }
0x1153   : > { %8591 = vmatpush1.bf16.msra.mxu1 %v8183_v4  ;;  %8420 = vmatprep.subr.bf16.mxu0 %v8186_v55  ;;  %v8242_v4 = vld [vmem:[#allocation4 + $0x528] sm:$0xff]  ;;  %v8244_v55 = vld [vmem:[#allocation4 + $0x538] sm:$0xff] }
0x1154   : > { %8592 = vmatprep.subr.bf16.mxu1 %v8188_v5  ;;  %v8241_v5 = vld [vmem:[#allocation4 + $0x520] sm:$0xff] }
0x1156   : > { %8421 = vmatpush1.bf16.msra.mxu0 %v8185_v30  ;;  %v8243_v30 = vld [vmem:[#allocation4 + $0x530] sm:$0xff] }
0x1157   : > { %8593 = vmatpush1.bf16.msra.mxu1 %v8187_v6  ;;  %8422 = vmatprep.subr.bf16.mxu0 %v8190_v7  ;;  %v8246_v6 = vld [vmem:[#allocation4 + $0x548] sm:$0xff]  ;;  %v8248_v7 = vld [vmem:[#allocation4 + $0x558] sm:$0xff] }
0x1158   : > { %8594 = vmatprep.subr.bf16.mxu1 %v8192_v8  ;;  %v8245_v8 = vld [vmem:[#allocation4 + $0x540] sm:$0xff] }
0x115a   : > { %8423 = vmatpush1.bf16.msra.mxu0 %v8189_v9  ;;  %v8247_v9 = vld [vmem:[#allocation4 + $0x550] sm:$0xff] }
0x115b   : > { %8595 = vmatpush1.bf16.msra.mxu1 %v8191_v11  ;;  %8424 = vmatprep.subr.bf16.mxu0 %v8194_v12  ;;  %v8250_v11 = vld [vmem:[#allocation4 + $0x568] sm:$0xff]  ;;  %v8252_v12 = vld [vmem:[#allocation4 + $0x578] sm:$0xff] }
0x115c   : > { %8596 = vmatprep.subr.bf16.mxu1 %v8196_v13  ;;  %v8249_v13 = vld [vmem:[#allocation4 + $0x560] sm:$0xff] }
0x115e   : > { %8425 = vmatpush1.bf16.msra.mxu0 %v8193_v14  ;;  %v8251_v14 = vld [vmem:[#allocation4 + $0x570] sm:$0xff] }
0x115f   : > { %8597 = vmatpush1.bf16.msra.mxu1 %v8195_v15  ;;  %8426 = vmatprep.subr.bf16.mxu0 %v8198_v16  ;;  %v8254_v15 = vld [vmem:[#allocation4 + $0x588] sm:$0xff]  ;;  %v8256_v16 = vld [vmem:[#allocation4 + $0x598] sm:$0xff] }
0x1160   : > { %8598 = vmatprep.subr.bf16.mxu1 %v8200_v18  ;;  %v8253_v18 = vld [vmem:[#allocation4 + $0x580] sm:$0xff] }
0x1162   : > { %8427 = vmatpush1.bf16.msra.mxu0 %v8197_v17  ;;  %v8255_v17 = vld [vmem:[#allocation4 + $0x590] sm:$0xff] }
0x1163   : > { %8599 = vmatpush1.bf16.msra.mxu1 %v8199_v24  ;;  %8428 = vmatprep.subr.bf16.mxu0 %v8202_v19  ;;  %v8258_v24 = vld [vmem:[#allocation4 + $0x5a8] sm:$0xff]  ;;  %v8260_v19 = vld [vmem:[#allocation4 + $0x5b8] sm:$0xff] }
0x1164   : > { %8600 = vmatprep.subr.bf16.mxu1 %v8204_v26  ;;  %v8257_v26 = vld [vmem:[#allocation4 + $0x5a0] sm:$0xff] }
0x1166   : > { %8429 = vmatpush1.bf16.msra.mxu0 %v8201_v31  ;;  %v8259_v31 = vld [vmem:[#allocation4 + $0x5b0] sm:$0xff] }
0x1167   : > { %8601 = vmatpush1.bf16.msra.mxu1 %v8203_v32  ;;  %8441 = vmatprep.subr.bf16.mxu0 %v8206_v33  ;;  %v8262_v32 = vld [vmem:[#allocation4 + $0x5c8] sm:$0xff]  ;;  %v8264_v33 = vld [vmem:[#allocation4 + $0x5d8] sm:$0xff] }
0x1168   : > { %8613 = vmatprep.subr.bf16.mxu1 %v8208_v34  ;;  %v8261_v34 = vld [vmem:[#allocation4 + $0x5c0] sm:$0xff] }
0x1169   : > { %8431 = vmatmul.mubr.bf16.vlgmr.msra.gmra.mrb[8].mxu0 %v13288_v29 }
0x116a   : > { %8603 = vmatmul.mubr.bf16.vlgmr.msra.gmra.mrb[8].mxu1 %v13288_v29  ;;  %8442 = vmatpush1.bf16.msra.mxu0 %v8205_v35  ;;  %v8218_v29 = vld [vmem:[#allocation4 + $0x468] sm:$0xff]  ;;  %v8263_v35 = vld [vmem:[#allocation4 + $0x5d0] sm:$0xff] }
0x116b   : > { %8473 = vmatprep.mubr.bf16.mxu0 %v13306_v41  ;;  %8614 = vmatpush1.bf16.msra.mxu1 %v8207_v39  ;;  %v8266_v39 = vld [vmem:[#allocation4 + $0x5e8] sm:$0xff] }
0x116c   : > { %8645 = vmatprep.mubr.bf16.mxu1 %v13306_v41  ;;  %8443 = vmatprep.subr.bf16.mxu0 %v8210_v36  ;;  %v8222_v41 = vld [vmem:[#allocation4 + $0x488] sm:$0xff]  ;;  %v8268_v36 = vld [vmem:[#allocation4 + $0x5f8] sm:$0xff] }
0x116d   : > { %8615 = vmatprep.subr.bf16.mxu1 %v8212_v27  ;;  %v8265_v27 = vld [vmem:[#allocation4 + $0x5e0] sm:$0xff] }
0x116e   : > { %8444 = vmatpush1.bf16.msra.mxu0 %v8209_v59  ;;  %v8267_v59 = vld [vmem:[#allocation4 + $0x5f0] sm:$0xff] }
0x116f   : > { %8616 = vmatpush1.bf16.msra.mxu1 %v8211_v40  ;;  %8445 = vmatprep.subr.bf16.mxu0 %v8214_v10  ;;  %v8270_v40 = vld [vmem:[#allocation4 + $0x608] sm:$0xff]  ;;  %v8272_v10 = vld [vmem:[#allocation4 + $0x618] sm:$0xff] }
0x1170   : > { %8617 = vmatprep.subr.bf16.mxu1 %v8216_v61  ;;  %v8269_v61 = vld [vmem:[#allocation4 + $0x600] sm:$0xff] }
0x1172   : > { %8446 = vmatpush1.bf16.msra.mxu0 %v8213_v42  ;;  %v8271_v42 = vld [vmem:[#allocation4 + $0x610] sm:$0xff] }
0x1173   : > { %8618 = vmatpush1.bf16.msra.mxu1 %v8215_v22  ;;  %8447 = vmatprep.subr.bf16.mxu0 %v8218_v29  ;;  %v8274_v22 = vld [vmem:[#allocation4 + $0x628] sm:$0xff]  ;;  %v8276_v29 = vld [vmem:[#allocation4 + $0x638] sm:$0xff] }
0x1174   : > { %8619 = vmatprep.subr.bf16.mxu1 %v8220_v43  ;;  %v8273_v43 = vld [vmem:[#allocation4 + $0x620] sm:$0xff] }
0x1176   : > { %8448 = vmatpush1.bf16.msra.mxu0 %v8217_v44  ;;  %v8275_v44 = vld [vmem:[#allocation4 + $0x630] sm:$0xff] }
0x1177   : > { %8620 = vmatpush1.bf16.msra.mxu1 %v8219_v45  ;;  %8449 = vmatprep.subr.bf16.mxu0 %v8222_v41  ;;  %v8278_v45 = vld [vmem:[#allocation4 + $0x648] sm:$0xff]  ;;  %v8280_v41 = vld [vmem:[#allocation4 + $0x658] sm:$0xff] }
0x1178   : > { %8621 = vmatprep.subr.bf16.mxu1 %v8224_v46  ;;  %v8277_v46 = vld [vmem:[#allocation4 + $0x640] sm:$0xff] }
0x117a   : > { %8450 = vmatpush1.bf16.msra.mxu0 %v8221_v47  ;;  %v8279_v47 = vld [vmem:[#allocation4 + $0x650] sm:$0xff] }
0x117b   : > { %8622 = vmatpush1.bf16.msra.mxu1 %v8223_v48  ;;  %8451 = vmatprep.subr.bf16.mxu0 %v8226_v49  ;;  %v8284_v48 = vld [vmem:[#allocation4 + $0x678] sm:$0xff]  ;;  %v8281_v49 = vld [vmem:[#allocation4 + $0x660] sm:$0xff] }
0x117c   : > { %8623 = vmatprep.subr.bf16.mxu1 %v8228_v51  ;;  %v8283_v51 = vld [vmem:[#allocation4 + $0x670] sm:$0xff] }
0x117e   : > { %8452 = vmatpush1.bf16.msra.mxu0 %v8225_v52  ;;  %v8288_v52 = vld [vmem:[#allocation4 + $0x698] sm:$0xff] }
0x117f   : > { %8624 = vmatpush1.bf16.msra.mxu1 %v8227_v53  ;;  %8453 = vmatprep.subr.bf16.mxu0 %v8230_v54  ;;  %v8285_v53 = vld [vmem:[#allocation4 + $0x680] sm:$0xff]  ;;  %v8287_v54 = vld [vmem:[#allocation4 + $0x690] sm:$0xff] }
0x1180   : > { %8625 = vmatprep.subr.bf16.mxu1 %v8232_v56  ;;  %v8290_v56 = vld [vmem:[#allocation4 + $0x6a8] sm:$0xff] }
0x1182   : > { %8454 = vmatpush1.bf16.msra.mxu0 %v8229_v50  ;;  %v8292_v50 = vld [vmem:[#allocation4 + $0x6b8] sm:$0xff] }
0x1183   : > { %8626 = vmatpush1.bf16.msra.mxu1 %v8231_v28  ;;  %8455 = vmatprep.subr.bf16.mxu0 %v8234_v57  ;;  %v8289_v28 = vld [vmem:[#allocation4 + $0x6a0] sm:$0xff]  ;;  %v8291_v57 = vld [vmem:[#allocation4 + $0x6b0] sm:$0xff] }
0x1184   : > { %8627 = vmatprep.subr.bf16.mxu1 %v8236_v60  ;;  %v8294_v60 = vld [vmem:[#allocation4 + $0x6c8] sm:$0xff] }
0x1186   : > { %8456 = vmatpush1.bf16.msra.mxu0 %v8233_v3  ;;  %v8296_v3 = vld [vmem:[#allocation4 + $0x6d8] sm:$0xff] }
0x1187   : > { %8628 = vmatpush1.bf16.msra.mxu1 %v8235_v62  ;;  %8457 = vmatprep.subr.bf16.mxu0 %v8238_v63  ;;  %v8293_v62 = vld [vmem:[#allocation4 + $0x6c0] sm:$0xff]  ;;  %v8295_v63 = vld [vmem:[#allocation4 + $0x6d0] sm:$0xff] }
0x1188   : > { %8629 = vmatprep.subr.bf16.mxu1 %v8240_v0  ;;  %v8298_v0 = vld [vmem:[#allocation4 + $0x6e8] sm:$0xff] }
0x118a   : > { %8458 = vmatpush1.bf16.msra.mxu0 %v8237_v1  ;;  %v8300_v1 = vld [vmem:[#allocation4 + $0x6f8] sm:$0xff] }
0x118b   : > { %8630 = vmatpush1.bf16.msra.mxu1 %v8239_v2  ;;  %8459 = vmatprep.subr.bf16.mxu0 %v8242_v4  ;;  %v8297_v2 = vld [vmem:[#allocation4 + $0x6e0] sm:$0xff]  ;;  %v8299_v4 = vld [vmem:[#allocation4 + $0x6f0] sm:$0xff] }
0x118c   : > { %8631 = vmatprep.subr.bf16.mxu1 %v8244_v55  ;;  %v8302_v55 = vld [vmem:[#allocation4 + $0x708] sm:$0xff] }
0x118e   : > { %8460 = vmatpush1.bf16.msra.mxu0 %v8241_v5  ;;  %v8304_v5 = vld [vmem:[#allocation4 + $0x718] sm:$0xff] }
0x118f   : > { %8632 = vmatpush1.bf16.msra.mxu1 %v8243_v30  ;;  %8461 = vmatprep.subr.bf16.mxu0 %v8246_v6  ;;  %v8301_v30 = vld [vmem:[#allocation4 + $0x700] sm:$0xff]  ;;  %v8303_v6 = vld [vmem:[#allocation4 + $0x710] sm:$0xff] }
0x1190   : > { %8633 = vmatprep.subr.bf16.mxu1 %v8248_v7  ;;  %v8306_v7 = vld [vmem:[#allocation4 + $0x728] sm:$0xff] }
0x1192   : > { %8462 = vmatpush1.bf16.msra.mxu0 %v8245_v8  ;;  %v8308_v8 = vld [vmem:[#allocation4 + $0x738] sm:$0xff] }
0x1193   : > { %8634 = vmatpush1.bf16.msra.mxu1 %v8247_v9  ;;  %8463 = vmatprep.subr.bf16.mxu0 %v8250_v11  ;;  %v8305_v9 = vld [vmem:[#allocation4 + $0x720] sm:$0xff]  ;;  %v8307_v11 = vld [vmem:[#allocation4 + $0x730] sm:$0xff] }
0x1194   : > { %8635 = vmatprep.subr.bf16.mxu1 %v8252_v12  ;;  %v8310_v12 = vld [vmem:[#allocation4 + $0x748] sm:$0xff] }
0x1196   : > { %8464 = vmatpush1.bf16.msra.mxu0 %v8249_v13  ;;  %v8312_v13 = vld [vmem:[#allocation4 + $0x758] sm:$0xff] }
0x1197   : > { %8636 = vmatpush1.bf16.msra.mxu1 %v8251_v14  ;;  %8465 = vmatprep.subr.bf16.mxu0 %v8254_v15  ;;  %v8309_v14 = vld [vmem:[#allocation4 + $0x740] sm:$0xff]  ;;  %v8311_v15 = vld [vmem:[#allocation4 + $0x750] sm:$0xff] }
0x1198   : > { %8637 = vmatprep.subr.bf16.mxu1 %v8256_v16  ;;  %v8314_v16 = vld [vmem:[#allocation4 + $0x768] sm:$0xff] }
0x119a   : > { %8466 = vmatpush1.bf16.msra.mxu0 %v8253_v18  ;;  %v8316_v18 = vld [vmem:[#allocation4 + $0x778] sm:$0xff] }
0x119b   : > { %8638 = vmatpush1.bf16.msra.mxu1 %v8255_v17  ;;  %8467 = vmatprep.subr.bf16.mxu0 %v8258_v24  ;;  %v8313_v17 = vld [vmem:[#allocation4 + $0x760] sm:$0xff]  ;;  %v8315_v24 = vld [vmem:[#allocation4 + $0x770] sm:$0xff] }
0x119c   : > { %8639 = vmatprep.subr.bf16.mxu1 %v8260_v19  ;;  %v8318_v19 = vld [vmem:[#allocation4 + $0x788] sm:$0xff] }
0x119e   : > { %8468 = vmatpush1.bf16.msra.mxu0 %v8257_v26  ;;  %v8320_v26 = vld [vmem:[#allocation4 + $0x798] sm:$0xff] }
0x119f   : > { %8640 = vmatpush1.bf16.msra.mxu1 %v8259_v31  ;;  %8469 = vmatprep.subr.bf16.mxu0 %v8262_v32  ;;  %v8317_v31 = vld [vmem:[#allocation4 + $0x780] sm:$0xff]  ;;  %v8319_v32 = vld [vmem:[#allocation4 + $0x790] sm:$0xff] }
0x11a0   : > { %8641 = vmatprep.subr.bf16.mxu1 %v8264_v33  ;;  %v8322_v33 = vld [vmem:[#allocation4 + $0x7a8] sm:$0xff] }
0x11a2   : > { %8470 = vmatpush1.bf16.msra.mxu0 %v8261_v34  ;;  %v8324_v34 = vld [vmem:[#allocation4 + $0x7b8] sm:$0xff] }
0x11a3   : > { %8642 = vmatpush1.bf16.msra.mxu1 %v8263_v35  ;;  %8471 = vmatprep.subr.bf16.mxu0 %v8266_v39  ;;  %v8321_v35 = vld [vmem:[#allocation4 + $0x7a0] sm:$0xff]  ;;  %v8323_v39 = vld [vmem:[#allocation4 + $0x7b0] sm:$0xff] }
0x11a4   : > { %8643 = vmatprep.subr.bf16.mxu1 %v8268_v36  ;;  %v8326_v36 = vld [vmem:[#allocation4 + $0x7c8] sm:$0xff] }
0x11a6   : > { %8472 = vmatpush1.bf16.msra.mxu0 %v8265_v27  ;;  %v8328_v27 = vld [vmem:[#allocation4 + $0x7d8] sm:$0xff] }
0x11a7   : > { %8644 = vmatpush1.bf16.msra.mxu1 %v8267_v59  ;;  %8484 = vmatprep.subr.bf16.mxu0 %v8270_v40  ;;  %v8325_v59 = vld [vmem:[#allocation4 + $0x7c0] sm:$0xff]  ;;  %v8327_v40 = vld [vmem:[#allocation4 + $0x7d0] sm:$0xff] }
0x11a8   : > { %8656 = vmatprep.subr.bf16.mxu1 %v8272_v10  ;;  %v8330_v10 = vld [vmem:[#allocation4 + $0x7e8] sm:$0xff] }
0x11a9   : > { %8474 = vmatmul.mubr.bf16.vlgmr.msra.gmra.mrb[8].mxu0 %v13302_v58 }
0x11aa   : > { %8646 = vmatmul.mubr.bf16.vlgmr.msra.gmra.mrb[8].mxu1 %v13302_v58  ;;  %8485 = vmatpush1.bf16.msra.mxu0 %v8269_v61  ;;  %v8282_v58 = vld [vmem:[#allocation4 + $0x668] sm:$0xff]  ;;  %v8332_v61 = vld [vmem:[#allocation4 + $0x7f8] sm:$0xff] }
0x11ab   : > { %8516 = vmatprep.mubr.bf16.mxu0 %v13308_v38  ;;  %8657 = vmatpush1.bf16.msra.mxu1 %v8271_v42  ;;  %v8329_v42 = vld [vmem:[#allocation4 + $0x7e0] sm:$0xff] }
0x11ac   : > { %8688 = vmatprep.mubr.bf16.mxu1 %v13308_v38  ;;  %8486 = vmatprep.subr.bf16.mxu0 %v8274_v22  ;;  %v8286_v38 = vld [vmem:[#allocation4 + $0x688] sm:$0xff]  ;;  %v8331_v22 = vld [vmem:[#allocation4 + $0x7f0] sm:$0xff] }
0x11ad   : > { %8658 = vmatprep.subr.bf16.mxu1 %v8276_v29  ;;  %v8719_v29 = vld [vmem:[#allocation5 + $0x40] sm:$0xff] }
0x11ae   : > { %8487 = vmatpush1.bf16.msra.mxu0 %v8273_v43  ;;  %v8735_v43 = vld [vmem:[#allocation5 + $0xc0] sm:$0xff] }
0x11af   : > { %8659 = vmatpush1.bf16.msra.mxu1 %v8275_v44  ;;  %8488 = vmatprep.subr.bf16.mxu0 %v8278_v45  ;;  %v8711_v44 = vld [vmem:[#allocation5] sm:$0xff] }
0x11b0   : > { %8660 = vmatprep.subr.bf16.mxu1 %v8280_v41  ;;  %v8727_v45 = vld [vmem:[#allocation5 + $0x80] sm:$0xff]  ;;  %v8720_v41 = vld [vmem:[#allocation5 + $0x48] sm:$0xff] }
0x11b2   : > { %8489 = vmatpush1.bf16.msra.mxu0 %v8277_v46  ;;  %v8736_v46 = vld [vmem:[#allocation5 + $0xc8] sm:$0xff] }
0x11b3   : > { %8661 = vmatpush1.bf16.msra.mxu1 %v8279_v47  ;;  %8490 = vmatprep.subr.bf16.mxu0 %v8282_v58  ;;  %v8712_v47 = vld [vmem:[#allocation5 + $0x8] sm:$0xff] }
0x11b4   : > { %8662 = vmatprep.subr.bf16.mxu1 %v8284_v48  ;;  %v8728_v58 = vld [vmem:[#allocation5 + $0x88] sm:$0xff]  ;;  %v8721_v48 = vld [vmem:[#allocation5 + $0x50] sm:$0xff] }
0x11b6   : > { %8491 = vmatpush1.bf16.msra.mxu0 %v8281_v49  ;;  %v8737_v49 = vld [vmem:[#allocation5 + $0xd0] sm:$0xff] }
0x11b7   : > { %8663 = vmatpush1.bf16.msra.mxu1 %v8283_v51  ;;  %8492 = vmatprep.subr.bf16.mxu0 %v8286_v38  ;;  %v8713_v51 = vld [vmem:[#allocation5 + $0x10] sm:$0xff] }
0x11b8   : > { %8664 = vmatprep.subr.bf16.mxu1 %v8288_v52  ;;  %v8729_v38 = vld [vmem:[#allocation5 + $0x90] sm:$0xff]  ;;  %v8722_v52 = vld [vmem:[#allocation5 + $0x58] sm:$0xff] }
0x11ba   : > { %8493 = vmatpush1.bf16.msra.mxu0 %v8285_v53  ;;  %v8738_v53 = vld [vmem:[#allocation5 + $0xd8] sm:$0xff] }
0x11bb   : > { %8665 = vmatpush1.bf16.msra.mxu1 %v8287_v54  ;;  %8494 = vmatprep.subr.bf16.mxu0 %v8290_v56  ;;  %v8730_v54 = vld [vmem:[#allocation5 + $0x98] sm:$0xff]  ;;  %v8723_v56 = vld [vmem:[#allocation5 + $0x60] sm:$0xff] }
0x11bc   : > { %8666 = vmatprep.subr.bf16.mxu1 %v8292_v50  ;;  %v8739_v50 = vld [vmem:[#allocation5 + $0xe0] sm:$0xff] }
0x11be   : > { %8495 = vmatpush1.bf16.msra.mxu0 %v8289_v28  ;;  %v8715_v28 = vld [vmem:[#allocation5 + $0x20] sm:$0xff] }
0x11bf   : > { %8667 = vmatpush1.bf16.msra.mxu1 %v8291_v57  ;;  %8496 = vmatprep.subr.bf16.mxu0 %v8294_v60  ;;  %v8731_v57 = vld [vmem:[#allocation5 + $0xa0] sm:$0xff]  ;;  %v8724_v60 = vld [vmem:[#allocation5 + $0x68] sm:$0xff] }
0x11c0   : > { %8668 = vmatprep.subr.bf16.mxu1 %v8296_v3  ;;  %v8740_v3 = vld [vmem:[#allocation5 + $0xe8] sm:$0xff] }
0x11c2   : > { %8497 = vmatpush1.bf16.msra.mxu0 %v8293_v62  ;;  %v8716_v62 = vld [vmem:[#allocation5 + $0x28] sm:$0xff] }
0x11c3   : > { %8669 = vmatpush1.bf16.msra.mxu1 %v8295_v63  ;;  %8498 = vmatprep.subr.bf16.mxu0 %v8298_v0  ;;  %v8732_v63 = vld [vmem:[#allocation5 + $0xa8] sm:$0xff]  ;;  %v8725_v0 = vld [vmem:[#allocation5 + $0x70] sm:$0xff] }
0x11c4   : > { %8670 = vmatprep.subr.bf16.mxu1 %v8300_v1  ;;  %v8741_v1 = vld [vmem:[#allocation5 + $0xf0] sm:$0xff] }
0x11c6   : > { %8499 = vmatpush1.bf16.msra.mxu0 %v8297_v2  ;;  %v8717_v2 = vld [vmem:[#allocation5 + $0x30] sm:$0xff] }
0x11c7   : > { %8671 = vmatpush1.bf16.msra.mxu1 %v8299_v4  ;;  %8500 = vmatprep.subr.bf16.mxu0 %v8302_v55  ;;  %v8733_v4 = vld [vmem:[#allocation5 + $0xb0] sm:$0xff]  ;;  %v8726_v55 = vld [vmem:[#allocation5 + $0x78] sm:$0xff] }
0x11c8   : > { %8672 = vmatprep.subr.bf16.mxu1 %v8304_v5  ;;  %v8742_v5 = vld [vmem:[#allocation5 + $0xf8] sm:$0xff] }
0x11ca   : > { %8501 = vmatpush1.bf16.msra.mxu0 %v8301_v30  ;;  %v8718_v30 = vld [vmem:[#allocation5 + $0x38] sm:$0xff] }
0x11cb   : > { %8673 = vmatpush1.bf16.msra.mxu1 %v8303_v6  ;;  %8502 = vmatprep.subr.bf16.mxu0 %v8306_v7  ;;  %v8734_v6 = vld [vmem:[#allocation5 + $0xb8] sm:$0xff]  ;;  %v8333_v7 = vld [vmem:[#allocation30] sm:$0xf] }
0x11cc   : > { %8674 = vmatprep.subr.bf16.mxu1 %v8308_v8  ;;  %v8338_v8 = vrot.slane %v8333_v7, %v13247_v20 }
0x11ce   : > { %8503 = vmatpush1.bf16.msra.mxu0 %v8305_v9  ;;  %v8346_v9 = vrot.slane %v8333_v7, %v13249_v21 }
0x11cf   : > { %8675 = vmatpush1.bf16.msra.mxu1 %v8307_v11  ;;  %8504 = vmatprep.subr.bf16.mxu0 %v8310_v12  ;;  %v8342_v11 = vrot.slane %v8333_v7, %v13256_v23  ;;  %v8350_v12 = vrot.slane %v8333_v7, %v13258_v25 }
0x11d0   : > { %8676 = vmatprep.subr.bf16.mxu1 %v8312_v13 }
0x11d2   : > { %8505 = vmatpush1.bf16.msra.mxu0 %v8309_v14 }
0x11d3   : > { %8677 = vmatpush1.bf16.msra.mxu1 %v8311_v15  ;;  %8506 = vmatprep.subr.bf16.mxu0 %v8314_v16 }
0x11d4   : > { %8678 = vmatprep.subr.bf16.mxu1 %v8316_v18 }
0x11d6   : > { %8507 = vmatpush1.bf16.msra.mxu0 %v8313_v17 }
0x11d7   : > { %8679 = vmatpush1.bf16.msra.mxu1 %v8315_v24  ;;  %8508 = vmatprep.subr.bf16.mxu0 %v8318_v19 }
0x11d8   : > { %8680 = vmatprep.subr.bf16.mxu1 %v8320_v26 }
0x11da   : > { %8509 = vmatpush1.bf16.msra.mxu0 %v8317_v31 }
0x11db   : > { %8681 = vmatpush1.bf16.msra.mxu1 %v8319_v32  ;;  %8510 = vmatprep.subr.bf16.mxu0 %v8322_v33 }
0x11dc   : > { %8682 = vmatprep.subr.bf16.mxu1 %v8324_v34 }
0x11de   : > { %8511 = vmatpush1.bf16.msra.mxu0 %v8321_v35 }
0x11df   : > { %8683 = vmatpush1.bf16.msra.mxu1 %v8323_v39  ;;  %8512 = vmatprep.subr.bf16.mxu0 %v8326_v36 }
0x11e0   : > { %8684 = vmatprep.subr.bf16.mxu1 %v8328_v27 }
0x11e2   : > { %8513 = vmatpush1.bf16.msra.mxu0 %v8325_v59 }
0x11e3   : > { %8685 = vmatpush1.bf16.msra.mxu1 %v8327_v40  ;;  %8514 = vmatprep.subr.bf16.mxu0 %v8330_v10 }
0x11e4   : > { %8686 = vmatprep.subr.bf16.mxu1 %v8332_v61 }
0x11e6   : > { %8515 = vmatpush1.bf16.msra.mxu0 %v8329_v42 }
0x11e7   : > { %8687 = vmatpush1.bf16.msra.mxu1 %v8331_v22  ;;  %9522 = vmatprep.subr.bf16.mxu0 %v8719_v29 }
0x11e8   : > { %9544 = vmatprep.subr.bf16.mxu1 %v8735_v43 }
0x11e9   : > { %8517 = vmatmul.mubr.bf16.vlgmr.msra.gmra.mrb[8].mxu0 %v13304_v37 }
0x11ea   : > { %8689 = vmatmul.mubr.bf16.vlgmr.msra.gmra.mrb[8].mxu1 %v13304_v37  ;;  %9523 = vmatpush3.bf16.msra.mxu0 %v8711_v44  ;;  %v8714_v37 = vld [vmem:[#allocation5 + $0x18] sm:$0xff] }
0x11eb   : > { %9545 = vmatpush3.bf16.msra.mxu1 %v8727_v45  ;;  %9524 = vmatprep.subr.bf16.mxu0 %v8720_v41  ;;  %v9386_v45 = vld [vmem:[#allocation32] ss:$0 sm:$0xff] }
0x11ec   : > { %9546 = vmatprep.subr.bf16.mxu1 %v8736_v46 }
0x11ee   : > { %9525 = vmatpush3.bf16.msra.mxu0 %v8712_v47 }
0x11ef   : > { %9547 = vmatpush3.bf16.msra.mxu1 %v8728_v58  ;;  %9526 = vmatprep.subr.bf16.mxu0 %v8721_v48 }
0x11f0   : > { %9548 = vmatprep.subr.bf16.mxu1 %v8737_v49 }
0x11f2   : > { %9527 = vmatpush3.bf16.msra.mxu0 %v8713_v51 }
0x11f3   : > { %9549 = vmatpush3.bf16.msra.mxu1 %v8729_v38  ;;  %9528 = vmatprep.subr.bf16.mxu0 %v8722_v52 }
0x11f4   : > { %9550 = vmatprep.subr.bf16.mxu1 %v8738_v53 }
0x11f6   : > { %9529 = vmatpush3.bf16.msra.mxu0 %v8714_v37 }
0x11f7   : > { %9551 = vmatpush3.bf16.msra.mxu1 %v8730_v54  ;;  %9530 = vmatprep.subr.bf16.mxu0 %v8723_v56 }
0x11f8   : > { %9552 = vmatprep.subr.bf16.mxu1 %v8739_v50 }
0x11fa   : > { %9531 = vmatpush3.bf16.msra.mxu0 %v8715_v28 }
0x11fb   : > { %9553 = vmatpush3.bf16.msra.mxu1 %v8731_v57  ;;  %9532 = vmatprep.subr.bf16.mxu0 %v8724_v60 }
0x11fc   : > { %9554 = vmatprep.subr.bf16.mxu1 %v8740_v3 }
0x11fe   : > { %9533 = vmatpush3.bf16.msra.mxu0 %v8716_v62 }
0x11ff   : > { %9555 = vmatpush3.bf16.msra.mxu1 %v8732_v63  ;;  %9534 = vmatprep.subr.bf16.mxu0 %v8725_v0 }
0x1200   : > { %9556 = vmatprep.subr.bf16.mxu1 %v8741_v1 }
0x1202   : > { %9535 = vmatpush3.bf16.msra.mxu0 %v8717_v2 }
0x1203   : > { %9557 = vmatpush3.bf16.msra.mxu1 %v8733_v4  ;;  %9536 = vmatprep.subr.bf16.mxu0 %v8726_v55 }
0x1204   : > { %9558 = vmatprep.subr.bf16.mxu1 %v8742_v5 }
0x1206   : > { %9537 = vmatpush3.bf16.msra.mxu0 %v8718_v30 }
0x1207   : > { %9559 = vmatpush3.bf16.msra.mxu1 %v8734_v6 }
0x12bc   : > { %v8518_v13 = vpop.f32.mrb[8].mxu0 }
0x12bd   : > { %v9674_v14 = vadd.f32 %v8518_v13, %v8338_v8  ;;  %v8690_v15 = vpop.f32.mrb[8].mxu1  ;;  %v8520_v16 = vpop.f32.mrb[9].mxu0 }
0x12be   : > { %v9678_v18 = vadd.f32 %v8690_v15, %v8346_v9  ;;  %v9675_v17 = vadd.f32 %v8520_v16, %v8342_v11  ;;  %v8692_v24 = vpop.f32.mrb[9].mxu1  ;;  %v8522_v19 = vpop.f32.mrb[10].mxu0 }
0x12bf   : > { %v9679_v26 = vadd.f32 %v8692_v24, %v8350_v12  ;;  %v9676_v31 = vadd.f32 %v8522_v19, %v8338_v8  ;;  %v8694_v32 = vpop.f32.mrb[10].mxu1  ;;  %v8524_v33 = vpop.f32.mrb[11].mxu0  ;;  %v8699_v21 = vmax.f32 %v9674_v14, 0.0 }
0x12c0   : > { %v9680_v34 = vadd.f32 %v8694_v32, %v8346_v9  ;;  %v9677_v20 = vadd.f32 %v8524_v33, %v8342_v11  ;;  %v8696_v35 = vpop.f32.mrb[11].mxu1  ;;  %v8701_v36 = vmax.f32 %v9678_v18, 0.0  ;;  %v8700_v25 = vmax.f32 %v9675_v17, 0.0 }
0x12c1   : > { %v8703_v39 = vmax.f32 %v9676_v31, 0.0  ;;  %v9681_v23 = vadd.f32 %v8696_v35, %v8350_v12  ;;  %v8702_v40 = vmax.f32 %v9679_v26, 0.0 }
0x12c2   : > { %v8705_v27 = vmax.f32 %v9680_v34, 0.0  ;;  %v8704_v59 = vmax.f32 %v9677_v20, 0.0 }
0x12c3   : > { %v8707_v10 = vpack.c.bf16 %v8703_v39, %v8699_v21  ;;  %v8706_v61 = vmax.f32 %v9681_v23, 0.0 }
0x12c4   : > { %v8709_v42 = vpack.c.bf16 %v8705_v27, %v8701_v36  ;;  %v8708_v22 = vpack.c.bf16 %v8704_v59, %v8700_v25 }
0x12c5   : > { %v8710_v29 = vpack.c.bf16 %v8706_v61, %v8702_v40 }
0x12c6   : > { %8782 = vmatprep.mubr.bf16.mxu0 %v8708_v22 }
0x12c7   : > { %8823 = vmatprep.mubr.bf16.mxu1 %v8710_v29  ;;  %8783 = vmatmul.mubr.bf16.vlgmr.msra.gmra.mrb[12].mxu0 %v8707_v10 }
0x12c8   : > { %8824 = vmatmul.mubr.bf16.vlgmr.msra.gmra.mrb[12].mxu1 %v8709_v42 }
0x139a   : > { %v9538_v43 = vpop.f32.mrb[12].mxu0 }
0x139b   : > { %v9560_v44 = vpop.f32.mrb[12].mxu1  ;;  %v9539_v41 = vpop.f32.mrb[13].mxu0 }
0x139c   : > { %v9540_v46 = vadd.f32 %v9539_v41, %v9538_v43  ;;  %v9561_v47 = vpop.f32.mrb[13].mxu1  ;;  %v9541_v58 = vpop.f32.mrb[14].mxu0 }
0x139d   : > { %v9562_v48 = vadd.f32 %v9561_v47, %v9560_v44  ;;  %v9563_v49 = vpop.f32.mrb[14].mxu1  ;;  %v9542_v51 = vpop.f32.mrb[15].mxu0 }
0x139e   : > { %v8785_v38 = vadd.f32 %v9540_v46, %v9386_v45  ;;  %v9543_v52 = vadd.f32 %v9542_v51, %v9541_v58  ;;  %v9564_v53 = vpop.f32.mrb[15].mxu1 }
0x139f   : > { %v9565_v37 = vadd.f32 %v9564_v53, %v9563_v49 }
0x13a0   : > { %v8826_v54 = vadd.f32 %v9562_v48, %v8785_v38  ;;  %v8788_v56 = vadd.f32 %v9543_v52, %v9386_v45 }
0x13a2   : > { %8832 = vst [vmem:[%s13516_s23] sm:$0xff] %v8826_v54  ;;  %v8829_v50 = vadd.f32 %v9565_v37, %v8788_v56 }
0x13a4   : > { %8833 = vst [vmem:[%s13516_s23 + $0x8] sm:$0xff] %v8829_v50 }
0x13a5 PF: > { %s13517_s28 = sld [smem:[#allocation56_spill]]  ;;  %s13518_s27 = sld [smem:[#allocation52_spill]] }
0x13a6   : > { %s13519_s3 = sld [smem:[#allocation53_spill]]  ;;  %s13520_s7 = sld [smem:[#allocation58_spill]] }
0x13ab   : > { %p52_p13 = scmp.ge.s32.totalorder %s13517_s28, 5  }
0x13ad   :  { %54 = sbr.rel (!%p52_p13) target bundleno = 39 (0x27), region = 404 }
0x13b4   :  { %8845 = vsyncpa [#allocation8], 1 }
0x13b5   :  { %8847 = vsyncpa [#allocation8 + $0x1], 1 }
0x13b6   :  { %8848 = vsyncpa [#allocation10], 1 }
0x13b7   :  { %8850 = vsyncpa [#allocation10 + $0x1], 1 }
0x13b8   :  { %8851 = vsyncpa [#allocation13], 1 }
0x13b9   :  { %8853 = vsyncpa [#allocation13 + $0x1], 1 }
0x13ba   :  { %8854 = vsyncpa [#allocation16], 1 }
0x13bb   :  { %8856 = vsyncpa [#allocation16 + $0x1], 1 }
0x13bc   :  { %8857 = vsyncpa [#allocation19], 1 }
0x13bd   :  { %8859 = vsyncpa [#allocation19 + $0x1], 1 }
0x13be   :  { %8860 = vsyncpa [#allocation22], 1 }
0x13bf   :  { %8862 = vsyncpa [#allocation22 + $0x1], 1 }
0x13c0   :  { %8863 = vsyncpa [#allocation25], 1 }
0x13c1   :  { %8864 = vsyncpa [#allocation28], 1 }
0x13c2   :  { %8865 = vsyncpa [#allocation31], 1 }
0x13c3   :  { %8866 = vsyncmov [#allocation6] }
0x13c6   :  { %s8867_s11 = vpop.sfrf %8866 }
0x13c7   :  { %p9389_p5 = scmp.ne.s32.totalorder %s8867_s11, 0 }
0x13c9   :  { %8871 = shalt.err (%p9389_p5)  }
0x13ca   :  { %8873 = vsyncmov [#allocation6 + $0x1] }
0x13cd   :  { %s8874_s15 = vpop.sfrf %8873 }
0x13ce   :  { %p9390_p0 = scmp.ne.s32.totalorder %s8874_s15, 0 }
0x13d0   :  { %8878 = shalt.err (%p9390_p0)  }
0x13d1   :  { %8880 = vsyncmov [#allocation6 + $0x2] }
0x13d4   :  { %s8881_s17 = vpop.sfrf %8880 }
0x13d5   :  { %p9391_p11 = scmp.ne.s32.totalorder %s8881_s17, 0 }
0x13d7   :  { %8885 = shalt.err (%p9391_p11)  }

</bundles_post_ra>
